<compile_context>
chip_gen: v6e
topology: v6e:2x2x1
jax: 0.10.0
libtpu: 0.0.40
codegen_flags: <defaults>
</compile_context>

<pallas_src>
import functools

import jax
import jax.numpy as jnp
from jax import lax
from jax.experimental import pallas as pl
from jax.experimental.pallas import tpu as pltpu

EPS = 1e-5
LANE = 128
VMEM_LIMIT = 32 * 1024 * 1024  # explicit, safe headroom on v5e/v6e/v7x


# ---------------------------------------------------------------------------
# Kernel 1/2: 3x3 conv (with optional folded BN-affine + ReLU applied to the
# input read) + per-image channel statistics of the raw conv output.
# One grid step == one image.
# ---------------------------------------------------------------------------
def _conv3x3_stats_kernel(x_ref, scale_ref, shift_ref, w_ref,
                          a_ref, stats_ref, xpad_ref, *, apply_act):
    # x_ref    : (1, H, W, C)   raw (pre-activation) NHWC input for this conv
    # scale_ref: (1, 1, C)      folded BN scale for the input (unused if !act)
    # shift_ref: (1, 1, C)      folded BN shift for the input (unused if !act)
    # w_ref    : (9*C, C)       3x3 weights, (dh, dw, Cin)-major x Cout
    # a_ref    : (1, H, W, C)   raw conv output (pre-BN)
    # stats_ref: (1, 2, C)      per-image [sum, sum_sq] over all pixels
    # xpad_ref : (H+2, W+2, C)  VMEM scratch: zero halo + activated interior
    _, H, W, C = x_ref.shape
    Hp, Wp = H + 2, W + 2
    M = H * W

    # Activate input: identity for conv1, bn1-affine + relu for conv2.
    t = x_ref[0]
    if apply_act:
        t = jnp.maximum(t * scale_ref[...] + shift_ref[...], 0.0)

    # Zero only the 1-pixel halo ring (not the full buffer), then the interior.
    zrow = jnp.zeros((1, Wp, C), jnp.float32)
    zcol = jnp.zeros((Hp, 1, C), jnp.float32)
    xpad_ref[0:1, :, :] = zrow
    xpad_ref[Hp - 1:Hp, :, :] = zrow
    xpad_ref[:, 0:1, :] = zcol
    xpad_ref[:, Wp - 1:Wp, :] = zcol
    xpad_ref[1:1 + H, 1:1 + W, :] = t

    # im2col: 9 shifted patches -> one (M, 9*C) slab -> a single MXU matmul
    # with K = 9*C (instead of 9 K=C matmuls + 8 VPU accumulator adds).
    patches = [
        xpad_ref[dh:dh + H, dw:dw + W, :].reshape(M, C)
        for dh in range(3) for dw in range(3)
    ]
    slab = jnp.concatenate(patches, axis=-1)                       # (M, 9*C)
    acc = jnp.dot(slab, w_ref[...],
                  preferred_element_type=jnp.float32)              # (M, C)
    # TODO(synk): optionally cast slab/weights to bf16 for the MXU on v6e/v7x
    # (kept f32 here for exact parity with the f32 reference check).

    # Per-image channel statistics for the following BatchNorm fold.
    stats_ref[0, 0:1, :] = jnp.sum(acc, axis=0, keepdims=True)
    stats_ref[0, 1:2, :] = jnp.sum(acc * acc, axis=0, keepdims=True)

    # Raw (pre-BN) conv output for this image.
    a_ref[0] = acc.reshape(H, W, C)


def _conv3x3_with_stats(x_nhwc, w_flat, scale, shift, *, apply_act):
    N, H, W, C = x_nhwc.shape
    kernel = functools.partial(_conv3x3_stats_kernel, apply_act=apply_act)
    return pl.pallas_call(
        kernel,
        grid=(N,),
        out_shape=(jax.ShapeDtypeStruct((N, H, W, C), jnp.float32),
                   jax.ShapeDtypeStruct((N, 2, C), jnp.float32)),
        in_specs=[
            pl.BlockSpec((1, H, W, C), lambda n: (n, 0, 0, 0)),
            pl.BlockSpec((1, 1, C), lambda n: (0, 0, 0)),
            pl.BlockSpec((1, 1, C), lambda n: (0, 0, 0)),
            pl.BlockSpec((9 * C, C), lambda n: (0, 0)),
        ],
        out_specs=(
            pl.BlockSpec((1, H, W, C), lambda n: (n, 0, 0, 0)),
            pl.BlockSpec((1, 2, C), lambda n: (n, 0, 0)),
        ),
        scratch_shapes=[pltpu.VMEM((H + 2, W + 2, C), jnp.float32)],
        compiler_params=pltpu.CompilerParams(
            dimension_semantics=("parallel",),
            vmem_limit_bytes=VMEM_LIMIT),
    )(x_nhwc, scale, shift, w_flat)


# ---------------------------------------------------------------------------
# BN fold (tiny per-channel math, done in plain JAX between pallas_calls).
# ---------------------------------------------------------------------------
def _bn_fold(stats, gamma, beta, count):
    s = jnp.sum(stats[:, 0, :], axis=0)
    sq = jnp.sum(stats[:, 1, :], axis=0)
    mean = s / count
    var = sq / count - mean * mean          # biased variance (training mode)
    scale = gamma * lax.rsqrt(var + EPS)
    shift = beta - mean * scale
    return scale, shift


# ---------------------------------------------------------------------------
# Kernel 3: lane-dense bn2 + residual add + relu on a (rows, W*C) view.
# ---------------------------------------------------------------------------
def _finalize_kernel(a_ref, r_ref, scale_ref, shift_ref, o_ref):
    o_ref[...] = jnp.maximum(
        a_ref[...] * scale_ref[...] + shift_ref[...] + r_ref[...], 0.0)


def _pick_row_tile(rows, lanes):
    if lanes % LANE != 0:
        return rows                           # fall back to a single block
    for cand in (512, 256, 128, 64, 32, 16, 8):
        if rows % cand == 0:
            return cand
    return rows


def _bn_add_relu(a2, x_nhwc, scale2, shift2):
    N, H, W, C = x_nhwc.shape
    R, L = N * H, W * C
    a2f = a2.reshape(R, L)        # contiguous reshapes: free in XLA
    xf = x_nhwc.reshape(R, L)
    scale_t = jnp.tile(scale2, W).reshape(1, L)
    shift_t = jnp.tile(shift2, W).reshape(1, L)
    tr = _pick_row_tile(R, L)
    out = pl.pallas_call(
        _finalize_kernel,
        grid=(R // tr,),
        out_shape=jax.ShapeDtypeStruct((R, L), jnp.float32),
        in_specs=[
            pl.BlockSpec((tr, L), lambda i: (i, 0)),
            pl.BlockSpec((tr, L), lambda i: (i, 0)),
            pl.BlockSpec((1, L), lambda i: (0, 0)),
            pl.BlockSpec((1, L), lambda i: (0, 0)),
        ],
        out_specs=pl.BlockSpec((tr, L), lambda i: (i, 0)),
        compiler_params=pltpu.CompilerParams(
            dimension_semantics=("parallel",),
            vmem_limit_bytes=VMEM_LIMIT),
    )(a2f, xf, scale_t, shift_t)
    return out.reshape(N, H, W, C)


# ---------------------------------------------------------------------------
# Full BasicBlock forward.
# ---------------------------------------------------------------------------
@jax.jit
def basic_block_forward(x_nchw, w1_hwio, w2_hwio, g1, b1, g2, b2):
    """BasicBlock forward (training-mode BN); inplanes == planes, stride=1."""
    x = jnp.transpose(x_nchw, (0, 2, 3, 1)).astype(jnp.float32)   # -> NHWC
    N, H, W, C = x.shape
    count = float(N * H * W)

    w1 = w1_hwio.astype(jnp.float32).reshape(9 * C, C)
    w2 = w2_hwio.astype(jnp.float32).reshape(9 * C, C)
    ones = jnp.ones((1, 1, C), jnp.float32)
    zeros = jnp.zeros((1, 1, C), jnp.float32)

    # conv1 (raw) + per-image stats for bn1
    a1, st1 = _conv3x3_with_stats(x, w1, ones, zeros, apply_act=False)
    scale1, shift1 = _bn_fold(st1, g1, b1, count)

    # bn1 + relu folded into conv2's input read; conv2 (raw) + stats for bn2
    a2, st2 = _conv3x3_with_stats(a1, w2,
                                  scale1.reshape(1, 1, C),
                                  shift1.reshape(1, 1, C),
                                  apply_act=True)
    scale2, shift2 = _bn_fold(st2, g2, b2, count)

    # bn2 + residual add + relu, lane-dense output store
    out = _bn_add_relu(a2, x, scale2, shift2)
    return jnp.transpose(out, (0, 3, 1, 2))                        # -> NCHW


# ---------------------------------------------------------------------------
# Pure-JAX reference (lax.conv) for validation.
# ---------------------------------------------------------------------------
def reference_forward(x_nchw, w1_hwio, w2_hwio, g1, b1, g2, b2):
    x = jnp.transpose(x_nchw, (0, 2, 3, 1)).astype(jnp.float32)
    dn = ('NHWC', 'HWIO', 'NHWC')

    def bn(t, g, b):
        m = jnp.mean(t, axis=(0, 1, 2), keepdims=True)
        v = jnp.mean((t - m) ** 2, axis=(0, 1, 2), keepdims=True)
        return (t - m) / jnp.sqrt(v + EPS) * g + b

    y = lax.conv_general_dilated(x, w1_hwio, (1, 1), 'SAME',
                                 dimension_numbers=dn)
    y = jnp.maximum(bn(y, g1, b1), 0.0)
    z = lax.conv_general_dilated(y, w2_hwio, (1, 1), 'SAME',
                                 dimension_numbers=dn)
    z = bn(z, g2, b2)
    out = jnp.maximum(z + x, 0.0)
    return jnp.transpose(out, (0, 3, 1, 2))


if __name__ == "__main__":
    # Small shapes consistent with BasicBlock(inplanes=planes=8, stride=1).
    # W*C = 128 makes the finalize pass exactly lane-dense.
    N, C, H, W = 2, 8, 16, 16

    key = jax.random.PRNGKey(0)
    k_x, k_w1, k_w2 = jax.random.split(key, 3)

    x = jax.random.normal(k_x, (N, C, H, W), dtype=jnp.float32)

    fan_in = 3 * 3 * C
    w1 = jax.random.normal(k_w1, (3, 3, C, C), dtype=jnp.float32) * (2.0 / fan_in) ** 0.5
    w2 = jax.random.normal(k_w2, (3, 3, C, C), dtype=jnp.float32) * (2.0 / fan_in) ** 0.5
    g1 = 1.0 + 0.05 * jnp.arange(C, dtype=jnp.float32)
    b1 = 0.02 * jnp.arange(C, dtype=jnp.float32)
    g2 = 1.0 - 0.03 * jnp.arange(C, dtype=jnp.float32)
    b2 = -0.01 * jnp.arange(C, dtype=jnp.float32)

    out = jax.block_until_ready(basic_block_forward(x, w1, w2, g1, b1, g2, b2))
    ref = jax.block_until_ready(reference_forward(x, w1, w2, g1, b1, g2, b2))

    max_err = float(jnp.max(jnp.abs(out - ref)))
    assert out.shape == (N, C, H, W)
    assert max_err < 1e-4, f"mismatch vs reference: {max_err}"

    print("KERNEL_OK")
</pallas_src>

<mosaic_0001>
module attributes {stable_mosaic.version = 11 : i64} {
  func.func @_conv3x3_stats_kernel(%arg0: i32, %arg1: memref<1x16x16x8xf32, #tpu.memory_space<vmem>>, %arg2: memref<1x1x8xf32, #tpu.memory_space<vmem>>, %arg3: memref<1x1x8xf32, #tpu.memory_space<vmem>>, %arg4: memref<72x8xf32, #tpu.memory_space<vmem>>, %arg5: memref<1x16x16x8xf32, #tpu.memory_space<vmem>>, %arg6: memref<1x2x8xf32, #tpu.memory_space<vmem>>, %arg7: memref<18x18x8xf32, #tpu.memory_space<vmem>>) attributes {dimension_semantics = [#tpu.dimension_semantics<parallel>], iteration_bounds = array<i64: 2>, scalar_prefetch = 0 : i64, scratch_operands = 1 : i64, tpu.core_type = #tpu.core_type<tc>, window_params = [{transform_indices = @transform_0, window_bounds = array<i64: 1, 16, 16, 8>}, {pipeline_mode = #tpu.pipeline_mode<synchronous>, transform_indices = @transform_1, window_bounds = array<i64: 1, 1, 8>}, {pipeline_mode = #tpu.pipeline_mode<synchronous>, transform_indices = @transform_2, window_bounds = array<i64: 1, 1, 8>}, {pipeline_mode = #tpu.pipeline_mode<synchronous>, transform_indices = @transform_3, window_bounds = array<i64: 72, 8>}, {transform_indices = @transform_4, window_bounds = array<i64: 1, 16, 16, 8>}, {transform_indices = @transform_5, window_bounds = array<i64: 1, 2, 8>}]} {
    %c0 = arith.constant 0 : index
    %c0_0 = arith.constant 0 : index
    %c0_1 = arith.constant 0 : index
    %c0_2 = arith.constant 0 : index
    %0 = vector.load %arg1[%c0, %c0_0, %c0_1, %c0_2] : memref<1x16x16x8xf32, #tpu.memory_space<vmem>>, vector<1x16x16x8xf32>
    %1 = vector.shape_cast %0 : vector<1x16x16x8xf32> to vector<16x16x8xf32>
    %cst = arith.constant 0.000000e+00 : f32
    %2 = vector.broadcast %cst : f32 to vector<1x18x8xf32>
    %cst_3 = arith.constant 0.000000e+00 : f32
    %3 = vector.broadcast %cst_3 : f32 to vector<18x1x8xf32>
    %c0_4 = arith.constant 0 : index
    %c0_5 = arith.constant 0 : index
    %c0_6 = arith.constant 0 : index
    %4 = vector.load %arg7[%c0_4, %c0_5, %c0_6] : memref<18x18x8xf32, #tpu.memory_space<vmem>>, vector<1x18x8xf32>
    tpu.vector_store %arg7[%c0_4, %c0_5, %c0_6], %2 {strides = array<i32>} : memref<18x18x8xf32, #tpu.memory_space<vmem>>, vector<1x18x8xf32>,
    %c17 = arith.constant 17 : index
    %c0_7 = arith.constant 0 : index
    %c0_8 = arith.constant 0 : index
    %5 = vector.load %arg7[%c17, %c0_7, %c0_8] : memref<18x18x8xf32, #tpu.memory_space<vmem>>, vector<1x18x8xf32>
    tpu.vector_store %arg7[%c17, %c0_7, %c0_8], %2 {strides = array<i32>} : memref<18x18x8xf32, #tpu.memory_space<vmem>>, vector<1x18x8xf32>,
    %c0_9 = arith.constant 0 : index
    %c0_10 = arith.constant 0 : index
    %c0_11 = arith.constant 0 : index
    %6 = vector.load %arg7[%c0_9, %c0_10, %c0_11] : memref<18x18x8xf32, #tpu.memory_space<vmem>>, vector<18x1x8xf32>
    tpu.vector_store %arg7[%c0_9, %c0_10, %c0_11], %3 {strides = array<i32>} : memref<18x18x8xf32, #tpu.memory_space<vmem>>, vector<18x1x8xf32>,
    %c0_12 = arith.constant 0 : index
    %c17_13 = arith.constant 17 : index
    %c0_14 = arith.constant 0 : index
    %7 = vector.load %arg7[%c0_12, %c17_13, %c0_14] : memref<18x18x8xf32, #tpu.memory_space<vmem>>, vector<18x1x8xf32>
    tpu.vector_store %arg7[%c0_12, %c17_13, %c0_14], %3 {strides = array<i32>} : memref<18x18x8xf32, #tpu.memory_space<vmem>>, vector<18x1x8xf32>,
    %c1 = arith.constant 1 : index
    %c1_15 = arith.constant 1 : index
    %c0_16 = arith.constant 0 : index
    %8 = vector.load %arg7[%c1, %c1_15, %c0_16] : memref<18x18x8xf32, #tpu.memory_space<vmem>>, vector<16x16x8xf32>
    tpu.vector_store %arg7[%c1, %c1_15, %c0_16], %1 {strides = array<i32>} : memref<18x18x8xf32, #tpu.memory_space<vmem>>, vector<16x16x8xf32>,
    %c0_17 = arith.constant 0 : index
    %c0_18 = arith.constant 0 : index
    %c0_19 = arith.constant 0 : index
    %9 = vector.load %arg7[%c0_17, %c0_18, %c0_19] : memref<18x18x8xf32, #tpu.memory_space<vmem>>, vector<16x16x8xf32>
    %10 = vector.shape_cast %9 : vector<16x16x8xf32> to vector<256x8xf32>
    %c0_20 = arith.constant 0 : index
    %c1_21 = arith.constant 1 : index
    %c0_22 = arith.constant 0 : index
    %11 = vector.load %arg7[%c0_20, %c1_21, %c0_22] : memref<18x18x8xf32, #tpu.memory_space<vmem>>, vector<16x16x8xf32>
    %12 = vector.shape_cast %11 : vector<16x16x8xf32> to vector<256x8xf32>
    %c0_23 = arith.constant 0 : index
    %c2 = arith.constant 2 : index
    %c0_24 = arith.constant 0 : index
    %13 = vector.load %arg7[%c0_23, %c2, %c0_24] : memref<18x18x8xf32, #tpu.memory_space<vmem>>, vector<16x16x8xf32>
    %14 = vector.shape_cast %13 : vector<16x16x8xf32> to vector<256x8xf32>
    %c1_25 = arith.constant 1 : index
    %c0_26 = arith.constant 0 : index
    %c0_27 = arith.constant 0 : index
    %15 = vector.load %arg7[%c1_25, %c0_26, %c0_27] : memref<18x18x8xf32, #tpu.memory_space<vmem>>, vector<16x16x8xf32>
    %16 = vector.shape_cast %15 : vector<16x16x8xf32> to vector<256x8xf32>
    %c1_28 = arith.constant 1 : index
    %c1_29 = arith.constant 1 : index
    %c0_30 = arith.constant 0 : index
    %17 = vector.load %arg7[%c1_28, %c1_29, %c0_30] : memref<18x18x8xf32, #tpu.memory_space<vmem>>, vector<16x16x8xf32>
    %18 = vector.shape_cast %17 : vector<16x16x8xf32> to vector<256x8xf32>
    %c1_31 = arith.constant 1 : index
    %c2_32 = arith.constant 2 : index
    %c0_33 = arith.constant 0 : index
    %19 = vector.load %arg7[%c1_31, %c2_32, %c0_33] : memref<18x18x8xf32, #tpu.memory_space<vmem>>, vector<16x16x8xf32>
    %20 = vector.shape_cast %19 : vector<16x16x8xf32> to vector<256x8xf32>
    %c2_34 = arith.constant 2 : index
    %c0_35 = arith.constant 0 : index
    %c0_36 = arith.constant 0 : index
    %21 = vector.load %arg7[%c2_34, %c0_35, %c0_36] : memref<18x18x8xf32, #tpu.memory_space<vmem>>, vector<16x16x8xf32>
    %22 = vector.shape_cast %21 : vector<16x16x8xf32> to vector<256x8xf32>
    %c2_37 = arith.constant 2 : index
    %c1_38 = arith.constant 1 : index
    %c0_39 = arith.constant 0 : index
    %23 = vector.load %arg7[%c2_37, %c1_38, %c0_39] : memref<18x18x8xf32, #tpu.memory_space<vmem>>, vector<16x16x8xf32>
    %24 = vector.shape_cast %23 : vector<16x16x8xf32> to vector<256x8xf32>
    %c2_40 = arith.constant 2 : index
    %c2_41 = arith.constant 2 : index
    %c0_42 = arith.constant 0 : index
    %25 = vector.load %arg7[%c2_40, %c2_41, %c0_42] : memref<18x18x8xf32, #tpu.memory_space<vmem>>, vector<16x16x8xf32>
    %26 = vector.shape_cast %25 : vector<16x16x8xf32> to vector<256x8xf32>
    %27 = tpu.concatenate %10, %12, %14, %16, %18, %20, %22, %24, %26 in 1 : vector<256x8xf32>, vector<256x8xf32>, vector<256x8xf32>, vector<256x8xf32>, vector<256x8xf32>, vector<256x8xf32>, vector<256x8xf32>, vector<256x8xf32>, vector<256x8xf32> -> vector<256x72xf32>
    %c0_43 = arith.constant 0 : index
    %c0_44 = arith.constant 0 : index
    %28 = vector.load %arg4[%c0_43, %c0_44] : memref<72x8xf32, #tpu.memory_space<vmem>>, vector<72x8xf32>
    %cst_45 = arith.constant dense<0.000000e+00> : vector<256x8xf32>
    %29 = tpu.matmul %27, %28, %cst_45 {dimension_numbers = #tpu.dot_dimension_numbers<[1], [0], [0], [1], [0, 0, 1, 1], [], []>} : vector<256x72xf32>, vector<72x8xf32>, vector<256x8xf32> -> vector<256x8xf32>
    %cst_46 = arith.constant dense<0.000000e+00> : vector<8xf32>
    %30 = vector.multi_reduction <add>, %29, %cst_46 [0] : vector<256x8xf32> to vector<8xf32>
    %31 = vector.shape_cast %30 : vector<8xf32> to vector<1x8xf32>
    %c0_47 = arith.constant 0 : index
    %c0_48 = arith.constant 0 : index
    %c0_49 = arith.constant 0 : index
    %32 = vector.load %arg6[%c0_47, %c0_48, %c0_49] : memref<1x2x8xf32, #tpu.memory_space<vmem>>, vector<1x1x8xf32>
    %33 = vector.shape_cast %32 : vector<1x1x8xf32> to vector<1x8xf32>
    %34 = vector.shape_cast %31 : vector<1x8xf32> to vector<1x1x8xf32>
    tpu.vector_store %arg6[%c0_47, %c0_48, %c0_49], %34 {strides = array<i32>} : memref<1x2x8xf32, #tpu.memory_space<vmem>>, vector<1x1x8xf32>,
    %35 = arith.mulf %29, %29 : vector<256x8xf32>
    %cst_50 = arith.constant dense<0.000000e+00> : vector<8xf32>
    %36 = vector.multi_reduction <add>, %35, %cst_50 [0] : vector<256x8xf32> to vector<8xf32>
    %37 = vector.shape_cast %36 : vector<8xf32> to vector<1x8xf32>
    %c0_51 = arith.constant 0 : index
    %c1_52 = arith.constant 1 : index
    %c0_53 = arith.constant 0 : index
    %38 = vector.load %arg6[%c0_51, %c1_52, %c0_53] : memref<1x2x8xf32, #tpu.memory_space<vmem>>, vector<1x1x8xf32>
    %39 = vector.shape_cast %38 : vector<1x1x8xf32> to vector<1x8xf32>
    %40 = vector.shape_cast %37 : vector<1x8xf32> to vector<1x1x8xf32>
    tpu.vector_store %arg6[%c0_51, %c1_52, %c0_53], %40 {strides = array<i32>} : memref<1x2x8xf32, #tpu.memory_space<vmem>>, vector<1x1x8xf32>,
    %41 = vector.shape_cast %29 : vector<256x8xf32> to vector<16x16x8xf32>
    %c0_54 = arith.constant 0 : index
    %c0_55 = arith.constant 0 : index
    %c0_56 = arith.constant 0 : index
    %c0_57 = arith.constant 0 : index
    %42 = vector.load %arg5[%c0_54, %c0_55, %c0_56, %c0_57] : memref<1x16x16x8xf32, #tpu.memory_space<vmem>>, vector<1x16x16x8xf32>
    %43 = vector.shape_cast %42 : vector<1x16x16x8xf32> to vector<16x16x8xf32>
    %44 = vector.shape_cast %41 : vector<16x16x8xf32> to vector<1x16x16x8xf32>
    tpu.vector_store %arg5[%c0_54, %c0_55, %c0_56, %c0_57], %44 {strides = array<i32>} : memref<1x16x16x8xf32, #tpu.memory_space<vmem>>, vector<1x16x16x8xf32>,
    return
  }
  func.func @transform_0(%arg0: i32) -> (i32, i32, i32, i32) {
    %c0_i32 = arith.constant 0 : i32
    %c0_i32_0 = arith.constant 0 : i32
    %c0_i32_1 = arith.constant 0 : i32
    %c0_i32_2 = arith.constant 0 : i32
    return %arg0, %c0_i32, %c0_i32_0, %c0_i32_1 : i32, i32, i32, i32
  }
  func.func @transform_1(%arg0: i32) -> (i32, i32, i32) {
    %c0_i32 = arith.constant 0 : i32
    %c0_i32_0 = arith.constant 0 : i32
    %c0_i32_1 = arith.constant 0 : i32
    %c0_i32_2 = arith.constant 0 : i32
    return %c0_i32, %c0_i32_0, %c0_i32_1 : i32, i32, i32
  }
  func.func @transform_2(%arg0: i32) -> (i32, i32, i32) {
    %c0_i32 = arith.constant 0 : i32
    %c0_i32_0 = arith.constant 0 : i32
    %c0_i32_1 = arith.constant 0 : i32
    %c0_i32_2 = arith.constant 0 : i32
    return %c0_i32, %c0_i32_0, %c0_i32_1 : i32, i32, i32
  }
  func.func @transform_3(%arg0: i32) -> (i32, i32) {
    %c0_i32 = arith.constant 0 : i32
    %c0_i32_0 = arith.constant 0 : i32
    %c0_i32_1 = arith.constant 0 : i32
    return %c0_i32, %c0_i32_0 : i32, i32
  }
  func.func @transform_4(%arg0: i32) -> (i32, i32, i32, i32) {
    %c0_i32 = arith.constant 0 : i32
    %c0_i32_0 = arith.constant 0 : i32
    %c0_i32_1 = arith.constant 0 : i32
    %c0_i32_2 = arith.constant 0 : i32
    return %arg0, %c0_i32, %c0_i32_0, %c0_i32_1 : i32, i32, i32, i32
  }
  func.func @transform_5(%arg0: i32) -> (i32, i32, i32) {
    %c0_i32 = arith.constant 0 : i32
    %c0_i32_0 = arith.constant 0 : i32
    %c0_i32_1 = arith.constant 0 : i32
    return %arg0, %c0_i32, %c0_i32_0 : i32, i32, i32
  }
}

module attributes {stable_mosaic.version = 11 : i64} {
  func.func @_conv3x3_stats_kernel(%arg0: i32, %arg1: memref<1x16x16x8xf32, #tpu.memory_space<vmem>>, %arg2: memref<1x1x8xf32, #tpu.memory_space<vmem>>, %arg3: memref<1x1x8xf32, #tpu.memory_space<vmem>>, %arg4: memref<72x8xf32, #tpu.memory_space<vmem>>, %arg5: memref<1x16x16x8xf32, #tpu.memory_space<vmem>>, %arg6: memref<1x2x8xf32, #tpu.memory_space<vmem>>, %arg7: memref<18x18x8xf32, #tpu.memory_space<vmem>>) attributes {dimension_semantics = [#tpu.dimension_semantics<parallel>], iteration_bounds = array<i64: 2>, scalar_prefetch = 0 : i64, scratch_operands = 1 : i64, tpu.core_type = #tpu.core_type<tc>, window_params = [{transform_indices = @transform_0, window_bounds = array<i64: 1, 16, 16, 8>}, {pipeline_mode = #tpu.pipeline_mode<synchronous>, transform_indices = @transform_1, window_bounds = array<i64: 1, 1, 8>}, {pipeline_mode = #tpu.pipeline_mode<synchronous>, transform_indices = @transform_2, window_bounds = array<i64: 1, 1, 8>}, {pipeline_mode = #tpu.pipeline_mode<synchronous>, transform_indices = @transform_3, window_bounds = array<i64: 72, 8>}, {transform_indices = @transform_4, window_bounds = array<i64: 1, 16, 16, 8>}, {transform_indices = @transform_5, window_bounds = array<i64: 1, 2, 8>}]} {
    %c0 = arith.constant 0 : index
    %c0_0 = arith.constant 0 : index
    %c0_1 = arith.constant 0 : index
    %c0_2 = arith.constant 0 : index
    %0 = vector.load %arg1[%c0, %c0_0, %c0_1, %c0_2] : memref<1x16x16x8xf32, #tpu.memory_space<vmem>>, vector<1x16x16x8xf32>
    %1 = vector.shape_cast %0 : vector<1x16x16x8xf32> to vector<16x16x8xf32>
    %c0_3 = arith.constant 0 : index
    %c0_4 = arith.constant 0 : index
    %c0_5 = arith.constant 0 : index
    %2 = vector.load %arg2[%c0_3, %c0_4, %c0_5] : memref<1x1x8xf32, #tpu.memory_space<vmem>>, vector<1x1x8xf32>
    %3 = vector.broadcast %2 : vector<1x1x8xf32> to vector<16x16x8xf32>
    %4 = arith.mulf %1, %3 : vector<16x16x8xf32>
    %c0_6 = arith.constant 0 : index
    %c0_7 = arith.constant 0 : index
    %c0_8 = arith.constant 0 : index
    %5 = vector.load %arg3[%c0_6, %c0_7, %c0_8] : memref<1x1x8xf32, #tpu.memory_space<vmem>>, vector<1x1x8xf32>
    %6 = vector.broadcast %5 : vector<1x1x8xf32> to vector<16x16x8xf32>
    %7 = arith.addf %4, %6 : vector<16x16x8xf32>
    %cst = arith.constant 0.000000e+00 : f32
    %8 = vector.broadcast %cst : f32 to vector<16x16x8xf32>
    %9 = arith.maximumf %7, %8 : vector<16x16x8xf32>
    %cst_9 = arith.constant 0.000000e+00 : f32
    %10 = vector.broadcast %cst_9 : f32 to vector<1x18x8xf32>
    %cst_10 = arith.constant 0.000000e+00 : f32
    %11 = vector.broadcast %cst_10 : f32 to vector<18x1x8xf32>
    %c0_11 = arith.constant 0 : index
    %c0_12 = arith.constant 0 : index
    %c0_13 = arith.constant 0 : index
    %12 = vector.load %arg7[%c0_11, %c0_12, %c0_13] : memref<18x18x8xf32, #tpu.memory_space<vmem>>, vector<1x18x8xf32>
    tpu.vector_store %arg7[%c0_11, %c0_12, %c0_13], %10 {strides = array<i32>} : memref<18x18x8xf32, #tpu.memory_space<vmem>>, vector<1x18x8xf32>,
    %c17 = arith.constant 17 : index
    %c0_14 = arith.constant 0 : index
    %c0_15 = arith.constant 0 : index
    %13 = vector.load %arg7[%c17, %c0_14, %c0_15] : memref<18x18x8xf32, #tpu.memory_space<vmem>>, vector<1x18x8xf32>
    tpu.vector_store %arg7[%c17, %c0_14, %c0_15], %10 {strides = array<i32>} : memref<18x18x8xf32, #tpu.memory_space<vmem>>, vector<1x18x8xf32>,
    %c0_16 = arith.constant 0 : index
    %c0_17 = arith.constant 0 : index
    %c0_18 = arith.constant 0 : index
    %14 = vector.load %arg7[%c0_16, %c0_17, %c0_18] : memref<18x18x8xf32, #tpu.memory_space<vmem>>, vector<18x1x8xf32>
    tpu.vector_store %arg7[%c0_16, %c0_17, %c0_18], %11 {strides = array<i32>} : memref<18x18x8xf32, #tpu.memory_space<vmem>>, vector<18x1x8xf32>,
    %c0_19 = arith.constant 0 : index
    %c17_20 = arith.constant 17 : index
    %c0_21 = arith.constant 0 : index
    %15 = vector.load %arg7[%c0_19, %c17_20, %c0_21] : memref<18x18x8xf32, #tpu.memory_space<vmem>>, vector<18x1x8xf32>
    tpu.vector_store %arg7[%c0_19, %c17_20, %c0_21], %11 {strides = array<i32>} : memref<18x18x8xf32, #tpu.memory_space<vmem>>, vector<18x1x8xf32>,
    %c1 = arith.constant 1 : index
    %c1_22 = arith.constant 1 : index
    %c0_23 = arith.constant 0 : index
    %16 = vector.load %arg7[%c1, %c1_22, %c0_23] : memref<18x18x8xf32, #tpu.memory_space<vmem>>, vector<16x16x8xf32>
    tpu.vector_store %arg7[%c1, %c1_22, %c0_23], %9 {strides = array<i32>} : memref<18x18x8xf32, #tpu.memory_space<vmem>>, vector<16x16x8xf32>,
    %c0_24 = arith.constant 0 : index
    %c0_25 = arith.constant 0 : index
    %c0_26 = arith.constant 0 : index
    %17 = vector.load %arg7[%c0_24, %c0_25, %c0_26] : memref<18x18x8xf32, #tpu.memory_space<vmem>>, vector<16x16x8xf32>
    %18 = vector.shape_cast %17 : vector<16x16x8xf32> to vector<256x8xf32>
    %c0_27 = arith.constant 0 : index
    %c1_28 = arith.constant 1 : index
    %c0_29 = arith.constant 0 : index
    %19 = vector.load %arg7[%c0_27, %c1_28, %c0_29] : memref<18x18x8xf32, #tpu.memory_space<vmem>>, vector<16x16x8xf32>
    %20 = vector.shape_cast %19 : vector<16x16x8xf32> to vector<256x8xf32>
    %c0_30 = arith.constant 0 : index
    %c2 = arith.constant 2 : index
    %c0_31 = arith.constant 0 : index
    %21 = vector.load %arg7[%c0_30, %c2, %c0_31] : memref<18x18x8xf32, #tpu.memory_space<vmem>>, vector<16x16x8xf32>
    %22 = vector.shape_cast %21 : vector<16x16x8xf32> to vector<256x8xf32>
    %c1_32 = arith.constant 1 : index
    %c0_33 = arith.constant 0 : index
    %c0_34 = arith.constant 0 : index
    %23 = vector.load %arg7[%c1_32, %c0_33, %c0_34] : memref<18x18x8xf32, #tpu.memory_space<vmem>>, vector<16x16x8xf32>
    %24 = vector.shape_cast %23 : vector<16x16x8xf32> to vector<256x8xf32>
    %c1_35 = arith.constant 1 : index
    %c1_36 = arith.constant 1 : index
    %c0_37 = arith.constant 0 : index
    %25 = vector.load %arg7[%c1_35, %c1_36, %c0_37] : memref<18x18x8xf32, #tpu.memory_space<vmem>>, vector<16x16x8xf32>
    %26 = vector.shape_cast %25 : vector<16x16x8xf32> to vector<256x8xf32>
    %c1_38 = arith.constant 1 : index
    %c2_39 = arith.constant 2 : index
    %c0_40 = arith.constant 0 : index
    %27 = vector.load %arg7[%c1_38, %c2_39, %c0_40] : memref<18x18x8xf32, #tpu.memory_space<vmem>>, vector<16x16x8xf32>
    %28 = vector.shape_cast %27 : vector<16x16x8xf32> to vector<256x8xf32>
    %c2_41 = arith.constant 2 : index
    %c0_42 = arith.constant 0 : index
    %c0_43 = arith.constant 0 : index
    %29 = vector.load %arg7[%c2_41, %c0_42, %c0_43] : memref<18x18x8xf32, #tpu.memory_space<vmem>>, vector<16x16x8xf32>
    %30 = vector.shape_cast %29 : vector<16x16x8xf32> to vector<256x8xf32>
    %c2_44 = arith.constant 2 : index
    %c1_45 = arith.constant 1 : index
    %c0_46 = arith.constant 0 : index
    %31 = vector.load %arg7[%c2_44, %c1_45, %c0_46] : memref<18x18x8xf32, #tpu.memory_space<vmem>>, vector<16x16x8xf32>
    %32 = vector.shape_cast %31 : vector<16x16x8xf32> to vector<256x8xf32>
    %c2_47 = arith.constant 2 : index
    %c2_48 = arith.constant 2 : index
    %c0_49 = arith.constant 0 : index
    %33 = vector.load %arg7[%c2_47, %c2_48, %c0_49] : memref<18x18x8xf32, #tpu.memory_space<vmem>>, vector<16x16x8xf32>
    %34 = vector.shape_cast %33 : vector<16x16x8xf32> to vector<256x8xf32>
    %35 = tpu.concatenate %18, %20, %22, %24, %26, %28, %30, %32, %34 in 1 : vector<256x8xf32>, vector<256x8xf32>, vector<256x8xf32>, vector<256x8xf32>, vector<256x8xf32>, vector<256x8xf32>, vector<256x8xf32>, vector<256x8xf32>, vector<256x8xf32> -> vector<256x72xf32>
    %c0_50 = arith.constant 0 : index
    %c0_51 = arith.constant 0 : index
    %36 = vector.load %arg4[%c0_50, %c0_51] : memref<72x8xf32, #tpu.memory_space<vmem>>, vector<72x8xf32>
    %cst_52 = arith.constant dense<0.000000e+00> : vector<256x8xf32>
    %37 = tpu.matmul %35, %36, %cst_52 {dimension_numbers = #tpu.dot_dimension_numbers<[1], [0], [0], [1], [0, 0, 1, 1], [], []>} : vector<256x72xf32>, vector<72x8xf32>, vector<256x8xf32> -> vector<256x8xf32>
    %cst_53 = arith.constant dense<0.000000e+00> : vector<8xf32>
    %38 = vector.multi_reduction <add>, %37, %cst_53 [0] : vector<256x8xf32> to vector<8xf32>
    %39 = vector.shape_cast %38 : vector<8xf32> to vector<1x8xf32>
    %c0_54 = arith.constant 0 : index
    %c0_55 = arith.constant 0 : index
    %c0_56 = arith.constant 0 : index
    %40 = vector.load %arg6[%c0_54, %c0_55, %c0_56] : memref<1x2x8xf32, #tpu.memory_space<vmem>>, vector<1x1x8xf32>
    %41 = vector.shape_cast %40 : vector<1x1x8xf32> to vector<1x8xf32>
    %42 = vector.shape_cast %39 : vector<1x8xf32> to vector<1x1x8xf32>
    tpu.vector_store %arg6[%c0_54, %c0_55, %c0_56], %42 {strides = array<i32>} : memref<1x2x8xf32, #tpu.memory_space<vmem>>, vector<1x1x8xf32>,
    %43 = arith.mulf %37, %37 : vector<256x8xf32>
    %cst_57 = arith.constant dense<0.000000e+00> : vector<8xf32>
    %44 = vector.multi_reduction <add>, %43, %cst_57 [0] : vector<256x8xf32> to vector<8xf32>
    %45 = vector.shape_cast %44 : vector<8xf32> to vector<1x8xf32>
    %c0_58 = arith.constant 0 : index
    %c1_59 = arith.constant 1 : index
    %c0_60 = arith.constant 0 : index
    %46 = vector.load %arg6[%c0_58, %c1_59, %c0_60] : memref<1x2x8xf32, #tpu.memory_space<vmem>>, vector<1x1x8xf32>
    %47 = vector.shape_cast %46 : vector<1x1x8xf32> to vector<1x8xf32>
    %48 = vector.shape_cast %45 : vector<1x8xf32> to vector<1x1x8xf32>
    tpu.vector_store %arg6[%c0_58, %c1_59, %c0_60], %48 {strides = array<i32>} : memref<1x2x8xf32, #tpu.memory_space<vmem>>, vector<1x1x8xf32>,
    %49 = vector.shape_cast %37 : vector<256x8xf32> to vector<16x16x8xf32>
    %c0_61 = arith.constant 0 : index
    %c0_62 = arith.constant 0 : index
    %c0_63 = arith.constant 0 : index
    %c0_64 = arith.constant 0 : index
    %50 = vector.load %arg5[%c0_61, %c0_62, %c0_63, %c0_64] : memref<1x16x16x8xf32, #tpu.memory_space<vmem>>, vector<1x16x16x8xf32>
    %51 = vector.shape_cast %50 : vector<1x16x16x8xf32> to vector<16x16x8xf32>
    %52 = vector.shape_cast %49 : vector<16x16x8xf32> to vector<1x16x16x8xf32>
    tpu.vector_store %arg5[%c0_61, %c0_62, %c0_63, %c0_64], %52 {strides = array<i32>} : memref<1x16x16x8xf32, #tpu.memory_space<vmem>>, vector<1x16x16x8xf32>,
    return
  }
  func.func @transform_0(%arg0: i32) -> (i32, i32, i32, i32) {
    %c0_i32 = arith.constant 0 : i32
    %c0_i32_0 = arith.constant 0 : i32
    %c0_i32_1 = arith.constant 0 : i32
    %c0_i32_2 = arith.constant 0 : i32
    return %arg0, %c0_i32, %c0_i32_0, %c0_i32_1 : i32, i32, i32, i32
  }
  func.func @transform_1(%arg0: i32) -> (i32, i32, i32) {
    %c0_i32 = arith.constant 0 : i32
    %c0_i32_0 = arith.constant 0 : i32
    %c0_i32_1 = arith.constant 0 : i32
    %c0_i32_2 = arith.constant 0 : i32
    return %c0_i32, %c0_i32_0, %c0_i32_1 : i32, i32, i32
  }
  func.func @transform_2(%arg0: i32) -> (i32, i32, i32) {
    %c0_i32 = arith.constant 0 : i32
    %c0_i32_0 = arith.constant 0 : i32
    %c0_i32_1 = arith.constant 0 : i32
    %c0_i32_2 = arith.constant 0 : i32
    return %c0_i32, %c0_i32_0, %c0_i32_1 : i32, i32, i32
  }
  func.func @transform_3(%arg0: i32) -> (i32, i32) {
    %c0_i32 = arith.constant 0 : i32
    %c0_i32_0 = arith.constant 0 : i32
    %c0_i32_1 = arith.constant 0 : i32
    return %c0_i32, %c0_i32_0 : i32, i32
  }
  func.func @transform_4(%arg0: i32) -> (i32, i32, i32, i32) {
    %c0_i32 = arith.constant 0 : i32
    %c0_i32_0 = arith.constant 0 : i32
    %c0_i32_1 = arith.constant 0 : i32
    %c0_i32_2 = arith.constant 0 : i32
    return %arg0, %c0_i32, %c0_i32_0, %c0_i32_1 : i32, i32, i32, i32
  }
  func.func @transform_5(%arg0: i32) -> (i32, i32, i32) {
    %c0_i32 = arith.constant 0 : i32
    %c0_i32_0 = arith.constant 0 : i32
    %c0_i32_1 = arith.constant 0 : i32
    return %arg0, %c0_i32, %c0_i32_0 : i32, i32, i32
  }
}

module attributes {stable_mosaic.version = 11 : i64} {
  func.func @_finalize_kernel(%arg0: i32, %arg1: memref<32x128xf32, #tpu.memory_space<vmem>>, %arg2: memref<32x128xf32, #tpu.memory_space<vmem>>, %arg3: memref<1x128xf32, #tpu.memory_space<vmem>>, %arg4: memref<1x128xf32, #tpu.memory_space<vmem>>, %arg5: memref<32x128xf32, #tpu.memory_space<vmem>>) attributes {dimension_semantics = [#tpu.dimension_semantics<parallel>], iteration_bounds = array<i64: 1>, scalar_prefetch = 0 : i64, scratch_operands = 0 : i64, tpu.core_type = #tpu.core_type<tc>, window_params = [{transform_indices = @transform_0, window_bounds = array<i64: 32, 128>}, {transform_indices = @transform_1, window_bounds = array<i64: 32, 128>}, {pipeline_mode = #tpu.pipeline_mode<synchronous>, transform_indices = @transform_2, window_bounds = array<i64: 1, 128>}, {pipeline_mode = #tpu.pipeline_mode<synchronous>, transform_indices = @transform_3, window_bounds = array<i64: 1, 128>}, {transform_indices = @transform_4, window_bounds = array<i64: 32, 128>}]} {
    %c0 = arith.constant 0 : index
    %c0_0 = arith.constant 0 : index
    %0 = vector.load %arg1[%c0, %c0_0] : memref<32x128xf32, #tpu.memory_space<vmem>>, vector<32x128xf32>
    %c0_1 = arith.constant 0 : index
    %c0_2 = arith.constant 0 : index
    %1 = vector.load %arg3[%c0_1, %c0_2] : memref<1x128xf32, #tpu.memory_space<vmem>>, vector<1x128xf32>
    %2 = vector.broadcast %1 : vector<1x128xf32> to vector<32x128xf32>
    %3 = arith.mulf %0, %2 : vector<32x128xf32>
    %c0_3 = arith.constant 0 : index
    %c0_4 = arith.constant 0 : index
    %4 = vector.load %arg4[%c0_3, %c0_4] : memref<1x128xf32, #tpu.memory_space<vmem>>, vector<1x128xf32>
    %5 = vector.broadcast %4 : vector<1x128xf32> to vector<32x128xf32>
    %6 = arith.addf %3, %5 : vector<32x128xf32>
    %c0_5 = arith.constant 0 : index
    %c0_6 = arith.constant 0 : index
    %7 = vector.load %arg2[%c0_5, %c0_6] : memref<32x128xf32, #tpu.memory_space<vmem>>, vector<32x128xf32>
    %8 = arith.addf %6, %7 : vector<32x128xf32>
    %cst = arith.constant 0.000000e+00 : f32
    %9 = vector.broadcast %cst : f32 to vector<32x128xf32>
    %10 = arith.maximumf %8, %9 : vector<32x128xf32>
    %c0_7 = arith.constant 0 : index
    %c0_8 = arith.constant 0 : index
    %11 = vector.load %arg5[%c0_7, %c0_8] : memref<32x128xf32, #tpu.memory_space<vmem>>, vector<32x128xf32>
    tpu.vector_store %arg5[%c0_7, %c0_8], %10 {strides = array<i32>} : memref<32x128xf32, #tpu.memory_space<vmem>>, vector<32x128xf32>,
    return
  }
  func.func @transform_0(%arg0: i32) -> (i32, i32) {
    %c0_i32 = arith.constant 0 : i32
    %c0_i32_0 = arith.constant 0 : i32
    return %arg0, %c0_i32 : i32, i32
  }
  func.func @transform_1(%arg0: i32) -> (i32, i32) {
    %c0_i32 = arith.constant 0 : i32
    %c0_i32_0 = arith.constant 0 : i32
    return %arg0, %c0_i32 : i32, i32
  }
  func.func @transform_2(%arg0: i32) -> (i32, i32) {
    %c0_i32 = arith.constant 0 : i32
    %c0_i32_0 = arith.constant 0 : i32
    %c0_i32_1 = arith.constant 0 : i32
    return %c0_i32, %c0_i32_0 : i32, i32
  }
  func.func @transform_3(%arg0: i32) -> (i32, i32) {
    %c0_i32 = arith.constant 0 : i32
    %c0_i32_0 = arith.constant 0 : i32
    %c0_i32_1 = arith.constant 0 : i32
    return %c0_i32, %c0_i32_0 : i32, i32
  }
  func.func @transform_4(%arg0: i32) -> (i32, i32) {
    %c0_i32 = arith.constant 0 : i32
    %c0_i32_0 = arith.constant 0 : i32
    return %arg0, %c0_i32 : i32, i32
  }
}

</mosaic_0001>

<bundles_post_ra>
// kernel: tile.13
= control target key start
LH: loop header
LB: loop body
LE: loop exit
PB: predicated region body
PF: predicated region fallthrough
CT: control target
= control target key end

     0   :  { %s28_s0 = inlined_call_operand.vmem [shape: f32[8], index: 0, kind: input, shape index: {}]   ;;  %s29_s1 = inlined_call_operand.vmem [shape: f32[16,8], index: 1, kind: output, shape index: {}]  }
   0x1   :  { %v4_v0 = vld [vmem:[%s28_s0] ss:$0 sm:$0xff] }
   0x2   :  { %5 = vst [vmem:[%s29_s1] sm:$0xff] %v4_v0  ;;  %8 = vst [vmem:[%s29_s1 + $0x8] sm:$0xff] %v4_v0 }

// kernel: tile.14
= control target key start
LH: loop header
LB: loop body
LE: loop exit
PB: predicated region body
PF: predicated region fallthrough
CT: control target
= control target key end

     0   :  { %s133_s10 = smov 120   ;;  %s134_s11 = smov 104   ;;  %vm3_vm0 = vcmask 64512   ;;  %vm9_vm1 = vcmask 1048512   ;;  %vm15_vm2 = vcmask 982912   ;;  %vm21_vm3 = vcmask 917312   ;;  %s209_s0 = inlined_call_operand.vmem [shape: f32[16,8], index: 0, kind: input, shape index: {}]   ;;  %s210_s1 = inlined_call_operand.vmem [shape: f32[1,128], index: 1, kind: output, shape index: {}]  }
   0x1   :  { %v103_v0 = vld [vmem:[%s209_s0 + $0xf] sm:$0x1]   ;;  %v105_v1 = vld [vmem:[%s209_s0 + $0xd] sm:$0x1]   ;;  %v104_v2 = vld [vmem:[%s209_s0 + $0xe] sm:$0x1]  }
   0x2   :  { %7 = vrot.lane.b32.xlu0 %v103_v0, %s133_s10  ;;  %19 = vrot.lane.b32.xlu1 %v105_v1, %s134_s11  ;;  %v106_v3 = vld [vmem:[%s209_s0 + $0xc] sm:$0x1]   ;;  %s135_s16 = smov 112   ;;  %s136_s17 = smov 96   ;;  %v107_v4 = vld [vmem:[%s209_s0 + $0xb] sm:$0x1]  }
   0x3   :  { %v108_v5 = vld [vmem:[%s209_s0 + $0xa] sm:$0x1]   ;;  %v2_v6 = vld [vmem:[%s209_s0] sm:$0x1]   ;;  %s137_s24 = smov 88   ;;  %s138_s25 = smov 80  }
   0x4   :  { %4 = vst.msk [vmem:[#allocation0] sm:$0x1] %vm3_vm0, %v2_v6   ;;  %v109_v7 = vld [vmem:[%s209_s0 + $0x9] sm:$0x1]   ;;  %v110_v8 = vld [vmem:[%s209_s0 + $0x8] sm:$0x1]  }
   0x5   :  { %s139_s30 = smov 72   ;;  %s140_s2 = smov 64   ;;  %v111_v9 = vld [vmem:[%s209_s0 + $0x7] sm:$0x1]   ;;  %v112_v10 = vld [vmem:[%s209_s0 + $0x6] sm:$0x1]  }
   0x6   :  { %13 = vrot.lane.b32.xlu0 %v104_v2, %s135_s16  ;;  %25 = vrot.lane.b32.xlu1 %v106_v3, %s136_s17  ;;  %s141_s7 = smov 56   ;;  %s142_s8 = smov 48   ;;  %v113_v11 = vld [vmem:[%s209_s0 + $0x5] sm:$0x1]   ;;  %v114_v12 = vld [vmem:[%s209_s0 + $0x4] sm:$0x1]  }
   0x7   :  { %s143_s13 = smov 40   ;;  %s144_s14 = smov 32   ;;  %v115_v13 = vld [vmem:[%s209_s0 + $0x3] sm:$0x1]   ;;  %v116_v14 = vld [vmem:[%s209_s0 + $0x2] sm:$0x1]  }
   0x8   :  { %s145_s19 = smov 24   ;;  %s146_s20 = smov 16   ;;  %v117_v15 = vld [vmem:[%s209_s0 + $0x1] sm:$0x1]   ;;  %vm27_vm4 = vcmask 851712   ;;  %vm33_vm5 = vcmask 786112  }
   0x9   :  { %s147_s0 = smov 8   ;;  %vm39_vm6 = vcmask 720512   ;;  %vm45_vm7 = vcmask 654912   ;;  %vm51_vm8 = vcmask 589312   ;;  %vm57_vm9 = vcmask 523712  }
   0xa   :  { %31 = vrot.lane.b32.xlu0 %v107_v4, %s137_s24  ;;  %37 = vrot.lane.b32.xlu1 %v108_v5, %s138_s25  ;;  %vm63_vm10 = vcmask 458112   ;;  %vm69_vm11 = vcmask 392512   ;;  %vm75_vm12 = vcmask 326912   ;;  %vm81_vm13 = vcmask 261312  }
   0xb   :  { %vm87_vm14 = vcmask 195712   ;;  %vm93_vm15 = vcmask 130112  }
   0xe   :  { %43 = vrot.lane.b32.xlu0 %v109_v7, %s139_s30  ;;  %49 = vrot.lane.b32.xlu1 %v110_v8, %s140_s2 }
  0x12   :  { %55 = vrot.lane.b32.xlu0 %v111_v9, %s141_s7  ;;  %61 = vrot.lane.b32.xlu1 %v112_v10, %s142_s8 }
  0x16   :  { %67 = vrot.lane.b32.xlu0 %v113_v11, %s143_s13  ;;  %73 = vrot.lane.b32.xlu1 %v114_v12, %s144_s14 }
  0x1a   :  { %79 = vrot.lane.b32.xlu0 %v115_v13, %s145_s19  ;;  %85 = vrot.lane.b32.xlu1 %v116_v14, %s146_s20 }
  0x1e   :  { %91 = vrot.lane.b32.xlu0 %v117_v15, %s147_s0 }
  0x74   :  { %v8_v16 = vpop.permute.xlu0 %7   ;;  %v20_v17 = vpop.permute.xlu1 %19  }
  0x75   :  { %10 = vst.msk [vmem:[#allocation0] sm:$0x1] %vm9_vm1, %v8_v16  }
  0x78   :  { %v14_v18 = vpop.permute.xlu0 %13   ;;  %v26_v19 = vpop.permute.xlu1 %25  }
  0x79   :  { %16 = vst.msk [vmem:[#allocation0] sm:$0x1] %vm15_vm2, %v14_v18  }
  0x7a   :  { %22 = vst.msk [vmem:[#allocation0] sm:$0x1] %vm21_vm3, %v20_v17  }
  0x7b   :  { %28 = vst.msk [vmem:[#allocation0] sm:$0x1] %vm27_vm4, %v26_v19  }
  0x7c   :  { %v32_v20 = vpop.permute.xlu0 %31   ;;  %v38_v21 = vpop.permute.xlu1 %37  }
  0x7d   :  { %34 = vst.msk [vmem:[#allocation0] sm:$0x1] %vm33_vm5, %v32_v20  }
  0x7e   :  { %40 = vst.msk [vmem:[#allocation0] sm:$0x1] %vm39_vm6, %v38_v21  }
  0x80   :  { %v44_v22 = vpop.permute.xlu0 %43   ;;  %v50_v23 = vpop.permute.xlu1 %49  }
  0x81   :  { %46 = vst.msk [vmem:[#allocation0] sm:$0x1] %vm45_vm7, %v44_v22  }
  0x82   :  { %52 = vst.msk [vmem:[#allocation0] sm:$0x1] %vm51_vm8, %v50_v23  }
  0x84   :  { %v56_v24 = vpop.permute.xlu0 %55   ;;  %v62_v25 = vpop.permute.xlu1 %61  }
  0x85   :  { %58 = vst.msk [vmem:[#allocation0] sm:$0x1] %vm57_vm9, %v56_v24  }
  0x86   :  { %64 = vst.msk [vmem:[#allocation0] sm:$0x1] %vm63_vm10, %v62_v25  }
  0x88   :  { %v68_v26 = vpop.permute.xlu0 %67   ;;  %v74_v27 = vpop.permute.xlu1 %73  }
  0x89   :  { %70 = vst.msk [vmem:[#allocation0] sm:$0x1] %vm69_vm11, %v68_v26  }
  0x8a   :  { %76 = vst.msk [vmem:[#allocation0] sm:$0x1] %vm75_vm12, %v74_v27  }
  0x8c   :  { %v80_v28 = vpop.permute.xlu0 %79   ;;  %v86_v29 = vpop.permute.xlu1 %85  }
  0x8d   :  { %82 = vst.msk [vmem:[#allocation0] sm:$0x1] %vm81_vm13, %v80_v28  }
  0x8e   :  { %88 = vst.msk [vmem:[#allocation0] sm:$0x1] %vm87_vm14, %v86_v29  }
  0x90   :  { %v92_v30 = vpop.permute.xlu0 %91  }
  0x91   :  { %94 = vst.msk [vmem:[#allocation0] sm:$0x1] %vm93_vm15, %v92_v30  }
  0x98   :  { %v99_v31 = vld [vmem:[#allocation0] sm:$0x1] }
  0x99   :  { %102 = vst [vmem:[%s210_s1] sm:$0x1] %v99_v31 }

// kernel: basic_block_forward.5
= control target key start
LH: loop header
LB: loop body
LE: loop exit
PB: predicated region body
PF: predicated region fallthrough
CT: control target
= control target key end

     0   :  { %s132_s0 = inlined_call_operand.vmem [shape: f32[32,128], index: 0, kind: input, shape index: {}]   ;;  %s133_s1 = inlined_call_operand.vmem [shape: f32[32,128], index: 1, kind: input, shape index: {}]   ;;  %s134_s2 = inlined_call_operand.vmem [shape: f32[1,128], index: 2, kind: input, shape index: {}]   ;;  %s135_s3 = inlined_call_operand.vmem [shape: f32[1,128], index: 3, kind: input, shape index: {}]   ;;  %s136_s4 = inlined_call_operand.vmem [shape: f32[32,128], index: 4, kind: output, shape index: {}]  }
   0x1   :  { %v17_v0 = vld [vmem:[%s132_s0] sm:$0xff]  ;;  %v18_v4 = vld [vmem:[%s132_s0 + $0x8] sm:$0xff]  ;;  %v19_v7 = vld [vmem:[%s132_s0 + $0x10] sm:$0xff] }
   0x2   :  { %v63_v1 = vld [vmem:[%s134_s2] ss:$0 sm:$0xff]  ;;  %v20_v8 = vld [vmem:[%s132_s0 + $0x18] sm:$0xff]  ;;  %v44_v10 = vld [vmem:[%s133_s1 + $0x8] sm:$0xff] }
   0x3   :  { %v64_v2 = vld [vmem:[%s135_s3] ss:$0 sm:$0xff]  ;;  %v28_v3 = vmul.f32 %v63_v1, %v17_v0  ;;  %v29_v6 = vmul.f32 %v63_v1, %v18_v4  ;;  %v30_v11 = vmul.f32 %v63_v1, %v19_v7  ;;  %v31_v12 = vmul.f32 %v63_v1, %v20_v8  ;;  %v45_v14 = vld [vmem:[%s133_s1 + $0x10] sm:$0xff]  ;;  %v46_v15 = vld [vmem:[%s133_s1 + $0x18] sm:$0xff] }
   0x4   :  { %v43_v5 = vld [vmem:[%s133_s1] sm:$0xff] }
   0x5   :  { %v39_v9 = vadd.f32 %v64_v2, %v28_v3  ;;  %v40_v13 = vadd.f32 %v64_v2, %v29_v6  ;;  %v41_v17 = vadd.f32 %v64_v2, %v30_v11  ;;  %v42_v18 = vadd.f32 %v64_v2, %v31_v12 }
   0x7   :  { %v47_v16 = vadd.f32 %v43_v5, %v39_v9  ;;  %v48_v19 = vadd.f32 %v44_v10, %v40_v13  ;;  %v49_v21 = vadd.f32 %v45_v14, %v41_v17  ;;  %v50_v22 = vadd.f32 %v46_v15, %v42_v18 }
   0x9   :  { %v51_v20 = vmax.f32 %v47_v16, 0.0  ;;  %v52_v23 = vmax.f32 %v48_v19, 0.0  ;;  %v53_v24 = vmax.f32 %v49_v21, 0.0  ;;  %v54_v25 = vmax.f32 %v50_v22, 0.0 }
   0xb   :  { %55 = vst [vmem:[%s136_s4] sm:$0xff] %v51_v20  ;;  %56 = vst [vmem:[%s136_s4 + $0x8] sm:$0xff] %v52_v23 }
   0xc   :  { %57 = vst [vmem:[%s136_s4 + $0x10] sm:$0xff] %v53_v24  ;;  %58 = vst [vmem:[%s136_s4 + $0x18] sm:$0xff] %v54_v25 }

// kernel: basic_block_forward.3
= control target key start
LH: loop header
LB: loop body
LE: loop exit
PB: predicated region body
PF: predicated region fallthrough
CT: control target
= control target key end

     0   :  { %s2790_s18 = smov 0   ;;  %s4152_s0 = inlined_call_operand.vmem [shape: f32[2,16,16,8], index: 0, kind: input, shape index: {}]   ;;  %s4153_s1 = inlined_call_operand.vmem [shape: f32[1,1,8], index: 1, kind: input, shape index: {}]   ;;  %s4154_s2 = inlined_call_operand.vmem [shape: f32[1,1,8], index: 2, kind: input, shape index: {}]   ;;  %s4155_s3 = inlined_call_operand.vmem [shape: f32[72,8], index: 3, kind: input, shape index: {}]   ;;  %s4156_s4 = inlined_call_operand.vmem [shape: f32[2,16,16,8], index: 4, kind: output, shape index: {0}]   ;;  %s4157_s5 = inlined_call_operand.vmem [shape: f32[2,2,8], index: 5, kind: output, shape index: {1}]  }
   0x1 LB: > { %s2544_s1 = sadd.s32 4294967295, %s2749_s18   ;;  %p2548_p0 = scmp.ge.s32.totalorder %s2749_s18, 1  ;;  %s2749_s18 = sphi %s2790_s18, %s16_s18  }
   0x2   : > { %p190_p1 = scmp.lt.s32.totalorder %s2749_s18, 3 }
   0x4   : > { %p191_p2 = pnand %p2548_p0, %p190_p1 }
   0x6   : > { %194 = sbr.rel (%p191_p2) target bundleno = 880 (0x370), region = 36 }
   0xb   : > { %vm268_vm0 = vcmask 64512   ;;  %vm271_vm1 = vcmask 58368   ;;  %p2800_p3 = scmp.lt.s32.totalorder %s2544_s1, 1  ;;  %vm277_vm2 = vcmask 57344   ;;  %v2751_v0 = vmov 0.0   ;;  %s2752_s23 = smov 8  }
   0xc   : > { %269 = vst.msk [vmem:[#allocation2] sm:$0xff] %vm268_vm0, %v2751_v0  ;;  %270 = vst.msk [vmem:[#allocation2 + $0x8] sm:$0xff] %vm268_vm0, %v2751_v0  ;;  %s2753_s24 = smov 16   ;;  %s2754_s25 = smov 24   ;;  %vm1692_vm3 = vcmask 130048   ;;  %vm1725_vm4 = vcmask 195584  }
   0xd   : > { %274 = vst.msk [vmem:[#allocation2 + $0x198] sm:$0xff] %vm268_vm0, %v2751_v0  ;;  %275 = vst.msk [vmem:[#allocation2 + $0x1a0] sm:$0xff] %vm268_vm0, %v2751_v0  ;;  %s4283_s1 = smov (!%p2800_p3, %s2544_s1), 1  ;;  %s2755_s7 = smov 32   ;;  %vm1758_vm5 = vcmask 261120   ;;  %vm1791_vm6 = vcmask 326656  }
   0xe   : > { %272 = vst.msk [vmem:[#allocation2 + $0x10] sm:$0x3] %vm271_vm1, %v2751_v0  ;;  %276 = vst.msk [vmem:[#allocation2 + $0x1a8] sm:$0x3] %vm271_vm1, %v2751_v0  ;;  %s2588_s19 = sshll.u32 %s4283_s1, 8  ;;  %s2756_s12 = smov 40  }
   0xf   : > { %279 = vst.msk [vmem:[#allocation2 + $0x18] sm:$0x1] %vm277_vm2, %v2751_v0  ;;  %280 = vst.msk [vmem:[#allocation2 + $0x30] sm:$0x1] %vm277_vm2, %v2751_v0  ;;  %s2856_s22 = scalar_lea.vmem %s4152_s0, %s2588_s19  ;;  %s2757_s17 = smov 48   ;;  %vm1857_vm7 = vcmask 457728  }
  0x10   : > { %281 = vst.msk [vmem:[#allocation2 + $0x48] sm:$0x1] %vm277_vm2, %v2751_v0  ;;  %282 = vst.msk [vmem:[#allocation2 + $0x60] sm:$0x1] %vm277_vm2, %v2751_v0  ;;  %v236_v1 = vld [vmem:[%s2856_s22] sm:$0xff]  ;;  %v238_v2 = vld [vmem:[%s2856_s22 + $0x10] sm:$0xff]  ;;  %s3871_s27 = scalar_lea.vmem %s4156_s4, %s2588_s19 }
  0x11   : > { %283 = vst.msk [vmem:[#allocation2 + $0x78] sm:$0x1] %vm277_vm2, %v2751_v0  ;;  %284 = vst.msk [vmem:[#allocation2 + $0x90] sm:$0x1] %vm277_vm2, %v2751_v0  ;;  %v237_v3 = vld [vmem:[%s2856_s22 + $0x8] sm:$0xff]  ;;  %v240_v4 = vld [vmem:[%s2856_s22 + $0x20] sm:$0xff] }
  0x12   : > { %285 = vst.msk [vmem:[#allocation2 + $0xa8] sm:$0x1] %vm277_vm2, %v2751_v0  ;;  %286 = vst.msk [vmem:[#allocation2 + $0xc0] sm:$0x1] %vm277_vm2, %v2751_v0  ;;  %v239_v5 = vld [vmem:[%s2856_s22 + $0x18] sm:$0xff]  ;;  %v242_v6 = vld [vmem:[%s2856_s22 + $0x30] sm:$0xff] }
  0x13   : > { %287 = vst.msk [vmem:[#allocation2 + $0xd8] sm:$0x1] %vm277_vm2, %v2751_v0  ;;  %288 = vst.msk [vmem:[#allocation2 + $0xf0] sm:$0x1] %vm277_vm2, %v2751_v0  ;;  %v379_v7 = vld [vmem:[#allocation2 + $0x1] sm:$0xff]  ;;  %v243_v11 = vld [vmem:[%s2856_s22 + $0x38] sm:$0xff] }
  0x14   : > { %289 = vst.msk [vmem:[#allocation2 + $0x108] sm:$0x1] %vm277_vm2, %v2751_v0  ;;  %290 = vst.msk [vmem:[#allocation2 + $0x120] sm:$0x1] %vm277_vm2, %v2751_v0  ;;  %v241_v9 = vld [vmem:[%s2856_s22 + $0x28] sm:$0xff]  ;;  %668 = vrot.lane.b32.xlu0 %v379_v7, %s2752_s23  ;;  %v244_v10 = vld [vmem:[%s2856_s22 + $0x40] sm:$0xff] }
  0x15   : > { %291 = vst.msk [vmem:[#allocation2 + $0x138] sm:$0x1] %vm277_vm2, %v2751_v0  ;;  %292 = vst.msk [vmem:[#allocation2 + $0x150] sm:$0x1] %vm277_vm2, %v2751_v0  ;;  %v380_v8 = vld [vmem:[#allocation2 + $0x9] sm:$0xff]  ;;  %v248_v14 = vld [vmem:[%s2856_s22 + $0x60] sm:$0xff] }
  0x16   : > { %293 = vst.msk [vmem:[#allocation2 + $0x168] sm:$0x1] %vm277_vm2, %v2751_v0  ;;  %294 = vst.msk [vmem:[#allocation2 + $0x180] sm:$0x1] %vm277_vm2, %v2751_v0  ;;  %v246_v12 = vld [vmem:[%s2856_s22 + $0x50] sm:$0xff]  ;;  %v245_v13 = vld [vmem:[%s2856_s22 + $0x48] sm:$0xff] }
  0x17   : > { %297 = vst.msk [vmem:[#allocation2 + $0x29] sm:$0x1] %vm277_vm2, %v2751_v0  ;;  %298 = vst.msk [vmem:[#allocation2 + $0x41] sm:$0x1] %vm277_vm2, %v2751_v0  ;;  %v247_v15 = vld [vmem:[%s2856_s22 + $0x58] sm:$0xff]  ;;  %v250_v16 = vld [vmem:[%s2856_s22 + $0x70] sm:$0xff] }
  0x18   : > { %299 = vst.msk [vmem:[#allocation2 + $0x59] sm:$0x1] %vm277_vm2, %v2751_v0  ;;  %300 = vst.msk [vmem:[#allocation2 + $0x71] sm:$0x1] %vm277_vm2, %v2751_v0  ;;  %v249_v17 = vld [vmem:[%s2856_s22 + $0x68] sm:$0xff]  ;;  %v252_v18 = vld [vmem:[%s2856_s22 + $0x80] sm:$0xff]  ;;  %670 = vrot.lane.b32.xlu0 %v380_v8, %s2752_s23 }
  0x19   : > { %301 = vst.msk [vmem:[#allocation2 + $0x89] sm:$0x1] %vm277_vm2, %v2751_v0  ;;  %302 = vst.msk [vmem:[#allocation2 + $0xa1] sm:$0x1] %vm277_vm2, %v2751_v0  ;;  %v251_v19 = vld [vmem:[%s2856_s22 + $0x78] sm:$0xff]  ;;  %v254_v20 = vld [vmem:[%s2856_s22 + $0x90] sm:$0xff] }
  0x1a   : > { %303 = vst.msk [vmem:[#allocation2 + $0xb9] sm:$0x1] %vm277_vm2, %v2751_v0  ;;  %304 = vst.msk [vmem:[#allocation2 + $0xd1] sm:$0x1] %vm277_vm2, %v2751_v0  ;;  %v253_v21 = vld [vmem:[%s2856_s22 + $0x88] sm:$0xff]  ;;  %v256_v22 = vld [vmem:[%s2856_s22 + $0xa0] sm:$0xff] }
  0x1b   : > { %305 = vst.msk [vmem:[#allocation2 + $0xe9] sm:$0x1] %vm277_vm2, %v2751_v0  ;;  %306 = vst.msk [vmem:[#allocation2 + $0x101] sm:$0x1] %vm277_vm2, %v2751_v0  ;;  %v255_v23 = vld [vmem:[%s2856_s22 + $0x98] sm:$0xff]  ;;  %v258_v24 = vld [vmem:[%s2856_s22 + $0xb0] sm:$0xff] }
  0x1c   : > { %307 = vst.msk [vmem:[#allocation2 + $0x119] sm:$0x1] %vm277_vm2, %v2751_v0  ;;  %308 = vst.msk [vmem:[#allocation2 + $0x131] sm:$0x1] %vm277_vm2, %v2751_v0  ;;  %v257_v28 = vld [vmem:[%s2856_s22 + $0xa8] sm:$0xff]  ;;  %v260_v29 = vld [vmem:[%s2856_s22 + $0xc0] sm:$0xff] }
  0x1d   : > { %309 = vst.msk [vmem:[#allocation2 + $0x149] sm:$0x1] %vm277_vm2, %v2751_v0  ;;  %310 = vst.msk [vmem:[#allocation2 + $0x161] sm:$0x1] %vm277_vm2, %v2751_v0  ;;  %v259_v33 = vld [vmem:[%s2856_s22 + $0xb8] sm:$0xff]  ;;  %v262_v34 = vld [vmem:[%s2856_s22 + $0xd0] sm:$0xff] }
  0x1e   : > { %311 = vst.msk [vmem:[#allocation2 + $0x179] sm:$0x1] %vm277_vm2, %v2751_v0  ;;  %312 = vst.msk [vmem:[#allocation2 + $0x191] sm:$0x1] %vm277_vm2, %v2751_v0  ;;  %v261_v35 = vld [vmem:[%s2856_s22 + $0xc8] sm:$0xff]  ;;  %v264_v36 = vld [vmem:[%s2856_s22 + $0xe0] sm:$0xff] }
  0x1f   : > { %296 = vst.msk [vmem:[#allocation2 + $0x11] sm:$0x1] %vm277_vm2, %v2751_v0  ;;  %278 = vst.msk [vmem:[#allocation2] sm:$0x1] %vm277_vm2, %v2751_v0  ;;  %v263_v37 = vld [vmem:[%s2856_s22 + $0xd8] sm:$0xff]  ;;  %v265_v39 = vld [vmem:[%s2856_s22 + $0xe8] sm:$0xff] }
  0x20   : > { %295 = vst.msk [vmem:[#allocation2 + $0x198] sm:$0x1] %vm277_vm2, %v2751_v0  ;;  %313 = vst.msk [vmem:[#allocation2 + $0x1a9] sm:$0x1] %vm277_vm2, %v2751_v0  ;;  %v411_v62 = vld [vmem:[#allocation2 + $0x2] sm:$0xff]  ;;  %s2759_s26 = smov 64  }
  0x21   : > { %315 = vst.msk [vmem:[#allocation2 + $0x19] sm:$0xff] %vm268_vm0, %v236_v1  ;;  %317 = vst.msk [vmem:[#allocation2 + $0x31] sm:$0xff] %vm268_vm0, %v238_v2  ;;  %vm1824_vm8 = vcmask 392192   ;;  %vm1890_vm9 = vcmask 523264   ;;  %vm1932_vm10 = vcmask 588800   ;;  %s2553_s19 = sshll.u32 %s4283_s1, 1 }
  0x22   : > { %316 = vst.msk [vmem:[#allocation2 + $0x21] sm:$0xff] %vm268_vm0, %v237_v3  ;;  %319 = vst.msk [vmem:[#allocation2 + $0x49] sm:$0xff] %vm268_vm0, %v240_v4  ;;  %s235_s30 = scalar_lea.vmem %s4157_s5, %s2553_s19 }
  0x23   : > { %318 = vst.msk [vmem:[#allocation2 + $0x39] sm:$0xff] %vm268_vm0, %v239_v5  ;;  %321 = vst.msk [vmem:[#allocation2 + $0x61] sm:$0xff] %vm268_vm0, %v242_v6 }
  0x24   : > { %320 = vst.msk [vmem:[#allocation2 + $0x51] sm:$0xff] %vm268_vm0, %v241_v9  ;;  %323 = vst.msk [vmem:[#allocation2 + $0x79] sm:$0xff] %vm268_vm0, %v244_v10 }
  0x25   : > { %322 = vst.msk [vmem:[#allocation2 + $0x69] sm:$0xff] %vm268_vm0, %v243_v11  ;;  %325 = vst.msk [vmem:[#allocation2 + $0x91] sm:$0xff] %vm268_vm0, %v246_v12 }
  0x26   : > { %324 = vst.msk [vmem:[#allocation2 + $0x81] sm:$0xff] %vm268_vm0, %v245_v13  ;;  %327 = vst.msk [vmem:[#allocation2 + $0xa9] sm:$0xff] %vm268_vm0, %v248_v14  ;;  %v412_v1 = vld [vmem:[#allocation2 + $0xa] sm:$0xff] }
  0x27   : > { %326 = vst.msk [vmem:[#allocation2 + $0x99] sm:$0xff] %vm268_vm0, %v247_v15  ;;  %329 = vst.msk [vmem:[#allocation2 + $0xc1] sm:$0xff] %vm268_vm0, %v250_v16 }
  0x28   : > { %328 = vst.msk [vmem:[#allocation2 + $0xb1] sm:$0xff] %vm268_vm0, %v249_v17  ;;  %331 = vst.msk [vmem:[#allocation2 + $0xd9] sm:$0xff] %vm268_vm0, %v252_v18  ;;  %v2901_v25 = vld [vmem:[#allocation2 + $0x19] sm:$0xff]  ;;  %v2903_v26 = vld [vmem:[#allocation2 + $0x31] sm:$0xff] }
  0x29   : > { %330 = vst.msk [vmem:[#allocation2 + $0xc9] sm:$0xff] %vm268_vm0, %v251_v19  ;;  %333 = vst.msk [vmem:[#allocation2 + $0xf1] sm:$0xff] %vm268_vm0, %v254_v20  ;;  %672 = vrot.lane.b32.xlu1 %v2901_v25, %s2752_s23  ;;  %v2910_v27 = vld [vmem:[#allocation2 + $0x21] sm:$0xff]  ;;  %676 = vrot.lane.b32.xlu0 %v2903_v26, %s2752_s23  ;;  %v2918_v30 = vld [vmem:[#allocation2 + $0x49] sm:$0xff] }
  0x2a   : > { %332 = vst.msk [vmem:[#allocation2 + $0xe1] sm:$0xff] %vm268_vm0, %v253_v21  ;;  %335 = vst.msk [vmem:[#allocation2 + $0x109] sm:$0xff] %vm268_vm0, %v256_v22  ;;  %v2922_v31 = vld [vmem:[#allocation2 + $0x39] sm:$0xff]  ;;  %v2926_v32 = vld [vmem:[#allocation2 + $0x61] sm:$0xff] }
  0x2b   : > { %334 = vst.msk [vmem:[#allocation2 + $0xf9] sm:$0xff] %vm268_vm0, %v255_v23  ;;  %337 = vst.msk [vmem:[#allocation2 + $0x121] sm:$0xff] %vm268_vm0, %v258_v24  ;;  %v2938_v38 = vld [vmem:[#allocation2 + $0x51] sm:$0xff]  ;;  %v2946_v40 = vld [vmem:[#allocation2 + $0x79] sm:$0xff] }
  0x2c   : > { %336 = vst.msk [vmem:[#allocation2 + $0x111] sm:$0xff] %vm268_vm0, %v257_v28  ;;  %339 = vst.msk [vmem:[#allocation2 + $0x139] sm:$0xff] %vm268_vm0, %v260_v29  ;;  %v2950_v41 = vld [vmem:[#allocation2 + $0x69] sm:$0xff]  ;;  %v391_v42 = vld [vmem:[#allocation2 + $0x91] sm:$0xff] }
  0x2d   : > { %674 = vrot.lane.b32.xlu1 %v2910_v27, %s2752_s23  ;;  %680 = vrot.lane.b32.xlu0 %v2918_v30, %s2752_s23  ;;  %338 = vst.msk [vmem:[#allocation2 + $0x129] sm:$0xff] %vm268_vm0, %v259_v33  ;;  %341 = vst.msk [vmem:[#allocation2 + $0x151] sm:$0xff] %vm268_vm0, %v262_v34  ;;  %v2956_v43 = vld [vmem:[#allocation2 + $0x81] sm:$0xff]  ;;  %v393_v44 = vld [vmem:[#allocation2 + $0xa9] sm:$0xff] }
  0x2e   : > { %340 = vst.msk [vmem:[#allocation2 + $0x141] sm:$0xff] %vm268_vm0, %v261_v35  ;;  %343 = vst.msk [vmem:[#allocation2 + $0x169] sm:$0xff] %vm268_vm0, %v264_v36  ;;  %v392_v45 = vld [vmem:[#allocation2 + $0x99] sm:$0xff]  ;;  %v395_v46 = vld [vmem:[#allocation2 + $0xc1] sm:$0xff] }
  0x2f   : > { %342 = vst.msk [vmem:[#allocation2 + $0x159] sm:$0xff] %vm268_vm0, %v263_v37  ;;  %344 = vst.msk [vmem:[#allocation2 + $0x171] sm:$0xff] %vm268_vm0, %v265_v39  ;;  %v394_v47 = vld [vmem:[#allocation2 + $0xb1] sm:$0xff]  ;;  %v397_v48 = vld [vmem:[#allocation2 + $0xd9] sm:$0xff] }
  0x30   : > { %v396_v49 = vld [vmem:[#allocation2 + $0xc9] sm:$0xff]  ;;  %v399_v50 = vld [vmem:[#allocation2 + $0xf1] sm:$0xff]  ;;  %v2980_v0 = vld [vmem:[#allocation2 + $0x1a] sm:$0xff] }
  0x31   : > { %678 = vrot.lane.b32.xlu1 %v2922_v31, %s2752_s23  ;;  %684 = vrot.lane.b32.xlu0 %v2926_v32, %s2752_s23  ;;  %v398_v51 = vld [vmem:[#allocation2 + $0xe1] sm:$0xff]  ;;  %v401_v52 = vld [vmem:[#allocation2 + $0x109] sm:$0xff]  ;;  %v2985_v2 = vld [vmem:[#allocation2 + $0x32] sm:$0xff] }
  0x32   : > { %v400_v53 = vld [vmem:[#allocation2 + $0xf9] sm:$0xff]  ;;  %v403_v54 = vld [vmem:[#allocation2 + $0x121] sm:$0xff]  ;;  %v2992_v4 = vld [vmem:[#allocation2 + $0x4a] sm:$0xff] }
  0x33   : > { %v402_v55 = vld [vmem:[#allocation2 + $0x111] sm:$0xff]  ;;  %v405_v56 = vld [vmem:[#allocation2 + $0x139] sm:$0xff]  ;;  %v2988_v3 = vld [vmem:[#allocation2 + $0x22] sm:$0xff] }
  0x34   : > { %v404_v57 = vld [vmem:[#allocation2 + $0x129] sm:$0xff]  ;;  %v407_v58 = vld [vmem:[#allocation2 + $0x151] sm:$0xff]  ;;  %v2996_v5 = vld [vmem:[#allocation2 + $0x3a] sm:$0xff] }
  0x35   : > { %682 = vrot.lane.b32.xlu1 %v2938_v38, %s2752_s23  ;;  %688 = vrot.lane.b32.xlu0 %v2946_v40, %s2752_s23  ;;  %v406_v59 = vld [vmem:[#allocation2 + $0x141] sm:$0xff]  ;;  %v409_v60 = vld [vmem:[#allocation2 + $0x169] sm:$0xff]  ;;  %v3004_v7 = vld [vmem:[#allocation2 + $0x52] sm:$0xff] }
  0x36   : > { %v408_v61 = vld [vmem:[#allocation2 + $0x159] sm:$0xff]  ;;  %v410_v63 = vld [vmem:[#allocation2 + $0x171] sm:$0xff]  ;;  %v3000_v6 = vld [vmem:[#allocation2 + $0x62] sm:$0xff] }
  0x37   : > { %v3008_v8 = vld [vmem:[#allocation2 + $0x7a] sm:$0xff]  ;;  %v3012_v9 = vld [vmem:[#allocation2 + $0x6a] sm:$0xff]  ;;  %v3016_v10 = vld [vmem:[#allocation2 + $0x92] sm:$0xff] }
  0x38   : > { %v3020_v11 = vld [vmem:[#allocation2 + $0x82] sm:$0xff]  ;;  %v3024_v12 = vld [vmem:[#allocation2 + $0xaa] sm:$0xff]  ;;  %v3028_v13 = vld [vmem:[#allocation2 + $0x9a] sm:$0xff] }
  0x39   : > { %686 = vrot.lane.b32.xlu1 %v2950_v41, %s2752_s23  ;;  %692 = vrot.lane.b32.xlu0 %v391_v42, %s2752_s23  ;;  %v3032_v14 = vld [vmem:[#allocation2 + $0xc2] sm:$0xff]  ;;  %v3036_v15 = vld [vmem:[#allocation2 + $0xb2] sm:$0xff]  ;;  %v429_v16 = vld [vmem:[#allocation2 + $0xda] sm:$0xff] }
  0x3a   : > { %v3042_v17 = vld [vmem:[#allocation2 + $0xca] sm:$0xff]  ;;  %v431_v18 = vld [vmem:[#allocation2 + $0xf2] sm:$0xff]  ;;  %v430_v19 = vld [vmem:[#allocation2 + $0xe2] sm:$0xff] }
  0x3b   : > { %v433_v20 = vld [vmem:[#allocation2 + $0x10a] sm:$0xff]  ;;  %v432_v21 = vld [vmem:[#allocation2 + $0xfa] sm:$0xff]  ;;  %v435_v22 = vld [vmem:[#allocation2 + $0x122] sm:$0xff] }
  0x3c   : > { %v434_v23 = vld [vmem:[#allocation2 + $0x112] sm:$0xff]  ;;  %v437_v24 = vld [vmem:[#allocation2 + $0x13a] sm:$0xff]  ;;  %v436_v29 = vld [vmem:[#allocation2 + $0x12a] sm:$0xff] }
  0x3d   : > { %690 = vrot.lane.b32.xlu1 %v2956_v43, %s2752_s23  ;;  %696 = vrot.lane.b32.xlu0 %v393_v44, %s2752_s23  ;;  %v439_v33 = vld [vmem:[#allocation2 + $0x152] sm:$0xff]  ;;  %v438_v35 = vld [vmem:[#allocation2 + $0x142] sm:$0xff]  ;;  %v441_v37 = vld [vmem:[#allocation2 + $0x16a] sm:$0xff] }
  0x3e   : > { %v440_v42 = vld [vmem:[#allocation2 + $0x15a] sm:$0xff] }
  0x41   : > { %694 = vrot.lane.b32.xlu1 %v392_v45, %s2752_s23  ;;  %700 = vrot.lane.b32.xlu0 %v395_v46, %s2752_s23  ;;  %v3071_v46 = vld [vmem:[#allocation2 + $0x18] sm:$0xff] }
  0x45   : > { %698 = vrot.lane.b32.xlu1 %v394_v47, %s2752_s23  ;;  %704 = vrot.lane.b32.xlu0 %v397_v48, %s2752_s23  ;;  %v442_v47 = vld [vmem:[#allocation2 + $0x172] sm:$0xff] }
  0x49   : > { %702 = vrot.lane.b32.xlu1 %v396_v49, %s2752_s23  ;;  %708 = vrot.lane.b32.xlu0 %v399_v50, %s2752_s23  ;;  %v3080_v50 = vld [vmem:[#allocation2 + $0x30] sm:$0xff] }
  0x4d   : > { %706 = vrot.lane.b32.xlu1 %v398_v51, %s2752_s23  ;;  %712 = vrot.lane.b32.xlu0 %v401_v52, %s2752_s23  ;;  %v3086_v52 = vld [vmem:[#allocation2 + $0x20] sm:$0xff] }
  0x51   : > { %710 = vrot.lane.b32.xlu1 %v400_v53, %s2752_s23  ;;  %716 = vrot.lane.b32.xlu0 %v403_v54, %s2752_s23  ;;  %v3092_v54 = vld [vmem:[#allocation2 + $0x48] sm:$0xff] }
  0x55   : > { %714 = vrot.lane.b32.xlu1 %v402_v55, %s2752_s23  ;;  %720 = vrot.lane.b32.xlu0 %v405_v56, %s2752_s23  ;;  %v3098_v56 = vld [vmem:[#allocation2 + $0x38] sm:$0xff] }
  0x59   : > { %718 = vrot.lane.b32.xlu1 %v404_v57, %s2752_s23  ;;  %724 = vrot.lane.b32.xlu0 %v407_v58, %s2752_s23  ;;  %v3104_v58 = vld [vmem:[#allocation2 + $0x60] sm:$0xff] }
  0x5d   : > { %722 = vrot.lane.b32.xlu1 %v406_v59, %s2752_s23  ;;  %728 = vrot.lane.b32.xlu0 %v409_v60, %s2752_s23  ;;  %v3110_v60 = vld [vmem:[#allocation2 + $0x50] sm:$0xff] }
  0x61   : > { %726 = vrot.lane.b32.xlu1 %v408_v61, %s2752_s23  ;;  %796 = vrot.lane.b32.xlu0 %v411_v62, %s2753_s24  ;;  %v3116_v62 = vld [vmem:[#allocation2 + $0x78] sm:$0xff] }
  0x65   : > { %730 = vrot.lane.b32.xlu1 %v410_v63, %s2752_s23  ;;  %800 = vrot.lane.b32.xlu0 %v2980_v0, %s2753_s24 }
  0x69   : > { %798 = vrot.lane.b32.xlu1 %v412_v1, %s2753_s24  ;;  %804 = vrot.lane.b32.xlu0 %v2985_v2, %s2753_s24  ;;  %v3122_v1 = vld [vmem:[#allocation2 + $0x68] sm:$0xff] }
  0x6d   : > { %802 = vrot.lane.b32.xlu1 %v2988_v3, %s2753_s24  ;;  %808 = vrot.lane.b32.xlu0 %v2992_v4, %s2753_s24 }
  0x71   : > { %806 = vrot.lane.b32.xlu1 %v2996_v5, %s2753_s24  ;;  %812 = vrot.lane.b32.xlu0 %v3000_v6, %s2753_s24 }
  0x75   : > { %810 = vrot.lane.b32.xlu1 %v3004_v7, %s2753_s24  ;;  %816 = vrot.lane.b32.xlu0 %v3008_v8, %s2753_s24 }
  0x79   : > { %814 = vrot.lane.b32.xlu1 %v3012_v9, %s2753_s24  ;;  %820 = vrot.lane.b32.xlu0 %v3016_v10, %s2753_s24 }
  0x7d   : > { %818 = vrot.lane.b32.xlu1 %v3020_v11, %s2753_s24  ;;  %824 = vrot.lane.b32.xlu0 %v3024_v12, %s2753_s24 }
  0x81   : > { %822 = vrot.lane.b32.xlu1 %v3028_v13, %s2753_s24  ;;  %828 = vrot.lane.b32.xlu0 %v3032_v14, %s2753_s24 }
  0x85   : > { %826 = vrot.lane.b32.xlu1 %v3036_v15, %s2753_s24  ;;  %832 = vrot.lane.b32.xlu0 %v429_v16, %s2753_s24 }
  0x86   : > { %v3052_v28 = vpop.permute.xlu0 %668 }
  0x89   : > { %830 = vrot.lane.b32.xlu1 %v3042_v17, %s2753_s24  ;;  %836 = vrot.lane.b32.xlu0 %v431_v18, %s2753_s24  ;;  %v3128_v18 = vld [vmem:[#allocation2 + $0x90] sm:$0xff] }
  0x8a   : > { %v3056_v34 = vpop.permute.xlu0 %670  ;;  %4171 = vst [vmem:[#allocation12_spill] sm:$0xff] %v3128_v18 }
  0x8d   : > { %834 = vrot.lane.b32.xlu1 %v430_v19, %s2753_s24  ;;  %840 = vrot.lane.b32.xlu0 %v433_v20, %s2753_s24  ;;  %v3134_v20 = vld [vmem:[#allocation2 + $0x80] sm:$0xff] }
  0x91   : > { %838 = vrot.lane.b32.xlu1 %v432_v21, %s2753_s24  ;;  %844 = vrot.lane.b32.xlu0 %v435_v22, %s2753_s24  ;;  %v3140_v22 = vld [vmem:[#allocation2 + $0xa8] sm:$0xff] }
  0x95   : > { %842 = vrot.lane.b32.xlu1 %v434_v23, %s2753_s24  ;;  %848 = vrot.lane.b32.xlu0 %v437_v24, %s2753_s24  ;;  %v3146_v24 = vld [vmem:[#allocation2 + $0x98] sm:$0xff] }
  0x96   : > { %4175 = vst [vmem:[#allocation16_spill] sm:$0xff] %v3146_v24 }
  0x99   : > { %846 = vrot.lane.b32.xlu1 %v436_v29, %s2753_s24  ;;  %852 = vrot.lane.b32.xlu0 %v439_v33, %s2753_s24  ;;  %v3152_v33 = vld [vmem:[#allocation2 + $0xc0] sm:$0xff] }
  0x9b   : > { %v3060_v36 = vpop.permute.xlu1 %672  ;;  %v3062_v39 = vpop.permute.xlu0 %676 }
  0x9d   : > { %850 = vrot.lane.b32.xlu1 %v438_v35, %s2753_s24  ;;  %856 = vrot.lane.b32.xlu0 %v441_v37, %s2753_s24  ;;  %v3158_v37 = vld [vmem:[#allocation2 + $0xb0] sm:$0xff] }
  0x9f   : > { %v3066_v44 = vpop.permute.xlu1 %674  ;;  %v3068_v45 = vpop.permute.xlu0 %680 }
  0xa1   : > { %854 = vrot.lane.b32.xlu1 %v440_v42, %s2753_s24  ;;  %924 = vrot.lane.b32.xlu0 %v3071_v46, %s2754_s25 }
  0xa3   : > { %v3075_v48 = vpop.permute.xlu1 %678  ;;  %v3077_v49 = vpop.permute.xlu0 %684 }
  0xa4   : > { %4162 = vst [vmem:[#allocation3_spill] sm:$0xff] %v3077_v49 }
  0xa5   : > { %858 = vrot.lane.b32.xlu1 %v442_v47, %s2753_s24  ;;  %928 = vrot.lane.b32.xlu0 %v3080_v50, %s2754_s25  ;;  %v3164_v47 = vld [vmem:[#allocation2 + $0xd8] sm:$0xff]  ;;  %s2758_s24 = smov 56  }
  0xa7   : > { %v3084_v51 = vpop.permute.xlu1 %682  ;;  %v3088_v53 = vpop.permute.xlu0 %688 }
  0xa8   : > { %4163 = vst [vmem:[#allocation4_spill] sm:$0xff] %v3084_v51  ;;  %4164 = vst [vmem:[#allocation5_spill] sm:$0xff] %v3088_v53 }
  0xa9   : > { %926 = vrot.lane.b32.xlu1 %v3086_v52, %s2754_s25  ;;  %932 = vrot.lane.b32.xlu0 %v3092_v54, %s2754_s25 }
  0xab   : > { %v3096_v55 = vpop.permute.xlu1 %686  ;;  %v3100_v57 = vpop.permute.xlu0 %692 }
  0xac   : > { %4165 = vst [vmem:[#allocation6_spill] sm:$0xff] %v3096_v55  ;;  %4166 = vst [vmem:[#allocation7_spill] sm:$0xff] %v3100_v57 }
  0xad   : > { %930 = vrot.lane.b32.xlu1 %v3098_v56, %s2754_s25  ;;  %936 = vrot.lane.b32.xlu0 %v3104_v58, %s2754_s25 }
  0xaf   : > { %v3108_v59 = vpop.permute.xlu1 %690  ;;  %v3112_v61 = vpop.permute.xlu0 %696 }
  0xb0   : > { %4167 = vst [vmem:[#allocation8_spill] sm:$0xff] %v3108_v59  ;;  %4168 = vst [vmem:[#allocation9_spill] sm:$0xff] %v3112_v61  ;;  %v3194_v61 = vld [vmem:[#allocation2 + $0xf8] sm:$0xff] }
  0xb1   : > { %934 = vrot.lane.b32.xlu1 %v3110_v60, %s2754_s25  ;;  %940 = vrot.lane.b32.xlu0 %v3116_v62, %s2754_s25 }
  0xb3   : > { %v3120_v63 = vpop.permute.xlu1 %694  ;;  %v3124_v16 = vpop.permute.xlu0 %700 }
  0xb4   : > { %4169 = vst [vmem:[#allocation10_spill] sm:$0xff] %v3120_v63  ;;  %4170 = vst [vmem:[#allocation11_spill] sm:$0xff] %v3124_v16  ;;  %v3182_v16 = vld [vmem:[#allocation2 + $0xe0] sm:$0xff] }
  0xb5   : > { %938 = vrot.lane.b32.xlu1 %v3122_v1, %s2754_s25  ;;  %944 = vrot.lane.b32.xlu0 %v3128_v18, %s2754_s25 }
  0xb7   : > { %v3132_v19 = vpop.permute.xlu1 %698  ;;  %v3136_v21 = vpop.permute.xlu0 %704 }
  0xb8   : > { %4172 = vst [vmem:[#allocation13_spill] sm:$0xff] %v3132_v19  ;;  %4173 = vst [vmem:[#allocation14_spill] sm:$0xff] %v3136_v21  ;;  %v3170_v21 = vld [vmem:[#allocation2 + $0xc8] sm:$0xff] }
  0xb9   : > { %942 = vrot.lane.b32.xlu1 %v3134_v20, %s2754_s25  ;;  %948 = vrot.lane.b32.xlu0 %v3140_v22, %s2754_s25 }
  0xbb   : > { %v3144_v23 = vpop.permute.xlu1 %702  ;;  %v3148_v29 = vpop.permute.xlu0 %708 }
  0xbc   : > { %4174 = vst [vmem:[#allocation15_spill] sm:$0xff] %v3144_v23  ;;  %4176 = vst [vmem:[#allocation17_spill] sm:$0xff] %v3148_v29 }
  0xbd   : > { %946 = vrot.lane.b32.xlu1 %v3146_v24, %s2754_s25  ;;  %952 = vrot.lane.b32.xlu0 %v3152_v33, %s2754_s25 }
  0xbf   : > { %v3156_v35 = vpop.permute.xlu1 %706  ;;  %v3160_v42 = vpop.permute.xlu0 %712 }
  0xc0   : > { %4177 = vst [vmem:[#allocation18_spill] sm:$0xff] %v3156_v35  ;;  %4178 = vst [vmem:[#allocation19_spill] sm:$0xff] %v3160_v42  ;;  %v3176_v35 = vld [vmem:[#allocation2 + $0xf0] sm:$0xff] }
  0xc1   : > { %950 = vrot.lane.b32.xlu1 %v3158_v37, %s2754_s25  ;;  %956 = vrot.lane.b32.xlu0 %v3164_v47, %s2754_s25 }
  0xc3   : > { %v3168_v29 = vpop.permute.xlu1 %710  ;;  %v3172_v23 = vpop.permute.xlu0 %716 }
  0xc4   : > { %4179 = vst [vmem:[#allocation20_spill] sm:$0xff] %v3168_v29  ;;  %4180 = vst [vmem:[#allocation21_spill] sm:$0xff] %v3172_v23  ;;  %v3188_v29 = vld [vmem:[#allocation2 + $0x108] sm:$0xff] }
  0xc5   : > { %954 = vrot.lane.b32.xlu1 %v3170_v21, %s2754_s25  ;;  %960 = vrot.lane.b32.xlu0 %v3176_v35, %s2754_s25 }
  0xc7   : > { %v3180_v42 = vpop.permute.xlu1 %714  ;;  %v3184_v19 = vpop.permute.xlu0 %720 }
  0xc8   : > { %4181 = vst [vmem:[#allocation22_spill] sm:$0xff] %v3180_v42  ;;  %4182 = vst [vmem:[#allocation23_spill] sm:$0xff] %v3184_v19  ;;  %v3200_v42 = vld [vmem:[#allocation2 + $0x120] sm:$0xff] }
  0xc9   : > { %958 = vrot.lane.b32.xlu1 %v3182_v16, %s2754_s25  ;;  %964 = vrot.lane.b32.xlu0 %v3188_v29, %s2754_s25  ;;  %4185 = vst [vmem:[#allocation26_spill] sm:$0xff] %v3200_v42  ;;  %v1931_v19 = vld [vmem:[%s4155_s3 + $0x40] sm:$0xff] }
  0xca   : > { %2631 = vmatprep.subr.mxu0 %v1931_v19  ;;  %2697 = vmatprep.subr.mxu1 %v1931_v19 }
  0xcb   : > { %v3192_v23 = vpop.permute.xlu1 %718  ;;  %v3196_v63 = vpop.permute.xlu0 %724  ;;  %2632 = vmatpush3.msra.mxu0 %v1931_v19  ;;  %2706 = vmatpush3.msra.mxu1 %v1931_v19  ;;  %v1927_v19 = vld [vmem:[%s4155_s3 + $0x20] sm:$0xff] }
  0xcc   : > { %4183 = vst [vmem:[#allocation24_spill] sm:$0xff] %v3192_v23  ;;  %4184 = vst [vmem:[#allocation25_spill] sm:$0xff] %v3196_v63  ;;  %v3209_v23 = vld [vmem:[#allocation2 + $0x110] sm:$0xff]  ;;  %v1930_v63 = vld [vmem:[%s4155_s3 + $0x38] sm:$0xff] }
  0xcd   : > { %962 = vrot.lane.b32.xlu1 %v3194_v61, %s2754_s25  ;;  %968 = vrot.lane.b32.xlu0 %v3200_v42, %s2754_s25 }
  0xce   : > { %2633 = vmatprep.subr.mxu0 %v1930_v63  ;;  %2698 = vmatprep.subr.mxu1 %v1930_v63 }
  0xcf   : > { %v3207_v57 = vpop.permute.xlu1 %722  ;;  %v3214_v59 = vpop.permute.xlu0 %728  ;;  %2634 = vmatpush3.msra.mxu0 %v1930_v63  ;;  %2707 = vmatpush3.msra.mxu1 %v1930_v63 }
  0xd0   : > { %4186 = vst [vmem:[#allocation27_spill] sm:$0xff] %v3207_v57  ;;  %4187 = vst [vmem:[#allocation28_spill] sm:$0xff] %v3214_v59  ;;  %v1929_v57 = vld [vmem:[%s4155_s3 + $0x30] sm:$0xff]  ;;  %v1928_v59 = vld [vmem:[%s4155_s3 + $0x28] sm:$0xff] }
  0xd1   : > { %966 = vrot.lane.b32.xlu1 %v3209_v23, %s2754_s25  ;;  %1054 = vrot.lane.b32.xlu0 %v2910_v27, %s2755_s7 }
  0xd2   : > { %2635 = vmatprep.subr.mxu0 %v1929_v57  ;;  %2699 = vmatprep.subr.mxu1 %v1929_v57 }
  0xd3   : > { %v3223_v53 = vpop.permute.xlu1 %726  ;;  %2636 = vmatpush3.msra.mxu0 %v1929_v57  ;;  %v3228_v55 = vpop.permute.xlu0 %796  ;;  %2708 = vmatpush3.msra.mxu1 %v1929_v57  ;;  %v1923_v57 = vld [vmem:[%s4155_s3] sm:$0xff] }
  0xd4   : > { %4188 = vst [vmem:[#allocation29_spill] sm:$0xff] %v3223_v53  ;;  %2637 = vmatprep.subr.mxu0 %v1928_v59  ;;  %v1926_v53 = vld [vmem:[%s4155_s3 + $0x18] sm:$0xff]  ;;  %2700 = vmatprep.subr.mxu1 %v1928_v59 }
  0xd5   : > { %1052 = vrot.lane.b32.xlu1 %v2901_v25, %s2755_s7  ;;  %2638 = vmatpush3.msra.mxu0 %v1928_v59 }
  0xd6   : > { %1182 = vrot.lane.b32.xlu0 %v2988_v3, %s2756_s12  ;;  %2639 = vmatprep.subr.mxu0 %v1927_v19  ;;  %v1925_v3 = vld [vmem:[%s4155_s3 + $0x10] sm:$0xff] }
  0xd7   : > { %v3237_v27 = vpop.permute.xlu1 %730  ;;  %2640 = vmatpush3.msra.mxu0 %v1927_v19  ;;  %v3242_v25 = vpop.permute.xlu0 %800  ;;  %2709 = vmatpush3.msra.mxu1 %v1928_v59 }
  0xd8   : > { %4189 = vst [vmem:[#allocation30_spill] sm:$0xff] %v3237_v27  ;;  %2641 = vmatprep.subr.mxu0 %v1926_v53  ;;  %v1924_v27 = vld [vmem:[%s4155_s3 + $0x8] sm:$0xff]  ;;  %2701 = vmatprep.subr.mxu1 %v1927_v19 }
  0xd9   : > { %1180 = vrot.lane.b32.xlu1 %v2980_v0, %s2756_s12  ;;  %2642 = vmatpush3.msra.mxu0 %v1926_v53 }
  0xda   : > { %1310 = vrot.lane.b32.xlu0 %v3098_v56, %s2757_s17  ;;  %2643 = vmatprep.subr.mxu0 %v1925_v3 }
  0xdb   : > { %v3251_v63 = vpop.permute.xlu1 %798  ;;  %2644 = vmatpush3.msra.mxu0 %v1925_v3  ;;  %v3256_v0 = vpop.permute.xlu0 %804  ;;  %2710 = vmatpush3.msra.mxu1 %v1927_v19 }
  0xdc   : > { %2645 = vmatprep.subr.mxu0 %v1924_v27  ;;  %2702 = vmatprep.subr.mxu1 %v1926_v53 }
  0xdd   : > { %1308 = vrot.lane.b32.xlu1 %v3080_v50, %s2757_s17  ;;  %2646 = vmatpush3.msra.mxu0 %v1924_v27 }
  0xde   : > { %1056 = vrot.lane.b32.xlu0 %v2903_v26, %s2755_s7  ;;  %2647 = vmatprep.subr.mxu0 %v1923_v57 }
  0xdf   : > { %v3265_v42 = vpop.permute.xlu1 %802  ;;  %2648 = vmatpush3.msra.mxu0 %v1923_v57  ;;  %v3267_v49 = vpop.permute.xlu0 %808  ;;  %2711 = vmatpush3.msra.mxu1 %v1926_v53 }
  0xe0   : > { %2703 = vmatprep.subr.mxu1 %v1925_v3 }
  0xe1   : > { %1436 = vrot.lane.b32.xlu1 %v2903_v26, %s2758_s24  ;;  %2712 = vmatpush3.msra.mxu1 %v1925_v3 }
  0xe2   : > { %1564 = vrot.lane.b32.xlu0 %v2985_v2, %s2759_s26  ;;  %2704 = vmatprep.subr.mxu1 %v1924_v27 }
  0xe3   : > { %v3273_v59 = vpop.permute.xlu1 %806  ;;  %v3275_v51 = vpop.permute.xlu0 %812  ;;  %2713 = vmatpush3.msra.mxu1 %v1924_v27 }
  0xe4   : > { %2705 = vmatprep.subr.mxu1 %v1923_v57 }
  0xe5   : > { %1438 = vrot.lane.b32.xlu1 %v2922_v31, %s2758_s24  ;;  %2714 = vmatpush3.msra.mxu1 %v1923_v57 }
  0xe6   : > { %1184 = vrot.lane.b32.xlu0 %v2985_v2, %s2756_s12 }
  0xe7   : > { %v3281_v26 = vpop.permute.xlu1 %810  ;;  %v3283_v19 = vpop.permute.xlu0 %816 }
  0xe9   : > { %1058 = vrot.lane.b32.xlu1 %v2922_v31, %s2755_s7 }
  0xea   : > { %1186 = vrot.lane.b32.xlu0 %v2996_v5, %s2756_s12 }
  0xeb   : > { %v3289_v53 = vpop.permute.xlu1 %814  ;;  %v3291_v3 = vpop.permute.xlu0 %820 }
  0xec   : > { %4190 = vst [vmem:[#allocation31_spill] sm:$0xff] %v3291_v3 }
  0xed   : > { %1566 = vrot.lane.b32.xlu1 %v2996_v5, %s2759_s26 }
  0xee   : > { %1314 = vrot.lane.b32.xlu0 %v3110_v60, %s2757_s17 }
  0xef   : > { %v3297_v2 = vpop.permute.xlu1 %818  ;;  %v3299_v27 = vpop.permute.xlu0 %824 }
  0xf0   : > { %4191 = vst [vmem:[#allocation32_spill] sm:$0xff] %v3299_v27 }
  0xf1   : > { %1312 = vrot.lane.b32.xlu1 %v3092_v54, %s2757_s17 }
  0xf2   : > { %1060 = vrot.lane.b32.xlu0 %v2918_v30, %s2755_s7 }
  0xf3   : > { %v3305_v31 = vpop.permute.xlu1 %822  ;;  %v3307_v57 = vpop.permute.xlu0 %828 }
  0xf4   : > { %4192 = vst [vmem:[#allocation33_spill] sm:$0xff] %v3305_v31  ;;  %4193 = vst [vmem:[#allocation34_spill] sm:$0xff] %v3307_v57 }
  0xf5   : > { %1440 = vrot.lane.b32.xlu1 %v2918_v30, %s2758_s24 }
  0xf6   : > { %1568 = vrot.lane.b32.xlu0 %v2992_v4, %s2759_s26 }
  0xf7   : > { %v3313_v5 = vpop.permute.xlu1 %826  ;;  %v3315_v3 = vpop.permute.xlu0 %832 }
  0xf8   : > { %4194 = vst [vmem:[#allocation35_spill] sm:$0xff] %v3313_v5  ;;  %4195 = vst [vmem:[#allocation36_spill] sm:$0xff] %v3315_v3 }
  0xf9   : > { %1442 = vrot.lane.b32.xlu1 %v2938_v38, %s2758_s24 }
  0xfa   : > { %1188 = vrot.lane.b32.xlu0 %v2992_v4, %s2756_s12 }
  0xfb   : > { %v3321_v27 = vpop.permute.xlu1 %830  ;;  %v3323_v31 = vpop.permute.xlu0 %836 }
  0xfc   : > { %4196 = vst [vmem:[#allocation37_spill] sm:$0xff] %v3321_v27  ;;  %4197 = vst [vmem:[#allocation38_spill] sm:$0xff] %v3323_v31 }
  0xfd   : > { %1062 = vrot.lane.b32.xlu1 %v2938_v38, %s2755_s7 }
  0xfe   : > { %1190 = vrot.lane.b32.xlu0 %v3004_v7, %s2756_s12 }
  0xff   : > { %v3329_v30 = vpop.permute.xlu1 %834  ;;  %v3331_v57 = vpop.permute.xlu0 %840 }
 0x100   : > { %4198 = vst [vmem:[#allocation39_spill] sm:$0xff] %v3329_v30  ;;  %4199 = vst [vmem:[#allocation40_spill] sm:$0xff] %v3331_v57 }
 0x101   : > { %1570 = vrot.lane.b32.xlu1 %v3004_v7, %s2759_s26 }
 0x102   : > { %1318 = vrot.lane.b32.xlu0 %v3122_v1, %s2757_s17 }
 0x103   : > { %v3337_v4 = vpop.permute.xlu1 %838  ;;  %v3339_v3 = vpop.permute.xlu0 %844 }
 0x104   : > { %4200 = vst [vmem:[#allocation41_spill] sm:$0xff] %v3337_v4  ;;  %4201 = vst [vmem:[#allocation42_spill] sm:$0xff] %v3339_v3  ;;  %v485_v4 = vld [vmem:[#allocation2 + $0x91] sm:$0xff] }
 0x105   : > { %1316 = vrot.lane.b32.xlu1 %v3104_v58, %s2757_s17 }
 0x106   : > { %1064 = vrot.lane.b32.xlu0 %v2926_v32, %s2755_s7 }
 0x107   : > { %v3345_v38 = vpop.permute.xlu1 %842  ;;  %v3347_v31 = vpop.permute.xlu0 %848 }
 0x108   : > { %4202 = vst [vmem:[#allocation43_spill] sm:$0xff] %v3345_v38  ;;  %4203 = vst [vmem:[#allocation44_spill] sm:$0xff] %v3347_v31 }
 0x109   : > { %1444 = vrot.lane.b32.xlu1 %v2926_v32, %s2758_s24 }
 0x10a   : > { %1572 = vrot.lane.b32.xlu0 %v3000_v6, %s2759_s26 }
 0x10b   : > { %v3353_v7 = vpop.permute.xlu1 %846  ;;  %v3355_v57 = vpop.permute.xlu0 %852 }
 0x10c   : > { %4204 = vst [vmem:[#allocation45_spill] sm:$0xff] %v3353_v7  ;;  %4205 = vst [vmem:[#allocation46_spill] sm:$0xff] %v3355_v57 }
 0x10d   : > { %1446 = vrot.lane.b32.xlu1 %v2950_v41, %s2758_s24 }
 0x10e   : > { %1192 = vrot.lane.b32.xlu0 %v3000_v6, %s2756_s12 }
 0x10f   : > { %v3361_v3 = vpop.permute.xlu1 %850  ;;  %v3363_v38 = vpop.permute.xlu0 %856 }
 0x110   : > { %4206 = vst [vmem:[#allocation47_spill] sm:$0xff] %v3361_v3  ;;  %4207 = vst [vmem:[#allocation48_spill] sm:$0xff] %v3363_v38 }
 0x111   : > { %1066 = vrot.lane.b32.xlu1 %v2950_v41, %s2755_s7 }
 0x112   : > { %1194 = vrot.lane.b32.xlu0 %v3012_v9, %s2756_s12 }
 0x113   : > { %v3369_v32 = vpop.permute.xlu1 %854  ;;  %v3371_v31 = vpop.permute.xlu0 %924 }
 0x114   : > { %4208 = vst [vmem:[#allocation49_spill] sm:$0xff] %v3369_v32 }
 0x115   : > { %1574 = vrot.lane.b32.xlu1 %v3012_v9, %s2759_s26 }
 0x116   : > { %1322 = vrot.lane.b32.xlu0 %v3134_v20, %s2757_s17 }
 0x117   : > { %v3377_v6 = vpop.permute.xlu1 %858  ;;  %v3379_v57 = vpop.permute.xlu0 %928 }
 0x118   : > { %4209 = vst [vmem:[#allocation50_spill] sm:$0xff] %v3377_v6 }
 0x119   : > { %1320 = vrot.lane.b32.xlu1 %v3116_v62, %s2757_s17 }
 0x11a   : > { %1068 = vrot.lane.b32.xlu0 %v2946_v40, %s2755_s7 }
 0x11b   : > { %v3385_v41 = vpop.permute.xlu1 %926  ;;  %v3387_v38 = vpop.permute.xlu0 %932 }
 0x11d   : > { %1448 = vrot.lane.b32.xlu1 %v2946_v40, %s2758_s24 }
 0x11e   : > { %1576 = vrot.lane.b32.xlu0 %v3008_v8, %s2759_s26 }
 0x11f   : > { %v3393_v9 = vpop.permute.xlu1 %930  ;;  %v3395_v6 = vpop.permute.xlu0 %936 }
 0x121   : > { %1450 = vrot.lane.b32.xlu1 %v2956_v43, %s2758_s24 }
 0x122   : > { %1196 = vrot.lane.b32.xlu0 %v3008_v8, %s2756_s12 }
 0x123   : > { %v3401_v32 = vpop.permute.xlu1 %934  ;;  %v3403_v3 = vpop.permute.xlu0 %940 }
 0x125   : > { %1070 = vrot.lane.b32.xlu1 %v2956_v43, %s2755_s7 }
 0x126   : > { %1198 = vrot.lane.b32.xlu0 %v3020_v11, %s2756_s12 }
 0x127   : > { %v3409_v40 = vpop.permute.xlu1 %938  ;;  %v3411_v7 = vpop.permute.xlu0 %944 }
 0x129   : > { %1578 = vrot.lane.b32.xlu1 %v3020_v11, %s2759_s26  ;;  %v581_v11 = vld [vmem:[#allocation2 + $0x99] sm:$0xff] }
 0x12a   : > { %1326 = vrot.lane.b32.xlu0 %v3146_v24, %s2757_s17 }
 0x12b   : > { %v3417_v8 = vpop.permute.xlu1 %942  ;;  %v3419_v30 = vpop.permute.xlu0 %948 }
 0x12c   : > { %4210 = vst [vmem:[#allocation51_spill] sm:$0xff] %v3419_v30 }
 0x12d   : > { %1324 = vrot.lane.b32.xlu1 %v3128_v18, %s2757_s17 }
 0x12e   : > { %1072 = vrot.lane.b32.xlu0 %v485_v4, %s2755_s7 }
 0x12f   : > { %v3424_v43 = vpop.permute.xlu1 %946  ;;  %v3426_v27 = vpop.permute.xlu0 %952 }
 0x130   : > { %4211 = vst [vmem:[#allocation52_spill] sm:$0xff] %v3424_v43  ;;  %4212 = vst [vmem:[#allocation53_spill] sm:$0xff] %v3426_v27 }
 0x131   : > { %1452 = vrot.lane.b32.xlu1 %v485_v4, %s2758_s24 }
 0x132   : > { %1580 = vrot.lane.b32.xlu0 %v3016_v10, %s2759_s26 }
 0x133   : > { %v3431_v5 = vpop.permute.xlu1 %950  ;;  %v3433_v24 = vpop.permute.xlu0 %956 }
 0x134   : > { %4213 = vst [vmem:[#allocation54_spill] sm:$0xff] %v3431_v5  ;;  %4214 = vst [vmem:[#allocation55_spill] sm:$0xff] %v3433_v24  ;;  %v487_v24 = vld [vmem:[#allocation2 + $0xa9] sm:$0xff] }
 0x135   : > { %1454 = vrot.lane.b32.xlu1 %v581_v11, %s2758_s24 }
 0x136   : > { %1200 = vrot.lane.b32.xlu0 %v3016_v10, %s2756_s12 }
 0x137   : > { %v3438_v30 = vpop.permute.xlu1 %954  ;;  %v3440_v18 = vpop.permute.xlu0 %960 }
 0x138   : > { %4215 = vst [vmem:[#allocation56_spill] sm:$0xff] %v3438_v30  ;;  %4216 = vst [vmem:[#allocation57_spill] sm:$0xff] %v3440_v18 }
 0x139   : > { %1074 = vrot.lane.b32.xlu1 %v581_v11, %s2755_s7 }
 0x13a   : > { %1202 = vrot.lane.b32.xlu0 %v3028_v13, %s2756_s12 }
 0x13b   : > { %v3445_v4 = vpop.permute.xlu1 %958  ;;  %v3447_v27 = vpop.permute.xlu0 %964 }
 0x13c   : > { %4217 = vst [vmem:[#allocation58_spill] sm:$0xff] %v3445_v4  ;;  %4218 = vst [vmem:[#allocation59_spill] sm:$0xff] %v3447_v27  ;;  %v583_v27 = vld [vmem:[#allocation2 + $0xb1] sm:$0xff] }
 0x13d   : > { %1582 = vrot.lane.b32.xlu1 %v3028_v13, %s2759_s26 }
 0x13e   : > { %1330 = vrot.lane.b32.xlu0 %v3158_v37, %s2757_s17 }
 0x13f   : > { %v3453_v10 = vpop.permute.xlu1 %962  ;;  %v3455_v30 = vpop.permute.xlu0 %968 }
 0x140   : > { %4219 = vst [vmem:[#allocation60_spill] sm:$0xff] %v3453_v10  ;;  %4220 = vst [vmem:[#allocation61_spill] sm:$0xff] %v3455_v30  ;;  %v347_v10 = vld [vmem:[#allocation2] sm:$0xff] }
 0x141   : > { %1328 = vrot.lane.b32.xlu1 %v3140_v22, %s2757_s17 }
 0x142   : > { %1076 = vrot.lane.b32.xlu0 %v487_v24, %s2755_s7 }
 0x143   : > { %v3460_v11 = vpop.permute.xlu1 %966  ;;  %v1055_v18 = vpop.permute.xlu0 %1054 }
 0x144   : > { %4221 = vst [vmem:[#allocation62_spill] sm:$0xff] %v3460_v11 }
 0x145   : > { %1456 = vrot.lane.b32.xlu1 %v487_v24, %s2758_s24  ;;  %v1660_v24 = vsel %vm268_vm0, %v347_v10, %v3052_v28  ;;  %v489_v10 = vld [vmem:[#allocation2 + $0xc1] sm:$0xff] }
 0x146   : > { %1584 = vrot.lane.b32.xlu0 %v3024_v12, %s2759_s26  ;;  %v1693_v11 = vsel %vm1692_vm3, %v1660_v24, %v3228_v55  ;;  %v585_v24 = vld [vmem:[#allocation2 + $0xc9] sm:$0xff] }
 0x147   : > { %v1053_v13 = vpop.permute.xlu1 %1052  ;;  %v1726_v5 = vsel %vm1725_vm4, %v1693_v11, %v3371_v31 }
 0x148   : > { %v1183_v37 = vpop.permute.xlu0 %1182 }
 0x149   : > { %1458 = vrot.lane.b32.xlu1 %v583_v27, %s2758_s24 }
 0x14a   : > { %1204 = vrot.lane.b32.xlu0 %v3024_v12, %s2756_s12  ;;  %v1759_v12 = vsel %vm1758_vm5, %v1726_v5, %v1053_v13 }
 0x14b   : > { %v1181_v22 = vpop.permute.xlu1 %1180 }
 0x14c   : > { %v1311_v30 = vpop.permute.xlu0 %1310  ;;  %v1792_v28 = vsel %vm1791_vm6, %v1759_v12, %v1181_v22 }
 0x14d   : > { %1078 = vrot.lane.b32.xlu1 %v583_v27, %s2755_s7 }
 0x14e   : > { %1206 = vrot.lane.b32.xlu0 %v3036_v15, %s2756_s12 }
 0x14f   : > { %v1309_v4 = vpop.permute.xlu1 %1308 }
 0x150   : > { %v1057_v43 = vpop.permute.xlu0 %1056  ;;  %v1825_v55 = vsel %vm1824_vm8, %v1792_v28, %v1309_v4 }
 0x151   : > { %1586 = vrot.lane.b32.xlu1 %v3036_v15, %s2759_s26  ;;  %v348_v15 = vld [vmem:[#allocation2 + $0x8] sm:$0xff] }
 0x152   : > { %1334 = vrot.lane.b32.xlu0 %v3170_v21, %s2757_s17  ;;  %v1661_v21 = vsel %vm268_vm0, %v348_v15, %v3056_v34 }
 0x153   : > { %v1437_v27 = vpop.permute.xlu1 %1436  ;;  %v1694_v22 = vsel %vm1692_vm3, %v1661_v21, %v3251_v63 }
 0x154   : > { %v1858_v31 = vsel %vm1857_vm7, %v1825_v55, %v1437_v27  ;;  %v1565_v5 = vpop.permute.xlu0 %1564 }
 0x155   : > { %1332 = vrot.lane.b32.xlu1 %v3152_v33, %s2757_s17  ;;  %v1891_v11 = vsel %vm1890_vm9, %v1858_v31, %v1565_v5  ;;  %v1727_v33 = vsel %vm1725_vm4, %v1694_v22, %v3385_v41 }
 0x156   : > { %1080 = vrot.lane.b32.xlu0 %v489_v10, %s2755_s7  ;;  %2649 = vmatprep.mubr.msk.f32.mxu0 %vm1932_vm10, %v1891_v11  ;;  %v1760_v28 = vsel %vm1758_vm5, %v1727_v33, %v1055_v18  ;;  %v1662_v18 = vsel %vm268_vm0, %v3071_v46, %v3060_v36  ;;  %v587_v33 = vld [vmem:[#allocation2 + $0xe1] sm:$0xff] }
 0x157   : > { %v1439_v4 = vpop.permute.xlu1 %1438  ;;  %v1793_v55 = vsel %vm1791_vm6, %v1760_v28, %v1183_v37 }
 0x158   : > { %v1185_v13 = vpop.permute.xlu0 %1184  ;;  %v1826_v34 = vsel %vm1824_vm8, %v1793_v55, %v1311_v30  ;;  %v1695_v30 = vsel %vm1692_vm3, %v1662_v18, %v3242_v25 }
 0x159   : > { %1460 = vrot.lane.b32.xlu1 %v489_v10, %s2758_s24  ;;  %v1859_v31 = vsel %vm1857_vm7, %v1826_v34, %v1439_v4  ;;  %v491_v4 = vld [vmem:[#allocation2 + $0xd9] sm:$0xff] }
 0x15a   : > { %1588 = vrot.lane.b32.xlu0 %v3032_v14, %s2759_s26 }
 0x15b   : > { %v1059_v12 = vpop.permute.xlu1 %1058 }
 0x15c   : > { %v1187_v27 = vpop.permute.xlu0 %1186 }
 0x15d   : > { %1462 = vrot.lane.b32.xlu1 %v585_v24, %s2758_s24 }
 0x15e   : > { %1208 = vrot.lane.b32.xlu0 %v3032_v14, %s2756_s12  ;;  %v1728_v14 = vsel %vm1725_vm4, %v1695_v30, %v3379_v57 }
 0x15f   : > { %v1567_v63 = vpop.permute.xlu1 %1566  ;;  %v1761_v5 = vsel %vm1758_vm5, %v1728_v14, %v1057_v43 }
 0x160   : > { %v1892_v41 = vsel %vm1890_vm9, %v1859_v31, %v1567_v63  ;;  %v1315_v10 = vpop.permute.xlu0 %1314  ;;  %v1794_v11 = vsel %vm1791_vm6, %v1761_v5, %v1185_v13  ;;  %v618_v13 = vld [vmem:[#allocation2 + $0xda] sm:$0xff]  ;;  %v266_v63 = vld [vmem:[%s2856_s22 + $0xf0] sm:$0xff] }
 0x161   : > { %1082 = vrot.lane.b32.xlu1 %v585_v24, %s2755_s7  ;;  %2650 = vmatmul.mubr.msk.f32.vlgmr.msra.gmra.mxu0 %vm1932_vm10, %v1892_v41  ;;  %345 = vst.msk [vmem:[#allocation2 + $0x181] sm:$0xff] %vm268_vm0, %v266_v63 }
 0x162   : > { %1210 = vrot.lane.b32.xlu0 %v3042_v17, %s2756_s12 }
 0x163   : > { %v1313_v37 = vpop.permute.xlu1 %1312 }
 0x164   : > { %v1061_v15 = vpop.permute.xlu0 %1060  ;;  %v1827_v36 = vsel %vm1824_vm8, %v1794_v11, %v1313_v37  ;;  %v493_v11 = vld [vmem:[#allocation2 + $0xf1] sm:$0xff] }
 0x165   : > { %1590 = vrot.lane.b32.xlu1 %v3042_v17, %s2759_s26  ;;  %v1663_v17 = vsel %vm268_vm0, %v3086_v52, %v3066_v44 }
 0x166   : > { %1338 = vrot.lane.b32.xlu0 %v3182_v16, %s2757_s17  ;;  %v1696_v16 = vsel %vm1692_vm3, %v1663_v17, %v3265_v42 }
 0x167   : > { %v1441_v46 = vpop.permute.xlu1 %1440  ;;  %v1729_v22 = vsel %vm1725_vm4, %v1696_v16, %v3393_v9 }
 0x168   : > { %v1860_v25 = vsel %vm1857_vm7, %v1827_v36, %v1441_v46  ;;  %v1569_v21 = vpop.permute.xlu0 %1568  ;;  %v1665_v36 = vsel %vm268_vm0, %v3098_v56, %v3075_v48 }
 0x169   : > { %1336 = vrot.lane.b32.xlu1 %v3164_v47, %s2757_s17  ;;  %v1893_v57 = vsel %vm1890_vm9, %v1860_v25, %v1569_v21  ;;  %v1762_v47 = vsel %vm1758_vm5, %v1729_v22, %v1059_v12  ;;  %v524_v12 = vld [vmem:[#allocation2 + $0xe2] sm:$0xff]  ;;  %v620_v25 = vld [vmem:[#allocation2 + $0xf2] sm:$0xff] }
 0x16a   : > { %1084 = vrot.lane.b32.xlu0 %v491_v4, %s2755_s7  ;;  %2652 = vmatprep.mubr.msk.f32.mxu0 %vm1932_vm10, %v1893_v57  ;;  %v1795_v52 = vsel %vm1791_vm6, %v1762_v47, %v1187_v27  ;;  %v1664_v27 = vsel %vm268_vm0, %v3080_v50, %v3062_v39  ;;  %v267_v39 = vld [vmem:[%s2856_s22 + $0xf8] sm:$0xff] }
 0x16b   : > { %v1443_v43 = vpop.permute.xlu1 %1442  ;;  %v1828_v42 = vsel %vm1824_vm8, %v1795_v52, %v1315_v10  ;;  %v1697_v41 = vsel %vm1692_vm3, %v1664_v27, %v3256_v0  ;;  %346 = vst.msk [vmem:[#allocation2 + $0x189] sm:$0xff] %vm268_vm0, %v267_v39  ;;  %v589_v57 = vld [vmem:[#allocation2 + $0xf9] sm:$0xff]  ;;  %v622_v27 = vld [vmem:[#allocation2 + $0x10a] sm:$0xff] }
 0x16c   : > { %v1189_v24 = vpop.permute.xlu0 %1188  ;;  %v1861_v55 = vsel %vm1857_vm7, %v1828_v42, %v1443_v43  ;;  %v1730_v18 = vsel %vm1725_vm4, %v1697_v41, %v3387_v38  ;;  %v528_v39 = vld [vmem:[#allocation2 + $0x112] sm:$0xff] }
 0x16d   : > { %1464 = vrot.lane.b32.xlu1 %v491_v4, %s2758_s24  ;;  %v1763_v30 = vsel %vm1758_vm5, %v1730_v18, %v1061_v15 }
 0x16e   : > { %1592 = vrot.lane.b32.xlu0 %v618_v13, %s2759_s26  ;;  %v1796_v14 = vsel %vm1791_vm6, %v1763_v30, %v1189_v24  ;;  %v1666_v24 = vsel %vm268_vm0, %v3092_v54, %v3068_v45  ;;  %v495_v54 = vld [vmem:[#allocation2 + $0x109] sm:$0xff] }
 0x16f   : > { %v1063_v44 = vpop.permute.xlu1 %1062  ;;  %v1699_v47 = vsel %vm1692_vm3, %v1666_v24, %v3267_v49 }
 0x170   : > { %v1191_v28 = vpop.permute.xlu0 %1190 }
 0x171   : > { %1466 = vrot.lane.b32.xlu1 %v587_v33, %s2758_s24 }
 0x172   : > { %1212 = vrot.lane.b32.xlu0 %v618_v13, %s2756_s12  ;;  %v526_v13 = vld [vmem:[#allocation2 + $0xfa] sm:$0xff] }
 0x173   : > { %v1571_v9 = vpop.permute.xlu1 %1570 }
 0x174   : > { %v1894_v34 = vsel %vm1890_vm9, %v1861_v55, %v1571_v9  ;;  %v1319_v31 = vpop.permute.xlu0 %1318 }
 0x175   : > { %1086 = vrot.lane.b32.xlu1 %v587_v33, %s2755_s7  ;;  %2653 = vmatmul.mubr.msk.f32.gmra.mxu0 %vm1932_vm10, %v1894_v34  ;;  %v4222_v34 = vld [vmem:[#allocation4_spill] sm:$0xff] }
 0x176   : > { %1214 = vrot.lane.b32.xlu0 %v524_v12, %s2756_s12 }
 0x177   : > { %v1317_v10 = vpop.permute.xlu1 %1316 }
 0x178   : > { %v1065_v37 = vpop.permute.xlu0 %1064  ;;  %v1829_v50 = vsel %vm1824_vm8, %v1796_v14, %v1317_v10  ;;  %v591_v10 = vld [vmem:[#allocation2 + $0x111] sm:$0xff] }
 0x179   : > { %1594 = vrot.lane.b32.xlu1 %v524_v12, %s2759_s26  ;;  %v1667_v12 = vsel %vm268_vm0, %v3110_v60, %v4222_v34 }
 0x17a   : > { %1342 = vrot.lane.b32.xlu0 %v3194_v61, %s2757_s17  ;;  %v1698_v61 = vsel %vm1692_vm3, %v1665_v36, %v3273_v59 }
 0x17b   : > { %v1445_v0 = vpop.permute.xlu1 %1444  ;;  %v1731_v4 = vsel %vm1725_vm4, %v1698_v61, %v3401_v32  ;;  %v3639_v61 = vld [vmem:[#allocation2 + $0x128] sm:$0xff] }
 0x17c   : > { %v1862_v5 = vsel %vm1857_vm7, %v1829_v50, %v1445_v0  ;;  %v1573_v38 = vpop.permute.xlu0 %1572  ;;  %v4223_v0 = vld [vmem:[#allocation3_spill] sm:$0xff] }
 0x17d   : > { %1340 = vrot.lane.b32.xlu1 %v3176_v35, %s2757_s17  ;;  %v1895_v15 = vsel %vm1890_vm9, %v1862_v5, %v1573_v38  ;;  %v1764_v35 = vsel %vm1758_vm5, %v1731_v4, %v1063_v44  ;;  %v1732_v44 = vsel %vm1725_vm4, %v1699_v47, %v3395_v6  ;;  %v1668_v5 = vsel %vm268_vm0, %v3104_v58, %v4223_v0 }
 0x17e   : > { %1088 = vrot.lane.b32.xlu0 %v493_v11, %s2755_s7  ;;  %2655 = vmatprep.mubr.msk.f32.mxu0 %vm1932_vm10, %v1895_v15  ;;  %v1797_v56 = vsel %vm1791_vm6, %v1764_v35, %v1191_v28  ;;  %v1765_v52 = vsel %vm1758_vm5, %v1732_v44, %v1065_v37 }
 0x17f   : > { %v1447_v46 = vpop.permute.xlu1 %1446  ;;  %v1830_v59 = vsel %vm1824_vm8, %v1797_v56, %v1319_v31 }
 0x180   : > { %v1193_v21 = vpop.permute.xlu0 %1192  ;;  %v1863_v43 = vsel %vm1857_vm7, %v1830_v59, %v1447_v46 }
 0x181   : > { %1468 = vrot.lane.b32.xlu1 %v493_v11, %s2758_s24  ;;  %v1798_v42 = vsel %vm1791_vm6, %v1765_v52, %v1193_v21  ;;  %v1701_v11 = vsel %vm1692_vm3, %v1668_v5, %v3275_v51  ;;  %v625_v52 = vld [vmem:[#allocation2 + $0x12a] sm:$0xff] }
 0x182   : > { %1596 = vrot.lane.b32.xlu0 %v620_v25, %s2759_s26  ;;  %v1734_v15 = vsel %vm1725_vm4, %v1701_v11, %v3403_v3  ;;  %v4224_v3 = vld [vmem:[#allocation26_spill] sm:$0xff] }
 0x183   : > { %v1067_v48 = vpop.permute.xlu1 %1066 }
 0x184   : > { %v1195_v17 = vpop.permute.xlu0 %1194 }
 0x185   : > { %1470 = vrot.lane.b32.xlu1 %v589_v57, %s2758_s24 }
 0x186   : > { %1216 = vrot.lane.b32.xlu0 %v620_v25, %s2756_s12 }
 0x187   : > { %v1575_v32 = vpop.permute.xlu1 %1574 }
 0x188   : > { %v1896_v16 = vsel %vm1890_vm9, %v1863_v43, %v1575_v32  ;;  %v1323_v22 = vpop.permute.xlu0 %1322  ;;  %v593_v43 = vld [vmem:[#allocation2 + $0x129] sm:$0xff] }
 0x189   : > { %1090 = vrot.lane.b32.xlu1 %v589_v57, %s2755_s7  ;;  %2656 = vmatmul.mubr.msk.f32.gmra.mxu0 %vm1932_vm10, %v1896_v16  ;;  %v592_v57 = vld [vmem:[#allocation2 + $0x121] sm:$0xff] }
 0x18a   : > { %1218 = vrot.lane.b32.xlu0 %v526_v13, %s2756_s12 }
 0x18b   : > { %v1321_v33 = vpop.permute.xlu1 %1320 }
 0x18c   : > { %v1069_v28 = vpop.permute.xlu0 %1068  ;;  %v1831_v55 = vsel %vm1824_vm8, %v1798_v42, %v1321_v33  ;;  %v4226_v42 = vld [vmem:[#allocation5_spill] sm:$0xff] }
 0x18d   : > { %1598 = vrot.lane.b32.xlu1 %v526_v13, %s2759_s26  ;;  %v1767_v36 = vsel %vm1758_vm5, %v1734_v15, %v1069_v28  ;;  %v4230_v15 = vld [vmem:[#allocation12_spill] sm:$0xff] }
 0x18e   : > { %1346 = vrot.lane.b32.xlu0 %v3209_v23, %s2757_s17  ;;  %v1700_v23 = vsel %vm1692_vm3, %v1667_v12, %v3281_v26 }
 0x18f   : > { %v1449_v45 = vpop.permute.xlu1 %1448  ;;  %v1733_v63 = vsel %vm1725_vm4, %v1700_v23, %v3409_v40  ;;  %v563_v23 = vld [vmem:[#allocation2 + $0x140] sm:$0xff] }
 0x190   : > { %v1864_v49 = vsel %vm1857_vm7, %v1831_v55, %v1449_v45  ;;  %v1577_v9 = vpop.permute.xlu0 %1576  ;;  %v1670_v55 = vsel %vm268_vm0, %v3116_v62, %v4226_v42 }
 0x191   : > { %1344 = vrot.lane.b32.xlu1 %v3188_v29, %s2757_s17  ;;  %v1897_v6 = vsel %vm1890_vm9, %v1864_v49, %v1577_v9  ;;  %v1766_v29 = vsel %vm1758_vm5, %v1733_v63, %v1067_v48  ;;  %v4225_v48 = vld [vmem:[#allocation6_spill] sm:$0xff]  ;;  %v1703_v45 = vsel %vm1692_vm3, %v1670_v55, %v3283_v19  ;;  %v562_v9 = vld [vmem:[#allocation2 + $0x138] sm:$0xff] }
 0x192   : > { %1092 = vrot.lane.b32.xlu0 %v495_v54, %s2755_s7  ;;  %2658 = vmatprep.mubr.msk.f32.mxu0 %vm1932_vm10, %v1897_v6  ;;  %v1799_v18 = vsel %vm1791_vm6, %v1766_v29, %v1195_v17  ;;  %v1669_v56 = vsel %vm268_vm0, %v3122_v1, %v4225_v48  ;;  %v4227_v63 = vld [vmem:[#allocation8_spill] sm:$0xff] }
 0x193   : > { %v1451_v31 = vpop.permute.xlu1 %1450  ;;  %v1832_v26 = vsel %vm1824_vm8, %v1799_v18, %v1323_v22  ;;  %v1702_v59 = vsel %vm1692_vm3, %v1669_v56, %v3289_v53  ;;  %v624_v53 = vld [vmem:[#allocation2 + $0x122] sm:$0xff] }
 0x194   : > { %v1197_v41 = vpop.permute.xlu0 %1196  ;;  %v1865_v37 = vsel %vm1857_vm7, %v1832_v26, %v1451_v31  ;;  %v1735_v32 = vsel %vm1725_vm4, %v1702_v59, %v3417_v8 }
 0x195   : > { %1472 = vrot.lane.b32.xlu1 %v495_v54, %s2758_s24  ;;  %v1800_v25 = vsel %vm1791_vm6, %v1767_v36, %v1197_v41  ;;  %v1736_v54 = vsel %vm1725_vm4, %v1703_v45, %v3411_v7  ;;  %v1671_v41 = vsel %vm268_vm0, %v3134_v20, %v4227_v63 }
 0x196   : > { %1600 = vrot.lane.b32.xlu0 %v622_v27, %s2759_s26 }
 0x197   : > { %v1071_v60 = vpop.permute.xlu1 %1070 }
 0x198   : > { %v1199_v30 = vpop.permute.xlu0 %1198  ;;  %v1768_v13 = vsel %vm1758_vm5, %v1735_v32, %v1071_v60  ;;  %v4228_v60 = vld [vmem:[#allocation52_spill] sm:$0xff] }
 0x199   : > { %1474 = vrot.lane.b32.xlu1 %v591_v10, %s2758_s24  ;;  %v1801_v22 = vsel %vm1791_vm6, %v1768_v13, %v1199_v30  ;;  %v4233_v13 = vld [vmem:[#allocation10_spill] sm:$0xff] }
 0x19a   : > { %1220 = vrot.lane.b32.xlu0 %v622_v27, %s2756_s12 }
 0x19b   : > { %v1579_v40 = vpop.permute.xlu1 %1578 }
 0x19c   : > { %v1898_v14 = vsel %vm1890_vm9, %v1865_v37, %v1579_v40  ;;  %v1327_v50 = vpop.permute.xlu0 %1326  ;;  %v594_v37 = vld [vmem:[#allocation2 + $0x139] sm:$0xff]  ;;  %v595_v40 = vld [vmem:[#allocation2 + $0x141] sm:$0xff] }
 0x19d   : > { %1094 = vrot.lane.b32.xlu1 %v591_v10, %s2755_s7  ;;  %2659 = vmatmul.mubr.msk.f32.gmra.mxu0 %vm1932_vm10, %v1898_v14  ;;  %v1834_v47 = vsel %vm1824_vm8, %v1801_v22, %v1327_v50  ;;  %v1704_v10 = vsel %vm1692_vm3, %v1671_v41, %v3297_v2  ;;  %v4239_v41 = vld [vmem:[#allocation53_spill] sm:$0xff] }
 0x19e   : > { %1222 = vrot.lane.b32.xlu0 %v528_v39, %s2756_s12  ;;  %v1737_v18 = vsel %vm1725_vm4, %v1704_v10, %v4228_v60 }
 0x19f   : > { %v1325_v38 = vpop.permute.xlu1 %1324 }
 0x1a0   : > { %v1073_v46 = vpop.permute.xlu0 %1072  ;;  %v1833_v58 = vsel %vm1824_vm8, %v1800_v25, %v1325_v38  ;;  %v4229_v38 = vld [vmem:[#allocation7_spill] sm:$0xff] }
 0x1a1   : > { %1602 = vrot.lane.b32.xlu1 %v528_v39, %s2759_s26  ;;  %v1769_v6 = vsel %vm1758_vm5, %v1736_v54, %v1073_v46  ;;  %v1672_v36 = vsel %vm268_vm0, %v4230_v15, %v4229_v38  ;;  %v626_v46 = vld [vmem:[#allocation2 + $0x13a] sm:$0xff]  ;;  %v4231_v25 = vld [vmem:[#allocation31_spill] sm:$0xff]  ;;  %v566_v15 = vld [vmem:[#allocation2 + $0x168] sm:$0xff] }
 0x1a2   : > { %1350 = vrot.lane.b32.xlu0 %v3639_v61, %s2757_s17  ;;  %v596_v54 = vld [vmem:[#allocation2 + $0x151] sm:$0xff] }
 0x1a3   : > { %v1453_v51 = vpop.permute.xlu1 %1452 }
 0x1a4   : > { %v1866_v4 = vsel %vm1857_vm7, %v1833_v58, %v1453_v51  ;;  %v1581_v21 = vpop.permute.xlu0 %1580  ;;  %v1705_v58 = vsel %vm1692_vm3, %v1672_v36, %v4231_v25  ;;  %v4242_v36 = vld [vmem:[#allocation56_spill] sm:$0xff] }
 0x1a5   : > { %1348 = vrot.lane.b32.xlu1 %v4224_v3, %s2757_s17  ;;  %v1899_v35 = vsel %vm1890_vm9, %v1866_v4, %v1581_v21  ;;  %v4232_v4 = vld [vmem:[#allocation51_spill] sm:$0xff]  ;;  %v627_v3 = vld [vmem:[#allocation2 + $0x142] sm:$0xff] }
 0x1a6   : > { %970 = vrot.lane.b32.xlu0 %v3639_v61, %s2754_s25  ;;  %2661 = vmatprep.mubr.msk.f32.mxu0 %vm1932_vm10, %v1899_v35  ;;  %v1738_v21 = vsel %vm1725_vm4, %v1705_v58, %v4232_v4  ;;  %v567_v4 = vld [vmem:[#allocation2 + $0x170] sm:$0xff] }
 0x1a7   : > { %v1455_v17 = vpop.permute.xlu1 %1454 }
 0x1a8   : > { %v1201_v16 = vpop.permute.xlu0 %1200  ;;  %v1867_v33 = vsel %vm1857_vm7, %v1834_v47, %v1455_v17  ;;  %v4235_v47 = vld [vmem:[#allocation33_spill] sm:$0xff] }
 0x1a9   : > { %1476 = vrot.lane.b32.xlu1 %v592_v57, %s2758_s24  ;;  %v1802_v12 = vsel %vm1791_vm6, %v1769_v6, %v1201_v16 }
 0x1aa   : > { %1478 = vrot.lane.b32.xlu0 %v593_v43, %s2758_s24 }
 0x1ab   : > { %v1075_v1 = vpop.permute.xlu1 %1074 }
 0x1ac   : > { %v1203_v24 = vpop.permute.xlu0 %1202  ;;  %v1770_v26 = vsel %vm1758_vm5, %v1737_v18, %v1075_v1  ;;  %v4234_v1 = vld [vmem:[#allocation16_spill] sm:$0xff] }
 0x1ad   : > { %1096 = vrot.lane.b32.xlu1 %v592_v57, %s2755_s7  ;;  %v1803_v14 = vsel %vm1791_vm6, %v1770_v26, %v1203_v24  ;;  %v1673_v22 = vsel %vm268_vm0, %v4234_v1, %v4233_v13  ;;  %v4244_v13 = vld [vmem:[#allocation34_spill] sm:$0xff] }
 0x1ae   : > { %1098 = vrot.lane.b32.xlu0 %v593_v43, %s2755_s7  ;;  %v564_v43 = vld [vmem:[#allocation2 + $0x150] sm:$0xff] }
 0x1af   : > { %v1583_v8 = vpop.permute.xlu1 %1582 }
 0x1b0   : > { %v1900_v44 = vsel %vm1890_vm9, %v1867_v33, %v1583_v8  ;;  %v1331_v28 = vpop.permute.xlu0 %1330  ;;  %v565_v33 = vld [vmem:[#allocation2 + $0x158] sm:$0xff]  ;;  %v4236_v8 = vld [vmem:[#allocation54_spill] sm:$0xff] }
 0x1b1   : > { %1604 = vrot.lane.b32.xlu1 %v624_v53, %s2759_s26  ;;  %2662 = vmatmul.mubr.msk.f32.gmra.mxu0 %vm1932_vm10, %v1900_v44  ;;  %v1836_v2 = vsel %vm1824_vm8, %v1803_v14, %v1331_v28 }
 0x1b2   : > { %1606 = vrot.lane.b32.xlu0 %v625_v52, %s2759_s26 }
 0x1b3   : > { %v1329_v49 = vpop.permute.xlu1 %1328 }
 0x1b4   : > { %v1077_v34 = vpop.permute.xlu0 %1076  ;;  %v1835_v31 = vsel %vm1824_vm8, %v1802_v12, %v1329_v49  ;;  %v597_v12 = vld [vmem:[#allocation2 + $0x159] sm:$0xff] }
 0x1b5   : > { %1224 = vrot.lane.b32.xlu1 %v624_v53, %s2756_s12  ;;  %v1771_v35 = vsel %vm1758_vm5, %v1738_v21, %v1077_v34  ;;  %v1706_v53 = vsel %vm1692_vm3, %v1673_v22, %v4235_v47 }
 0x1b6   : > { %1352 = vrot.lane.b32.xlu0 %v562_v9, %s2757_s17  ;;  %v1739_v44 = vsel %vm1725_vm4, %v1706_v53, %v4236_v8  ;;  %v599_v53 = vld [vmem:[#allocation2 + $0x171] sm:$0xff] }
 0x1b7   : > { %v1457_v62 = vpop.permute.xlu1 %1456 }
 0x1b8   : > { %v1868_v19 = vsel %vm1857_vm7, %v1835_v31, %v1457_v62  ;;  %v1585_v27 = vpop.permute.xlu0 %1584  ;;  %v2732_v62 = vld [vmem:[#allocation2 + $0xa8] sm:$0xff] }
 0x1b9   : > { %1226 = vrot.lane.b32.xlu1 %v625_v52, %s2756_s12  ;;  %v1901_v7 = vsel %vm1890_vm9, %v1868_v19, %v1585_v27  ;;  %v4237_v19 = vld [vmem:[#allocation9_spill] sm:$0xff]  ;;  %v4238_v27 = vld [vmem:[#allocation32_spill] sm:$0xff] }
 0x1ba   : > { %1354 = vrot.lane.b32.xlu0 %v563_v23, %s2757_s17  ;;  %2664 = vmatprep.mubr.msk.f32.mxu0 %vm1932_vm10, %v1901_v7 }
 0x1bb   : > { %v1459_v29 = vpop.permute.xlu1 %1458 }
 0x1bc   : > { %v1205_v30 = vpop.permute.xlu0 %1204  ;;  %v1869_v50 = vsel %vm1857_vm7, %v1836_v2, %v1459_v29  ;;  %v2733_v2 = vld [vmem:[#allocation2 + $0xb0] sm:$0xff] }
 0x1bd   : > { %972 = vrot.lane.b32.xlu1 %v562_v9, %s2754_s25  ;;  %v1804_v48 = vsel %vm1791_vm6, %v1771_v35, %v1205_v30  ;;  %v628_v30 = vld [vmem:[#allocation2 + $0x152] sm:$0xff] }
 0x1be   : > { %974 = vrot.lane.b32.xlu0 %v563_v23, %s2754_s25  ;;  %v1674_v23 = vsel %vm268_vm0, %v2732_v62, %v4237_v19  ;;  %v631_v62 = vld [vmem:[#allocation2 + $0x172] sm:$0xff]  ;;  %v4248_v19 = vld [vmem:[#allocation58_spill] sm:$0xff] }
 0x1bf   : > { %v1079_v20 = vpop.permute.xlu1 %1078  ;;  %v1707_v7 = vsel %vm1692_vm3, %v1674_v23, %v4238_v27 }
 0x1c0   : > { %v1207_v39 = vpop.permute.xlu0 %1206  ;;  %v1772_v28 = vsel %vm1758_vm5, %v1739_v44, %v1079_v20  ;;  %v1740_v29 = vsel %vm1725_vm4, %v1707_v7, %v4239_v41  ;;  %v568_v41 = vld [vmem:[#allocation2 + $0x180] sm:$0xff] }
 0x1c1   : > { %1480 = vrot.lane.b32.xlu1 %v594_v37, %s2758_s24  ;;  %v1805_v55 = vsel %vm1791_vm6, %v1772_v28, %v1207_v39 }
 0x1c2   : > { %1482 = vrot.lane.b32.xlu0 %v595_v40, %s2758_s24 }
 0x1c3   : > { %v1587_v0 = vpop.permute.xlu1 %1586 }
 0x1c4   : > { %v1902_v5 = vsel %vm1890_vm9, %v1869_v50, %v1587_v0  ;;  %v1335_v11 = vpop.permute.xlu0 %1334  ;;  %v4240_v50 = vld [vmem:[#allocation13_spill] sm:$0xff] }
 0x1c5   : > { %1100 = vrot.lane.b32.xlu1 %v594_v37, %s2755_s7  ;;  %2665 = vmatmul.mubr.msk.f32.gmra.mxu0 %vm1932_vm10, %v1902_v5  ;;  %v1838_v49 = vsel %vm1824_vm8, %v1805_v55, %v1335_v11  ;;  %v1675_v0 = vsel %vm268_vm0, %v2733_v2, %v4240_v50  ;;  %v4241_v11 = vld [vmem:[#allocation35_spill] sm:$0xff]  ;;  %v4250_v2 = vld [vmem:[#allocation36_spill] sm:$0xff] }
 0x1c6   : > { %1102 = vrot.lane.b32.xlu0 %v595_v40, %s2755_s7  ;;  %v629_v40 = vld [vmem:[#allocation2 + $0x15a] sm:$0xff]  ;;  %v1708_v38 = vsel %vm1692_vm3, %v1675_v0, %v4241_v11 }
 0x1c7   : > { %v1333_v51 = vpop.permute.xlu1 %1332 }
 0x1c8   : > { %v1081_v57 = vpop.permute.xlu0 %1080  ;;  %v1837_v56 = vsel %vm1824_vm8, %v1804_v48, %v1333_v51 }
 0x1c9   : > { %1608 = vrot.lane.b32.xlu1 %v626_v46, %s2759_s26  ;;  %v1773_v10 = vsel %vm1758_vm5, %v1740_v29, %v1081_v57 }
 0x1ca   : > { %1610 = vrot.lane.b32.xlu0 %v627_v3, %s2759_s26 }
 0x1cb   : > { %v1461_v17 = vpop.permute.xlu1 %1460 }
 0x1cc   : > { %v1870_v59 = vsel %vm1857_vm7, %v1837_v56, %v1461_v17  ;;  %v1589_v32 = vpop.permute.xlu0 %1588 }
 0x1cd   : > { %1228 = vrot.lane.b32.xlu1 %v626_v46, %s2756_s12  ;;  %v1903_v16 = vsel %vm1890_vm9, %v1870_v59, %v1589_v32  ;;  %v1741_v46 = vsel %vm1725_vm4, %v1708_v38, %v4242_v36  ;;  %v2734_v59 = vld [vmem:[#allocation2 + $0xc0] sm:$0xff] }
 0x1ce   : > { %1356 = vrot.lane.b32.xlu0 %v564_v43, %s2757_s17  ;;  %2667 = vmatprep.mubr.msk.f32.mxu0 %vm1932_vm10, %v1903_v16  ;;  %v598_v16 = vld [vmem:[#allocation2 + $0x169] sm:$0xff] }
 0x1cf   : > { %v1463_v24 = vpop.permute.xlu1 %1462 }
 0x1d0   : > { %v1209_v52 = vpop.permute.xlu0 %1208  ;;  %v1871_v9 = vsel %vm1857_vm7, %v1838_v49, %v1463_v24  ;;  %v4245_v24 = vld [vmem:[#allocation55_spill] sm:$0xff] }
 0x1d1   : > { %1230 = vrot.lane.b32.xlu1 %v627_v3, %s2756_s12  ;;  %v1806_v18 = vsel %vm1791_vm6, %v1773_v10, %v1209_v52  ;;  %v630_v49 = vld [vmem:[#allocation2 + $0x16a] sm:$0xff] }
 0x1d2   : > { %1358 = vrot.lane.b32.xlu0 %v565_v33, %s2757_s17 }
 0x1d3   : > { %v1083_v42 = vpop.permute.xlu1 %1082 }
 0x1d4   : > { %v1211_v45 = vpop.permute.xlu0 %1210  ;;  %v1774_v58 = vsel %vm1758_vm5, %v1741_v46, %v1083_v42  ;;  %v600_v46 = vld [vmem:[#allocation2 + $0x181] sm:$0xff] }
 0x1d5   : > { %976 = vrot.lane.b32.xlu1 %v564_v43, %s2754_s25  ;;  %v1807_v21 = vsel %vm1791_vm6, %v1774_v58, %v1211_v45  ;;  %v4243_v43 = vld [vmem:[#allocation11_spill] sm:$0xff] }
 0x1d6   : > { %978 = vrot.lane.b32.xlu0 %v565_v33, %s2754_s25  ;;  %v1676_v32 = vsel %vm268_vm0, %v2734_v59, %v4243_v43  ;;  %v4254_v43 = vld [vmem:[#allocation60_spill] sm:$0xff] }
 0x1d7   : > { %v1591_v6 = vpop.permute.xlu1 %1590  ;;  %v1709_v1 = vsel %vm1692_vm3, %v1676_v32, %v4244_v13 }
 0x1d8   : > { %v1904_v34 = vsel %vm1890_vm9, %v1871_v9, %v1591_v6  ;;  %v1339_v31 = vpop.permute.xlu0 %1338  ;;  %v1742_v47 = vsel %vm1725_vm4, %v1709_v1, %v4245_v24  ;;  %v4246_v9 = vld [vmem:[#allocation15_spill] sm:$0xff]  ;;  %v632_v1 = vld [vmem:[#allocation2 + $0x182] sm:$0xff] }
 0x1d9   : > { %1484 = vrot.lane.b32.xlu1 %v596_v54, %s2758_s24  ;;  %2668 = vmatmul.mubr.msk.f32.gmra.mxu0 %vm1932_vm10, %v1904_v34  ;;  %v1840_v35 = vsel %vm1824_vm8, %v1807_v21, %v1339_v31  ;;  %v633_v24 = vld [vmem:[#allocation2 + $0x18a] sm:$0xff] }
 0x1da   : > { %1486 = vrot.lane.b32.xlu0 %v597_v12, %s2758_s24 }
 0x1db   : > { %v1337_v63 = vpop.permute.xlu1 %1336 }
 0x1dc   : > { %v1085_v60 = vpop.permute.xlu0 %1084  ;;  %v1839_v26 = vsel %vm1824_vm8, %v1806_v18, %v1337_v63 }
 0x1dd   : > { %1104 = vrot.lane.b32.xlu1 %v596_v54, %s2755_s7  ;;  %v1775_v33 = vsel %vm1758_vm5, %v1742_v47, %v1085_v60  ;;  %v2735_v54 = vld [vmem:[#allocation2 + $0xc8] sm:$0xff] }
 0x1de   : > { %1106 = vrot.lane.b32.xlu0 %v597_v12, %s2755_s7  ;;  %v1677_v6 = vsel %vm268_vm0, %v2735_v54, %v4246_v9  ;;  %v4247_v12 = vld [vmem:[#allocation37_spill] sm:$0xff] }
 0x1df   : > { %v1465_v37 = vpop.permute.xlu1 %1464  ;;  %v1710_v31 = vsel %vm1692_vm3, %v1677_v6, %v4247_v12  ;;  %v571_v54 = vld [vmem:[#allocation2 + $0x1a0] sm:$0xff]  ;;  %v2738_v6 = vld [vmem:[#allocation2 + $0xf8] sm:$0xff] }
 0x1e0   : > { %v1872_v20 = vsel %vm1857_vm7, %v1839_v26, %v1465_v37  ;;  %v1593_v14 = vpop.permute.xlu0 %1592  ;;  %v1743_v23 = vsel %vm1725_vm4, %v1710_v31, %v4248_v19  ;;  %v569_v37 = vld [vmem:[#allocation2 + $0x188] sm:$0xff]  ;;  %v634_v31 = vld [vmem:[#allocation2 + $0x19a] sm:$0xff] }
 0x1e1   : > { %1612 = vrot.lane.b32.xlu1 %v628_v30, %s2759_s26  ;;  %v1905_v39 = vsel %vm1890_vm9, %v1872_v20, %v1593_v14  ;;  %v4249_v14 = vld [vmem:[#allocation14_spill] sm:$0xff]  ;;  %v4256_v19 = vld [vmem:[#allocation17_spill] sm:$0xff] }
 0x1e2   : > { %1614 = vrot.lane.b32.xlu0 %v629_v40, %s2759_s26  ;;  %2670 = vmatprep.mubr.msk.f32.mxu0 %vm1932_vm10, %v1905_v39 }
 0x1e3   : > { %v1467_v5 = vpop.permute.xlu1 %1466 }
 0x1e4   : > { %v1213_v25 = vpop.permute.xlu0 %1212  ;;  %v1873_v57 = vsel %vm1857_vm7, %v1840_v35, %v1467_v5  ;;  %v4251_v5 = vld [vmem:[#allocation57_spill] sm:$0xff] }
 0x1e5   : > { %1232 = vrot.lane.b32.xlu1 %v628_v30, %s2756_s12  ;;  %v1808_v44 = vsel %vm1791_vm6, %v1775_v33, %v1213_v25  ;;  %v2737_v35 = vld [vmem:[#allocation2 + $0xe0] sm:$0xff] }
 0x1e6   : > { %1360 = vrot.lane.b32.xlu0 %v566_v15, %s2757_s17 }
 0x1e7   : > { %v1087_v51 = vpop.permute.xlu1 %1086 }
 0x1e8   : > { %v1215_v3 = vpop.permute.xlu0 %1214  ;;  %v1776_v7 = vsel %vm1758_vm5, %v1743_v23, %v1087_v51 }
 0x1e9   : > { %1234 = vrot.lane.b32.xlu1 %v629_v40, %s2756_s12  ;;  %v1809_v29 = vsel %vm1791_vm6, %v1776_v7, %v1215_v3  ;;  %v2736_v40 = vld [vmem:[#allocation2 + $0xd8] sm:$0xff] }
 0x1ea   : > { %1362 = vrot.lane.b32.xlu0 %v567_v4, %s2757_s17  ;;  %v1678_v39 = vsel %vm268_vm0, %v2736_v40, %v4249_v14 }
 0x1eb   : > { %v1595_v48 = vpop.permute.xlu1 %1594  ;;  %v1711_v50 = vsel %vm1692_vm3, %v1678_v39, %v4250_v2 }
 0x1ec   : > { %v1906_v56 = vsel %vm1890_vm9, %v1873_v57, %v1595_v48  ;;  %v1343_v17 = vpop.permute.xlu0 %1342  ;;  %v1744_v11 = vsel %vm1725_vm4, %v1711_v50, %v4251_v5  ;;  %v4252_v57 = vld [vmem:[#allocation18_spill] sm:$0xff] }
 0x1ed   : > { %980 = vrot.lane.b32.xlu1 %v566_v15, %s2754_s25  ;;  %2671 = vmatmul.mubr.msk.f32.gmra.mxu0 %vm1932_vm10, %v1906_v56  ;;  %v1842_v60 = vsel %vm1824_vm8, %v1809_v29, %v1343_v17  ;;  %v1679_v48 = vsel %vm268_vm0, %v2737_v35, %v4252_v57  ;;  %v4253_v17 = vld [vmem:[#allocation39_spill] sm:$0xff] }
 0x1ee   : > { %982 = vrot.lane.b32.xlu0 %v567_v4, %s2754_s25  ;;  %v601_v4 = vld [vmem:[#allocation2 + $0x189] sm:$0xff]  ;;  %v1712_v59 = vsel %vm1692_vm3, %v1679_v48, %v4253_v17 }
 0x1ef   : > { %v1341_v22 = vpop.permute.xlu1 %1340  ;;  %v1745_v32 = vsel %vm1725_vm4, %v1712_v59, %v4254_v43 }
 0x1f0   : > { %v1089_v8 = vpop.permute.xlu0 %1088  ;;  %v1841_v52 = vsel %vm1824_vm8, %v1808_v44, %v1341_v22 }
 0x1f1   : > { %1488 = vrot.lane.b32.xlu1 %v598_v16, %s2758_s24  ;;  %v1777_v38 = vsel %vm1758_vm5, %v1744_v11, %v1089_v8  ;;  %v635_v11 = vld [vmem:[#allocation2 + $0x1a2] sm:$0xff] }
 0x1f2   : > { %1490 = vrot.lane.b32.xlu0 %v599_v53, %s2758_s24 }
 0x1f3   : > { %v1469_v28 = vpop.permute.xlu1 %1468 }
 0x1f4   : > { %v1874_v42 = vsel %vm1857_vm7, %v1841_v52, %v1469_v28  ;;  %v1597_v55 = vpop.permute.xlu0 %1596  ;;  %v570_v28 = vld [vmem:[#allocation2 + $0x198] sm:$0xff] }
 0x1f5   : > { %1108 = vrot.lane.b32.xlu1 %v598_v16, %s2755_s7  ;;  %v1907_v45 = vsel %vm1890_vm9, %v1874_v42, %v1597_v55 }
 0x1f6   : > { %1110 = vrot.lane.b32.xlu0 %v599_v53, %s2755_s7  ;;  %2673 = vmatprep.mubr.msk.f32.mxu1 %vm1932_vm10, %v1907_v45  ;;  %v602_v45 = vld [vmem:[#allocation2 + $0x199] sm:$0xff] }
 0x1f7   : > { %v1471_v34 = vpop.permute.xlu1 %1470 }
 0x1f8   : > { %v1217_v27 = vpop.permute.xlu0 %1216  ;;  %v1875_v18 = vsel %vm1857_vm7, %v1842_v60, %v1471_v34  ;;  %v4255_v34 = vld [vmem:[#allocation20_spill] sm:$0xff] }
 0x1f9   : > { %1616 = vrot.lane.b32.xlu1 %v630_v49, %s2759_s26  ;;  %v1810_v36 = vsel %vm1791_vm6, %v1777_v38, %v1217_v27  ;;  %v1681_v12 = vsel %vm268_vm0, %v2738_v6, %v4255_v34  ;;  %v4257_v27 = vld [vmem:[#allocation41_spill] sm:$0xff] }
 0x1fa   : > { %1618 = vrot.lane.b32.xlu0 %v631_v62, %s2759_s26  ;;  %v1714_v7 = vsel %vm1692_vm3, %v1681_v12, %v4257_v27 }
 0x1fb   : > { %v1091_v63 = vpop.permute.xlu1 %1090 }
 0x1fc   : > { %v1219_v10 = vpop.permute.xlu0 %1218  ;;  %v1778_v13 = vsel %vm1758_vm5, %v1745_v32, %v1091_v63 }
 0x1fd   : > { %1236 = vrot.lane.b32.xlu1 %v630_v49, %s2756_s12  ;;  %v1811_v47 = vsel %vm1791_vm6, %v1778_v13, %v1219_v10  ;;  %v4259_v10 = vld [vmem:[#allocation62_spill] sm:$0xff] }
 0x1fe   : > { %1364 = vrot.lane.b32.xlu0 %v568_v41, %s2757_s17  ;;  %v1747_v60 = vsel %vm1725_vm4, %v1714_v7, %v4259_v10 }
 0x1ff   : > { %v1599_v30 = vpop.permute.xlu1 %1598 }
 0x200   : > { %v1908_v26 = vsel %vm1890_vm9, %v1875_v18, %v1599_v30  ;;  %v1347_v20 = vpop.permute.xlu0 %1346  ;;  %v603_v18 = vld [vmem:[#allocation2 + $0x1a1] sm:$0xff]  ;;  %v4260_v30 = vld [vmem:[#allocation59_spill] sm:$0xff] }
 0x201   : > { %1238 = vrot.lane.b32.xlu1 %v631_v62, %s2756_s12  ;;  %2674 = vmatmul.mubr.msk.f32.vlgmr.msra.gmra.mxu1 %vm1932_vm10, %v1908_v26  ;;  %v1844_v33 = vsel %vm1824_vm8, %v1811_v47, %v1347_v20  ;;  %v2739_v62 = vld [vmem:[#allocation2 + $0xf0] sm:$0xff] }
 0x202   : > { %1366 = vrot.lane.b32.xlu0 %v569_v37, %s2757_s17  ;;  %v1680_v23 = vsel %vm268_vm0, %v2739_v62, %v4256_v19 }
 0x203   : > { %v1345_v0 = vpop.permute.xlu1 %1344 }
 0x204   : > { %v3818_v15 = vpop.permute.xlu0 %1092  ;;  %v1843_v25 = vsel %vm1824_vm8, %v1810_v36, %v1345_v0 }
 0x205   : > { %984 = vrot.lane.b32.xlu1 %v568_v41, %s2754_s25  ;;  %v4258_v41 = vld [vmem:[#allocation38_spill] sm:$0xff] }
 0x206   : > { %986 = vrot.lane.b32.xlu0 %v569_v37, %s2754_s25  ;;  %v1713_v29 = vsel %vm1692_vm3, %v1680_v23, %v4258_v41 }
 0x207   : > { %v1473_v58 = vpop.permute.xlu1 %1472  ;;  %v1746_v26 = vsel %vm1725_vm4, %v1713_v29, %v4260_v30 }
 0x208   : > { %v1876_v51 = vsel %vm1857_vm7, %v1843_v25, %v1473_v58  ;;  %v1601_v21 = vpop.permute.xlu0 %1600  ;;  %v1779_v40 = vsel %vm1758_vm5, %v1746_v26, %v3818_v15 }
 0x209   : > { %1492 = vrot.lane.b32.xlu1 %v600_v46, %s2758_s24  ;;  %v1909_v3 = vsel %vm1890_vm9, %v1876_v51, %v1601_v21 }
 0x20a   : > { %1494 = vrot.lane.b32.xlu0 %v601_v4, %s2758_s24  ;;  %2676 = vmatprep.mubr.msk.f32.mxu1 %vm1932_vm10, %v1909_v3 }
 0x20b   : > { %v1475_v56 = vpop.permute.xlu1 %1474 }
 0x20c   : > { %v1221_v16 = vpop.permute.xlu0 %1220  ;;  %v1877_v8 = vsel %vm1857_vm7, %v1844_v33, %v1475_v56  ;;  %v4262_v33 = vld [vmem:[#allocation40_spill] sm:$0xff] }
 0x20d   : > { %1112 = vrot.lane.b32.xlu1 %v600_v46, %s2755_s7  ;;  %v1812_v14 = vsel %vm1791_vm6, %v1779_v40, %v1221_v16 }
 0x20e   : > { %1114 = vrot.lane.b32.xlu0 %v601_v4, %s2755_s7 }
 0x20f   : > { %v1095_v22 = vpop.permute.xlu1 %1094 }
 0x210   : > { %v1223_v53 = vpop.permute.xlu0 %1222  ;;  %v1780_v37 = vsel %vm1758_vm5, %v1747_v60, %v1095_v22  ;;  %v2740_v22 = vld [vmem:[#allocation2 + $0x108] sm:$0xff] }
 0x211   : > { %1620 = vrot.lane.b32.xlu1 %v632_v1, %s2759_s26  ;;  %v1813_v50 = vsel %vm1791_vm6, %v1780_v37, %v1223_v53 }
 0x212   : > { %1622 = vrot.lane.b32.xlu0 %v633_v24, %s2759_s26 }
 0x213   : > { %v1603_v44 = vpop.permute.xlu1 %1602 }
 0x214   : > { %v1910_v52 = vsel %vm1890_vm9, %v1877_v8, %v1603_v44  ;;  %v1351_v42 = vpop.permute.xlu0 %1350  ;;  %v2741_v44 = vld [vmem:[#allocation2 + $0x110] sm:$0xff] }
 0x215   : > { %1240 = vrot.lane.b32.xlu1 %v632_v1, %s2756_s12  ;;  %2677 = vmatmul.mubr.msk.f32.gmra.mxu1 %vm1932_vm10, %v1910_v52  ;;  %v1846_v38 = vsel %vm1824_vm8, %v1813_v50, %v1351_v42  ;;  %v4263_v52 = vld [vmem:[#allocation22_spill] sm:$0xff]  ;;  %v4264_v42 = vld [vmem:[#allocation61_spill] sm:$0xff] }
 0x216   : > { %1368 = vrot.lane.b32.xlu0 %v570_v28, %s2757_s17  ;;  %v1683_v28 = vsel %vm268_vm0, %v2741_v44, %v4263_v52 }
 0x217   : > { %v1349_v55 = vpop.permute.xlu1 %1348 }
 0x218   : > { %v3847_v49 = vpop.permute.xlu0 %970  ;;  %v1845_v0 = vsel %vm1824_vm8, %v1812_v14, %v1349_v55 }
 0x219   : > { %1242 = vrot.lane.b32.xlu1 %v633_v24, %s2756_s12  ;;  %v4261_v24 = vld [vmem:[#allocation19_spill] sm:$0xff] }
 0x21a   : > { %1496 = vrot.lane.b32.xlu0 %v602_v45, %s2758_s24  ;;  %v1682_v47 = vsel %vm268_vm0, %v2740_v22, %v4261_v24 }
 0x21b   : > { %v1477_v9 = vpop.permute.xlu1 %1476  ;;  %v1715_v8 = vsel %vm1692_vm3, %v1682_v47, %v4262_v33  ;;  %v4269_v47 = vld [vmem:[#allocation45_spill] sm:$0xff] }
 0x21c   : > { %v1479_v63 = vpop.permute.xlu0 %1478  ;;  %v1878_v36 = vsel %vm1857_vm7, %v1845_v0, %v1477_v9  ;;  %v1748_v55 = vsel %vm1725_vm4, %v1715_v8, %v4264_v42  ;;  %v4265_v9 = vld [vmem:[#allocation43_spill] sm:$0xff] }
 0x21d   : > { %1370 = vrot.lane.b32.xlu1 %v571_v54, %s2757_s17  ;;  %v1879_v21 = vsel %vm1857_vm7, %v1846_v38, %v1479_v63  ;;  %v1716_v6 = vsel %vm1692_vm3, %v1683_v28, %v4265_v9 }
 0x21e   : > { %1624 = vrot.lane.b32.xlu0 %v634_v31, %s2759_s26  ;;  %v1749_v12 = vsel %vm1725_vm4, %v1716_v6, %v3847_v49 }
 0x21f   : > { %v1097_v20 = vpop.permute.xlu1 %1096 }
 0x220   : > { %v1099_v39 = vpop.permute.xlu0 %1098  ;;  %v1781_v34 = vsel %vm1758_vm5, %v1748_v55, %v1097_v20 }
 0x221   : > { %v2651_v2 = vpop.f32.mrf.mxu0  ;;  %1498 = vrot.lane.b32.xlu1 %v603_v18, %s2758_s24  ;;  %v1782_v23 = vsel %vm1758_vm5, %v1749_v12, %v1099_v39 }
 0x222   : > { %v2325_v5 = vmul.f32 %v2651_v2, %v2651_v2  ;;  %2427 = vst.msk [vmem:[%s3871_s27 + $0x8] sm:$0xff] %vm268_vm0, %v2651_v2  ;;  %v2255_v25 = vsel %vm268_vm0, %v2651_v2, 0.0 }
 0x223   : > { %v2095_v15 = vpop.f32.mrf.mxu0  ;;  %v1605_v46 = vpop.permute.xlu1 %1604 }
 0x224   : > { %v2254_v58 = vsel %vm268_vm0, %v2095_v15, 0.0  ;;  %v2324_v51 = vmul.f32 %v2095_v15, %v2095_v15  ;;  %2426 = vst.msk [vmem:[%s3871_s27] sm:$0xff] %vm268_vm0, %v2095_v15  ;;  %v1911_v4 = vsel %vm1890_vm9, %v1878_v36, %v1605_v46  ;;  %v1607_v35 = vpop.permute.xlu0 %1606  ;;  %v2357_v57 = vsel %vm268_vm0, %v2325_v5, 0.0 }
 0x225   : > { %v2256_v3 = vadd.f32 %v2255_v25, %v2254_v58  ;;  %1626 = vrot.lane.b32.xlu1 %v635_v11, %s2759_s26  ;;  %2679 = vmatprep.mubr.msk.f32.mxu1 %vm1932_vm10, %v1911_v4  ;;  %v1912_v56 = vsel %vm1890_vm9, %v1879_v21, %v1607_v35  ;;  %v4266_v4 = vld [vmem:[#allocation21_spill] sm:$0xff] }
 0x226   : > { %v2356_v48 = vsel %vm268_vm0, %v2324_v51, 0.0  ;;  %2680 = vmatmul.mubr.msk.f32.gmra.mxu1 %vm1932_vm10, %v1912_v56  ;;  %v2742_v51 = vld [vmem:[#allocation2 + $0x120] sm:$0xff] }
 0x227   : > { %v2358_v17 = vadd.f32 %v2357_v57, %v2356_v48  ;;  %v1225_v59 = vpop.permute.xlu1 %1224  ;;  %v1684_v21 = vsel %vm268_vm0, %v2742_v51, %v4266_v4  ;;  %v4267_v57 = vld [vmem:[#allocation42_spill] sm:$0xff]  ;;  %v4272_v51 = vld [vmem:[#allocation27_spill] sm:$0xff] }
 0x228   : > { %v1353_v43 = vpop.permute.xlu0 %1352  ;;  %v1814_v31 = vsel %vm1791_vm6, %v1781_v34, %v1225_v59  ;;  %v1717_v48 = vsel %vm1692_vm3, %v1684_v21, %v4267_v57  ;;  %v4273_v57 = vld [vmem:[#allocation47_spill] sm:$0xff] }
 0x229   : > { %v1847_v60 = vsel %vm1824_vm8, %v1814_v31, %v1353_v43  ;;  %v4268_v43 = vld [vmem:[#allocation24_spill] sm:$0xff] }
 0x22b   : > { %v1227_v32 = vpop.permute.xlu1 %1226 }
 0x22c   : > { %v1355_v16 = vpop.permute.xlu0 %1354  ;;  %v1815_v41 = vsel %vm1791_vm6, %v1782_v23, %v1227_v32  ;;  %v1685_v32 = vsel %vm268_vm0, %v3639_v61, %v4268_v43 }
 0x22d   : > { %v1848_v40 = vsel %vm1824_vm8, %v1815_v41, %v1355_v16 }
 0x22f   : > { %v973_v13 = vpop.permute.xlu1 %972 }
 0x230   : > { %v3895_v1 = vpop.permute.xlu0 %974  ;;  %v1750_v16 = vsel %vm1725_vm4, %v1717_v48, %v973_v13 }
 0x233   : > { %v1481_v53 = vpop.permute.xlu1 %1480 }
 0x234   : > { %v1483_v45 = vpop.permute.xlu0 %1482  ;;  %v1880_v30 = vsel %vm1857_vm7, %v1847_v60, %v1481_v53  ;;  %v1718_v53 = vsel %vm1692_vm3, %v1685_v32, %v4269_v47 }
 0x235   : > { %v2654_v54 = vpop.f32.mrf.mxu0  ;;  %v1881_v2 = vsel %vm1857_vm7, %v1848_v40, %v1483_v45  ;;  %v1751_v52 = vsel %vm1725_vm4, %v1718_v53, %v3895_v1 }
 0x236   : > { %2429 = vst.msk [vmem:[%s3871_s27 + $0x18] sm:$0xff] %vm268_vm0, %v2654_v54  ;;  %v2327_v27 = vmul.f32 %v2654_v54, %v2654_v54  ;;  %v2259_v49 = vsel %vm268_vm0, %v2654_v54, 0.0 }
 0x237   : > { %v1101_v62 = vpop.permute.xlu1 %1100  ;;  %v2105_v19 = vpop.f32.mrf.mxu0 }
 0x238   : > { %v2257_v7 = vsel %vm268_vm0, %v2105_v19, 0.0  ;;  %v2326_v63 = vmul.f32 %v2105_v19, %v2105_v19  ;;  %2428 = vst.msk [vmem:[%s3871_s27 + $0x10] sm:$0xff] %vm268_vm0, %v2105_v19  ;;  %v1103_v10 = vpop.permute.xlu0 %1102  ;;  %v2361_v14 = vsel %vm268_vm0, %v2327_v27, 0.0  ;;  %v1783_v33 = vsel %vm1758_vm5, %v1750_v16, %v1101_v62 }
 0x239   : > { %v2258_v29 = vadd.f32 %v2257_v7, %v2256_v3  ;;  %v1784_v13 = vsel %vm1758_vm5, %v1751_v52, %v1103_v10 }
 0x23a   : > { %v2359_v18 = vsel %vm268_vm0, %v2326_v63, 0.0 }
 0x23b   : > { %v2360_v26 = vadd.f32 %v2359_v18, %v2358_v17  ;;  %v1609_v37 = vpop.permute.xlu1 %1608  ;;  %v2260_v20 = vadd.f32 %v2259_v49, %v2258_v29  ;;  %v373_v18 = vld [vmem:[#allocation2 + $0x138] sm:$0xff] }
 0x23c   : > { %v1913_v39 = vsel %vm1890_vm9, %v1880_v30, %v1609_v37  ;;  %v1611_v50 = vpop.permute.xlu0 %1610 }
 0x23d   : > { %2682 = vmatprep.mubr.msk.f32.mxu1 %vm1932_vm10, %v1913_v39  ;;  %v2362_v0 = vadd.f32 %v2361_v14, %v2360_v26  ;;  %v1914_v5 = vsel %vm1890_vm9, %v1881_v2, %v1611_v50  ;;  %v374_v14 = vld [vmem:[#allocation2 + $0x140] sm:$0xff]  ;;  %v4270_v50 = vld [vmem:[#allocation23_spill] sm:$0xff] }
 0x23e   : > { %2683 = vmatmul.mubr.msk.f32.gmra.mxu1 %vm1932_vm10, %v1914_v5  ;;  %v1687_v4 = vsel %vm268_vm0, %v374_v14, %v4272_v51  ;;  %v4277_v14 = vld [vmem:[#allocation49_spill] sm:$0xff] }
 0x23f   : > { %v1229_v11 = vpop.permute.xlu1 %1228  ;;  %v1720_v48 = vsel %vm1692_vm3, %v1687_v4, %v4273_v57 }
 0x240   : > { %v1357_v38 = vpop.permute.xlu0 %1356  ;;  %v1816_v28 = vsel %vm1791_vm6, %v1783_v33, %v1229_v11 }
 0x241   : > { %v1849_v34 = vsel %vm1824_vm8, %v1816_v28, %v1357_v38 }
 0x243   : > { %v1231_v36 = vpop.permute.xlu1 %1230 }
 0x244   : > { %v1359_v15 = vpop.permute.xlu0 %1358  ;;  %v1817_v54 = vsel %vm1791_vm6, %v1784_v13, %v1231_v36  ;;  %v4271_v36 = vld [vmem:[#allocation44_spill] sm:$0xff] }
 0x245   : > { %v1850_v1 = vsel %vm1824_vm8, %v1817_v54, %v1359_v15 }
 0x247   : > { %v3929_v46 = vpop.permute.xlu1 %976 }
 0x248   : > { %v3931_v25 = vpop.permute.xlu0 %978 }
 0x249   : > { %v2657_v58 = vpop.f32.mrf.mxu0 }
 0x24a   : > { %2431 = vst.msk [vmem:[%s3871_s27 + $0x28] sm:$0xff] %vm268_vm0, %v2657_v58  ;;  %v2329_v56 = vmul.f32 %v2657_v58, %v2657_v58  ;;  %v2263_v8 = vsel %vm268_vm0, %v2657_v58, 0.0 }
 0x24b   : > { %v1485_v3 = vpop.permute.xlu1 %1484  ;;  %v2115_v35 = vpop.f32.mrf.mxu0 }
 0x24c   : > { %v2261_v17 = vsel %vm268_vm0, %v2115_v35, 0.0  ;;  %v2328_v59 = vmul.f32 %v2115_v35, %v2115_v35  ;;  %2430 = vst.msk [vmem:[%s3871_s27 + $0x20] sm:$0xff] %vm268_vm0, %v2115_v35  ;;  %v1487_v24 = vpop.permute.xlu0 %1486  ;;  %v2365_v45 = vsel %vm268_vm0, %v2329_v56, 0.0  ;;  %v1882_v12 = vsel %vm1857_vm7, %v1849_v34, %v1485_v3 }
 0x24d   : > { %v2262_v22 = vadd.f32 %v2261_v17, %v2260_v20  ;;  %v1883_v19 = vsel %vm1857_vm7, %v1850_v1, %v1487_v24  ;;  %v1753_v17 = vsel %vm1725_vm4, %v1720_v48, %v3931_v25 }
 0x24e   : > { %v2363_v44 = vsel %vm268_vm0, %v2328_v59, 0.0 }
 0x24f   : > { %v2364_v42 = vadd.f32 %v2363_v44, %v2362_v0  ;;  %v1105_v61 = vpop.permute.xlu1 %1104  ;;  %v2264_v55 = vadd.f32 %v2263_v8, %v2262_v22  ;;  %v1686_v0 = vsel %vm268_vm0, %v373_v18, %v4270_v50 }
 0x250   : > { %v1107_v9 = vpop.permute.xlu0 %1106  ;;  %v1719_v15 = vsel %vm1692_vm3, %v1686_v0, %v4271_v36 }
 0x251   : > { %v2366_v6 = vadd.f32 %v2365_v45, %v2364_v42  ;;  %v1752_v21 = vsel %vm1725_vm4, %v1719_v15, %v3929_v46  ;;  %v1786_v32 = vsel %vm1758_vm5, %v1753_v17, %v1107_v9 }
 0x252   : > { %v1785_v56 = vsel %vm1758_vm5, %v1752_v21, %v1105_v61 }
 0x253   : > { %v1613_v31 = vpop.permute.xlu1 %1612 }
 0x254   : > { %v1915_v62 = vsel %vm1890_vm9, %v1882_v12, %v1613_v31  ;;  %v1615_v23 = vpop.permute.xlu0 %1614 }
 0x255   : > { %2685 = vmatprep.mubr.msk.f32.mxu1 %vm1932_vm10, %v1915_v62  ;;  %v1916_v27 = vsel %vm1890_vm9, %v1883_v19, %v1615_v23  ;;  %v375_v19 = vld [vmem:[#allocation2 + $0x150] sm:$0xff] }
 0x256   : > { %2686 = vmatmul.mubr.msk.f32.gmra.mxu1 %vm1932_vm10, %v1916_v27 }
 0x257   : > { %v1233_v7 = vpop.permute.xlu1 %1232 }
 0x258   : > { %v1361_v63 = vpop.permute.xlu0 %1360  ;;  %v1818_v59 = vsel %vm1791_vm6, %v1785_v56, %v1233_v7 }
 0x259   : > { %v1851_v46 = vsel %vm1824_vm8, %v1818_v59, %v1361_v63  ;;  %v376_v63 = vld [vmem:[#allocation2 + $0x158] sm:$0xff] }
 0x25b   : > { %v1235_v41 = vpop.permute.xlu1 %1234 }
 0x25c   : > { %v1363_v29 = vpop.permute.xlu0 %1362  ;;  %v1819_v16 = vsel %vm1791_vm6, %v1786_v32, %v1235_v41  ;;  %v4274_v41 = vld [vmem:[#allocation25_spill] sm:$0xff]  ;;  %v4278_v32 = vld [vmem:[#allocation28_spill] sm:$0xff] }
 0x25d   : > { %v2660_v10 = vpop.f32.mrf.mxu0  ;;  %v1852_v53 = vsel %vm1824_vm8, %v1819_v16, %v1363_v29  ;;  %v1688_v29 = vsel %vm268_vm0, %v375_v19, %v4274_v41 }
 0x25e   : > { %2433 = vst.msk [vmem:[%s3871_s27 + $0x38] sm:$0xff] %vm268_vm0, %v2660_v10  ;;  %v2331_v30 = vmul.f32 %v2660_v10, %v2660_v10  ;;  %v2267_v39 = vsel %vm268_vm0, %v2660_v10, 0.0 }
 0x25f   : > { %v3967_v60 = vpop.permute.xlu1 %980  ;;  %v2125_v49 = vpop.f32.mrf.mxu0 }
 0x260   : > { %v2265_v26 = vsel %vm268_vm0, %v2125_v49, 0.0  ;;  %v2330_v37 = vmul.f32 %v2125_v49, %v2125_v49  ;;  %2432 = vst.msk [vmem:[%s3871_s27 + $0x30] sm:$0xff] %vm268_vm0, %v2125_v49  ;;  %v3972_v40 = vpop.permute.xlu0 %982  ;;  %v2369_v58 = vsel %vm268_vm0, %v2331_v30, 0.0  ;;  %v4275_v49 = vld [vmem:[#allocation46_spill] sm:$0xff]  ;;  %v4276_v30 = vld [vmem:[#allocation29_spill] sm:$0xff] }
 0x261   : > { %v2266_v20 = vadd.f32 %v2265_v26, %v2264_v55  ;;  %v1721_v18 = vsel %vm1692_vm3, %v1688_v29, %v4275_v49  ;;  %v1689_v26 = vsel %vm268_vm0, %v376_v63, %v4276_v30 }
 0x262   : > { %v2367_v2 = vsel %vm268_vm0, %v2330_v37, 0.0  ;;  %v1754_v37 = vsel %vm1725_vm4, %v1721_v18, %v3967_v60 }
 0x263   : > { %v2368_v5 = vadd.f32 %v2367_v2, %v2366_v6  ;;  %v1489_v11 = vpop.permute.xlu1 %1488  ;;  %v2268_v38 = vadd.f32 %v2267_v39, %v2266_v20  ;;  %v1722_v39 = vsel %vm1692_vm3, %v1689_v26, %v4277_v14 }
 0x264   : > { %v1491_v3 = vpop.permute.xlu0 %1490  ;;  %v1884_v24 = vsel %vm1857_vm7, %v1851_v46, %v1489_v11  ;;  %v1755_v50 = vsel %vm1725_vm4, %v1722_v39, %v3972_v40 }
 0x265   : > { %v2370_v35 = vadd.f32 %v2369_v58, %v2368_v5  ;;  %v1885_v25 = vsel %vm1857_vm7, %v1852_v53, %v1491_v3 }
 0x267   : > { %v1109_v43 = vpop.permute.xlu1 %1108 }
 0x268   : > { %v1111_v22 = vpop.permute.xlu0 %1110  ;;  %v1787_v2 = vsel %vm1758_vm5, %v1754_v37, %v1109_v43 }
 0x269   : > { %v1788_v11 = vsel %vm1758_vm5, %v1755_v50, %v1111_v22 }
 0x26b   : > { %v1617_v47 = vpop.permute.xlu1 %1616 }
 0x26c   : > { %v1917_v33 = vsel %vm1890_vm9, %v1884_v24, %v1617_v47  ;;  %v1619_v8 = vpop.permute.xlu0 %1618  ;;  %v4279_v24 = vld [vmem:[#allocation48_spill] sm:$0xff] }
 0x26d   : > { %2688 = vmatprep.mubr.msk.f32.mxu1 %vm1932_vm10, %v1917_v33  ;;  %v1918_v44 = vsel %vm1890_vm9, %v1885_v25, %v1619_v8 }
 0x26e   : > { %2689 = vmatmul.mubr.msk.f32.gmra.mxu1 %vm1932_vm10, %v1918_v44 }
 0x26f   : > { %v1237_v52 = vpop.permute.xlu1 %1236 }
 0x270   : > { %v1365_v28 = vpop.permute.xlu0 %1364  ;;  %v1820_v0 = vsel %vm1791_vm6, %v1787_v2, %v1237_v52 }
 0x271   : > { %v2663_v42 = vpop.f32.mrf.mxu0  ;;  %v1853_v60 = vsel %vm1824_vm8, %v1820_v0, %v1365_v28 }
 0x272   : > { %2435 = vst.msk [vmem:[%s3871_s27 + $0x48] sm:$0xff] %vm268_vm0, %v2663_v42  ;;  %v2333_v13 = vmul.f32 %v2663_v42, %v2663_v42  ;;  %v2271_v34 = vsel %vm268_vm0, %v2663_v42, 0.0 }
 0x273   : > { %v1239_v61 = vpop.permute.xlu1 %1238  ;;  %v2135_v55 = vpop.f32.mrf.mxu0 }
 0x274   : > { %v2269_v45 = vsel %vm268_vm0, %v2135_v55, 0.0  ;;  %v2332_v54 = vmul.f32 %v2135_v55, %v2135_v55  ;;  %2434 = vst.msk [vmem:[%s3871_s27 + $0x40] sm:$0xff] %vm268_vm0, %v2135_v55  ;;  %v1367_v6 = vpop.permute.xlu0 %1366  ;;  %v2373_v23 = vsel %vm268_vm0, %v2333_v13, 0.0 }
 0x275   : > { %v2270_v9 = vadd.f32 %v2269_v45, %v2268_v38  ;;  %v1821_v38 = vsel %vm1791_vm6, %v1788_v11, %v1239_v61  ;;  %v378_v45 = vld [vmem:[#allocation2 + $0x170] sm:$0xff] }
 0x276   : > { %v2371_v12 = vsel %vm268_vm0, %v2332_v54, 0.0  ;;  %v1854_v51 = vsel %vm1824_vm8, %v1821_v38, %v1367_v6  ;;  %v4280_v6 = vld [vmem:[#allocation30_spill] sm:$0xff] }
 0x277   : > { %v2372_v31 = vadd.f32 %v2371_v12, %v2370_v35  ;;  %v985_v1 = vpop.permute.xlu1 %984  ;;  %v2272_v62 = vadd.f32 %v2271_v34, %v2270_v9  ;;  %v377_v35 = vld [vmem:[#allocation2 + $0x168] sm:$0xff]  ;;  %v1691_v34 = vsel %vm268_vm0, %v378_v45, %v4280_v6 }
 0x278   : > { %v987_v27 = vpop.permute.xlu0 %986  ;;  %v1690_v16 = vsel %vm268_vm0, %v377_v35, %v4278_v32 }
 0x279   : > { %v2374_v7 = vadd.f32 %v2373_v23, %v2372_v31  ;;  %v1723_v47 = vsel %vm1692_vm3, %v1690_v16, %v4279_v24 }
 0x27a   : > { %v1756_v25 = vsel %vm1725_vm4, %v1723_v47, %v985_v1  ;;  %v4281_v1 = vld [vmem:[#allocation50_spill] sm:$0xff] }
 0x27b   : > { %v1493_v10 = vpop.permute.xlu1 %1492 }
 0x27c   : > { %v1495_v20 = vpop.permute.xlu0 %1494  ;;  %v1886_v15 = vsel %vm1857_vm7, %v1853_v60, %v1493_v10 }
 0x27d   : > { %v1887_v40 = vsel %vm1857_vm7, %v1854_v51, %v1495_v20 }
 0x27f   : > { %v1113_v5 = vpop.permute.xlu1 %1112 }
 0x280   : > { %v1115_v36 = vpop.permute.xlu0 %1114  ;;  %v1789_v28 = vsel %vm1758_vm5, %v1756_v25, %v1113_v5 }
 0x283   : > { %v1621_v58 = vpop.permute.xlu1 %1620 }
 0x284   : > { %v1919_v4 = vsel %vm1890_vm9, %v1886_v15, %v1621_v58  ;;  %v1623_v21 = vpop.permute.xlu0 %1622 }
 0x285   : > { %v2666_v3 = vpop.f32.mrf.mxu0  ;;  %2691 = vmatprep.mubr.msk.f32.mxu1 %vm1932_vm10, %v1919_v4  ;;  %v1920_v57 = vsel %vm1890_vm9, %v1887_v40, %v1623_v21 }
 0x286   : > { %2437 = vst.msk [vmem:[%s3871_s27 + $0x58] sm:$0xff] %vm268_vm0, %v2666_v3  ;;  %2692 = vmatmul.mubr.msk.f32.gmra.mxu1 %vm1932_vm10, %v1920_v57  ;;  %v2335_v17 = vmul.f32 %v2666_v3, %v2666_v3  ;;  %v2275_v53 = vsel %vm268_vm0, %v2666_v3, 0.0 }
 0x287   : > { %v1241_v48 = vpop.permute.xlu1 %1240  ;;  %v2145_v56 = vpop.f32.mrf.mxu0 }
 0x288   : > { %v2273_v59 = vsel %vm268_vm0, %v2145_v56, 0.0  ;;  %v2334_v43 = vmul.f32 %v2145_v56, %v2145_v56  ;;  %2436 = vst.msk [vmem:[%s3871_s27 + $0x50] sm:$0xff] %vm268_vm0, %v2145_v56  ;;  %v1369_v46 = vpop.permute.xlu0 %1368  ;;  %v2377_v42 = vsel %vm268_vm0, %v2335_v17, 0.0  ;;  %v1822_v61 = vsel %vm1791_vm6, %v1789_v28, %v1241_v48 }
 0x289   : > { %v2274_v22 = vadd.f32 %v2273_v59, %v2272_v62  ;;  %v1855_v9 = vsel %vm1824_vm8, %v1822_v61, %v1369_v46  ;;  %v1724_v62 = vsel %vm1692_vm3, %v1691_v34, %v4281_v1 }
 0x28a   : > { %v2375_v33 = vsel %vm268_vm0, %v2334_v43, 0.0  ;;  %v1757_v23 = vsel %vm1725_vm4, %v1724_v62, %v987_v27 }
 0x28b   : > { %v2376_v8 = vadd.f32 %v2375_v33, %v2374_v7  ;;  %v1243_v44 = vpop.permute.xlu1 %1242  ;;  %v2276_v52 = vadd.f32 %v2275_v53, %v2274_v22  ;;  %v1790_v63 = vsel %vm1758_vm5, %v1757_v23, %v1115_v36 }
 0x28c   : > { %v1497_v55 = vpop.permute.xlu0 %1496  ;;  %v1823_v41 = vsel %vm1791_vm6, %v1790_v63, %v1243_v44 }
 0x28d   : > { %v2378_v13 = vadd.f32 %v2377_v42, %v2376_v8  ;;  %v1888_v12 = vsel %vm1857_vm7, %v1855_v9, %v1497_v55 }
 0x28f   : > { %v1371_v54 = vpop.permute.xlu1 %1370 }
 0x290   : > { %v1625_v31 = vpop.permute.xlu0 %1624  ;;  %v1856_v29 = vsel %vm1824_vm8, %v1823_v41, %v1371_v54 }
 0x291   : > { %v1921_v19 = vsel %vm1890_vm9, %v1888_v12, %v1625_v31 }
 0x292   : > { %2694 = vmatprep.mubr.msk.f32.mxu1 %vm1932_vm10, %v1921_v19 }
 0x293   : > { %v1499_v7 = vpop.permute.xlu1 %1498 }
 0x294   : > { %v1889_v10 = vsel %vm1857_vm7, %v1856_v29, %v1499_v7 }
 0x297   : > { %v1627_v49 = vpop.permute.xlu1 %1626 }
 0x298   : > { %v1922_v18 = vsel %vm1890_vm9, %v1889_v10, %v1627_v49 }
 0x299   : > { %v2669_v30 = vpop.f32.mrf.mxu0  ;;  %2695 = vmatmul.mubr.msk.f32.gmra.mxu1 %vm1932_vm10, %v1922_v18 }
 0x29a   : > { %2439 = vst.msk [vmem:[%s3871_s27 + $0x68] sm:$0xff] %vm268_vm0, %v2669_v30  ;;  %v2337_v26 = vmul.f32 %v2669_v30, %v2669_v30  ;;  %v2279_v39 = vsel %vm268_vm0, %v2669_v30, 0.0 }
 0x29b   : > { %v2155_v27 = vpop.f32.mrf.mxu0 }
 0x29c   : > { %v2277_v37 = vsel %vm268_vm0, %v2155_v27, 0.0  ;;  %v2336_v20 = vmul.f32 %v2155_v27, %v2155_v27  ;;  %2438 = vst.msk [vmem:[%s3871_s27 + $0x60] sm:$0xff] %vm268_vm0, %v2155_v27  ;;  %v2381_v5 = vsel %vm268_vm0, %v2337_v26, 0.0 }
 0x29d   : > { %v2278_v14 = vadd.f32 %v2277_v37, %v2276_v52 }
 0x29e   : > { %v2379_v2 = vsel %vm268_vm0, %v2336_v20, 0.0 }
 0x29f   : > { %v2380_v50 = vadd.f32 %v2379_v2, %v2378_v13  ;;  %v2280_v0 = vadd.f32 %v2279_v39, %v2278_v14 }
 0x2a1   : > { %v2382_v11 = vadd.f32 %v2381_v5, %v2380_v50 }
 0x2ad   : > { %v2672_v38 = vpop.f32.mrf.mxu0 }
 0x2ae   : > { %2441 = vst.msk [vmem:[%s3871_s27 + $0x78] sm:$0xff] %vm268_vm0, %v2672_v38  ;;  %v2339_v60 = vmul.f32 %v2672_v38, %v2672_v38  ;;  %v2283_v4 = vsel %vm268_vm0, %v2672_v38, 0.0 }
 0x2af   : > { %v2165_v36 = vpop.f32.mrf.mxu0 }
 0x2b0   : > { %v2281_v15 = vsel %vm268_vm0, %v2165_v36, 0.0  ;;  %v2338_v58 = vmul.f32 %v2165_v36, %v2165_v36  ;;  %2440 = vst.msk [vmem:[%s3871_s27 + $0x70] sm:$0xff] %vm268_vm0, %v2165_v36  ;;  %v2385_v35 = vsel %vm268_vm0, %v2339_v60, 0.0 }
 0x2b1   : > { %v2282_v51 = vadd.f32 %v2281_v15, %v2280_v0 }
 0x2b2   : > { %v2383_v40 = vsel %vm268_vm0, %v2338_v58, 0.0 }
 0x2b3   : > { %v2284_v21 = vadd.f32 %v2283_v4, %v2282_v51  ;;  %v2384_v3 = vadd.f32 %v2383_v40, %v2382_v11 }
 0x2b5   : > { %v2386_v57 = vadd.f32 %v2385_v35, %v2384_v3 }
 0x2c1   : > { %v2675_v48 = vpop.f32.mrf.mxu1 }
 0x2c2   : > { %2443 = vst.msk [vmem:[%s3871_s27 + $0x88] sm:$0xff] %vm268_vm0, %v2675_v48  ;;  %v2341_v17 = vmul.f32 %v2675_v48, %v2675_v48  ;;  %v2287_v16 = vsel %vm268_vm0, %v2675_v48, 0.0 }
 0x2c3   : > { %v2175_v56 = vpop.f32.mrf.mxu1 }
 0x2c4   : > { %v2285_v59 = vsel %vm268_vm0, %v2175_v56, 0.0  ;;  %v2340_v43 = vmul.f32 %v2175_v56, %v2175_v56  ;;  %2442 = vst.msk [vmem:[%s3871_s27 + $0x80] sm:$0xff] %vm268_vm0, %v2175_v56  ;;  %v2389_v47 = vsel %vm268_vm0, %v2341_v17, 0.0 }
 0x2c5   : > { %v2286_v32 = vadd.f32 %v2285_v59, %v2284_v21 }
 0x2c6   : > { %v2387_v22 = vsel %vm268_vm0, %v2340_v43, 0.0 }
 0x2c7   : > { %v2388_v46 = vadd.f32 %v2387_v22, %v2386_v57  ;;  %v2288_v24 = vadd.f32 %v2287_v16, %v2286_v32 }
 0x2c9   : > { %v2390_v53 = vadd.f32 %v2389_v47, %v2388_v46 }
 0x2d5   : > { %v2678_v33 = vpop.f32.mrf.mxu1 }
 0x2d6   : > { %2445 = vst.msk [vmem:[%s3871_s27 + $0x98] sm:$0xff] %vm268_vm0, %v2678_v33  ;;  %v2343_v8 = vmul.f32 %v2678_v33, %v2678_v33  ;;  %v2291_v42 = vsel %vm268_vm0, %v2678_v33, 0.0 }
 0x2d7   : > { %v2185_v25 = vpop.f32.mrf.mxu1 }
 0x2d8   : > { %v2289_v44 = vsel %vm268_vm0, %v2185_v25, 0.0  ;;  %v2342_v52 = vmul.f32 %v2185_v25, %v2185_v25  ;;  %2444 = vst.msk [vmem:[%s3871_s27 + $0x90] sm:$0xff] %vm268_vm0, %v2185_v25  ;;  %v2393_v45 = vsel %vm268_vm0, %v2343_v8, 0.0 }
 0x2d9   : > { %v2290_v28 = vadd.f32 %v2289_v44, %v2288_v24 }
 0x2da   : > { %v2391_v61 = vsel %vm268_vm0, %v2342_v52, 0.0 }
 0x2db   : > { %v2392_v55 = vadd.f32 %v2391_v61, %v2390_v53  ;;  %v2292_v13 = vadd.f32 %v2291_v42, %v2290_v28 }
 0x2dd   : > { %v2394_v54 = vadd.f32 %v2393_v45, %v2392_v55 }
 0x2e6   : > { %v2681_v9 = vpop.f32.mrf.mxu1 }
 0x2e7   : > { %2447 = vst.msk [vmem:[%s3871_s27 + $0xa8] sm:$0xff] %vm268_vm0, %v2681_v9  ;;  %v2345_v34 = vmul.f32 %v2681_v9, %v2681_v9  ;;  %v2295_v62 = vsel %vm268_vm0, %v2681_v9, 0.0 }
 0x2e8   : > { %v2195_v6 = vpop.f32.mrf.mxu1 }
 0x2e9   : > { %v2293_v12 = vsel %vm268_vm0, %v2195_v6, 0.0  ;;  %v2344_v31 = vmul.f32 %v2195_v6, %v2195_v6  ;;  %2446 = vst.msk [vmem:[%s3871_s27 + $0xa0] sm:$0xff] %vm268_vm0, %v2195_v6  ;;  %v2397_v63 = vsel %vm268_vm0, %v2345_v34, 0.0 }
 0x2ea   : > { %v2294_v1 = vadd.f32 %v2293_v12, %v2292_v13 }
 0x2eb   : > { %v2395_v19 = vsel %vm268_vm0, %v2344_v31, 0.0 }
 0x2ec   : > { %v2396_v23 = vadd.f32 %v2395_v19, %v2394_v54  ;;  %v2296_v7 = vadd.f32 %v2295_v62, %v2294_v1 }
 0x2ee   : > { %v2398_v41 = vadd.f32 %v2397_v63, %v2396_v23 }
 0x2fe   : > { %v2684_v29 = vpop.f32.mrf.mxu1 }
 0x2ff   : > { %2449 = vst.msk [vmem:[%s3871_s27 + $0xb8] sm:$0xff] %vm268_vm0, %v2684_v29  ;;  %v2347_v49 = vmul.f32 %v2684_v29, %v2684_v29  ;;  %v2299_v26 = vsel %vm268_vm0, %v2684_v29, 0.0 }
 0x300   : > { %v2205_v10 = vpop.f32.mrf.mxu1 }
 0x301   : > { %v2297_v18 = vsel %vm268_vm0, %v2205_v10, 0.0  ;;  %v2346_v30 = vmul.f32 %v2205_v10, %v2205_v10  ;;  %2448 = vst.msk [vmem:[%s3871_s27 + $0xb0] sm:$0xff] %vm268_vm0, %v2205_v10  ;;  %v2401_v39 = vsel %vm268_vm0, %v2347_v49, 0.0 }
 0x302   : > { %v2298_v27 = vadd.f32 %v2297_v18, %v2296_v7 }
 0x303   : > { %v2399_v37 = vsel %vm268_vm0, %v2346_v30, 0.0 }
 0x304   : > { %v2400_v20 = vadd.f32 %v2399_v37, %v2398_v41  ;;  %v2300_v14 = vadd.f32 %v2299_v26, %v2298_v27 }
 0x306   : > { %v2402_v2 = vadd.f32 %v2401_v39, %v2400_v20 }
 0x316   : > { %v2687_v50 = vpop.f32.mrf.mxu1 }
 0x317   : > { %2451 = vst.msk [vmem:[%s3871_s27 + $0xc8] sm:$0xff] %vm268_vm0, %v2687_v50  ;;  %v2349_v4 = vmul.f32 %v2687_v50, %v2687_v50  ;;  %v2303_v3 = vsel %vm268_vm0, %v2687_v50, 0.0 }
 0x318   : > { %v2215_v0 = vpop.f32.mrf.mxu1 }
 0x319   : > { %2450 = vst.msk [vmem:[%s3871_s27 + $0xc0] sm:$0xff] %vm268_vm0, %v2215_v0  ;;  %v2348_v38 = vmul.f32 %v2215_v0, %v2215_v0  ;;  %v2301_v60 = vsel %vm268_vm0, %v2215_v0, 0.0  ;;  %v2405_v48 = vsel %vm268_vm0, %v2349_v4, 0.0 }
 0x31a   : > { %v2302_v51 = vadd.f32 %v2301_v60, %v2300_v14 }
 0x31b   : > { %v2403_v58 = vsel %vm268_vm0, %v2348_v38, 0.0 }
 0x31c   : > { %v2404_v21 = vadd.f32 %v2403_v58, %v2402_v2  ;;  %v2304_v57 = vadd.f32 %v2303_v3, %v2302_v51 }
 0x31e   : > { %v2406_v59 = vadd.f32 %v2405_v48, %v2404_v21 }
 0x32e   : > { %v2690_v5 = vpop.f32.mrf.mxu1 }
 0x32f   : > { %2453 = vst.msk [vmem:[%s3871_s27 + $0xd8] sm:$0xff] %vm268_vm0, %v2690_v5  ;;  %v2351_v43 = vmul.f32 %v2690_v5, %v2690_v5  ;;  %v2307_v22 = vsel %vm268_vm0, %v2690_v5, 0.0 }
 0x330   : > { %v2225_v11 = vpop.f32.mrf.mxu1 }
 0x331   : > { %2452 = vst.msk [vmem:[%s3871_s27 + $0xd0] sm:$0xff] %vm268_vm0, %v2225_v11  ;;  %v2350_v40 = vmul.f32 %v2225_v11, %v2225_v11  ;;  %v2305_v35 = vsel %vm268_vm0, %v2225_v11, 0.0  ;;  %v2409_v47 = vsel %vm268_vm0, %v2351_v43, 0.0 }
 0x332   : > { %v2306_v17 = vadd.f32 %v2305_v35, %v2304_v57 }
 0x333   : > { %v2407_v56 = vsel %vm268_vm0, %v2350_v40, 0.0 }
 0x334   : > { %v2408_v16 = vadd.f32 %v2407_v56, %v2406_v59  ;;  %v2308_v24 = vadd.f32 %v2307_v22, %v2306_v17 }
 0x336   : > { %v2410_v25 = vadd.f32 %v2409_v47, %v2408_v16 }
 0x346   : > { %v2693_v36 = vpop.f32.mrf.mxu1 }
 0x347   : > { %2455 = vst.msk [vmem:[%s3871_s27 + $0xe8] sm:$0xff] %vm268_vm0, %v2693_v36  ;;  %v2353_v8 = vmul.f32 %v2693_v36, %v2693_v36  ;;  %v2311_v28 = vsel %vm268_vm0, %v2693_v36, 0.0 }
 0x348   : > { %v2235_v15 = vpop.f32.mrf.mxu1 }
 0x349   : > { %2454 = vst.msk [vmem:[%s3871_s27 + $0xe0] sm:$0xff] %vm268_vm0, %v2235_v15  ;;  %v2352_v32 = vmul.f32 %v2235_v15, %v2235_v15  ;;  %v2309_v46 = vsel %vm268_vm0, %v2235_v15, 0.0  ;;  %v2413_v55 = vsel %vm268_vm0, %v2353_v8, 0.0 }
 0x34a   : > { %v2310_v33 = vadd.f32 %v2309_v46, %v2308_v24 }
 0x34b   : > { %v2411_v53 = vsel %vm268_vm0, %v2352_v32, 0.0 }
 0x34c   : > { %v2412_v44 = vadd.f32 %v2411_v53, %v2410_v25  ;;  %v2312_v61 = vadd.f32 %v2311_v28, %v2310_v33 }
 0x34e   : > { %v2414_v6 = vadd.f32 %v2413_v55, %v2412_v44 }
 0x359   : > { %v2696_v52 = vpop.f32.mrf.mxu1 }
 0x35a   : > { %2457 = vst.msk [vmem:[%s3871_s27 + $0xf8] sm:$0xff] %vm268_vm0, %v2696_v52  ;;  %v2355_v13 = vmul.f32 %v2696_v52, %v2696_v52  ;;  %v2315_v34 = vsel %vm268_vm0, %v2696_v52, 0.0 }
 0x35b   : > { %v2245_v42 = vpop.f32.mrf.mxu1 }
 0x35c   : > { %v2313_v45 = vsel %vm268_vm0, %v2245_v42, 0.0  ;;  %v2354_v54 = vmul.f32 %v2245_v42, %v2245_v42  ;;  %2456 = vst.msk [vmem:[%s3871_s27 + $0xf0] sm:$0xff] %vm268_vm0, %v2245_v42  ;;  %v2417_v62 = vsel %vm268_vm0, %v2355_v13, 0.0 }
 0x35d   : > { %v2314_v9 = vadd.f32 %v2313_v45, %v2312_v61 }
 0x35e   : > { %v2415_v12 = vsel %vm268_vm0, %v2354_v54, 0.0 }
 0x35f   : > { %v2316_v31 = vadd.f32 %v2315_v34, %v2314_v9  ;;  %v2416_v1 = vadd.f32 %v2415_v12, %v2414_v6 }
 0x361   : > { %v2317_v19 = vrot.slane %v2316_v31, 4  ;;  %v2418_v23 = vadd.f32 %v2417_v62, %v2416_v1 }
 0x363   : > { %v2318_v7 = vadd.f32 %v2317_v19, %v2316_v31  ;;  %v2419_v63 = vrot.slane %v2418_v23, 4 }
 0x365   : > { %v2319_v41 = vrot.slane %v2318_v7, 2  ;;  %v2420_v29 = vadd.f32 %v2419_v63, %v2418_v23 }
 0x367   : > { %v2320_v10 = vadd.f32 %v2319_v41, %v2318_v7  ;;  %v2421_v49 = vrot.slane %v2420_v29, 2 }
 0x369   : > { %v2321_v18 = vrot.slane %v2320_v10, 1  ;;  %v2422_v30 = vadd.f32 %v2421_v49, %v2420_v29 }
 0x36b   : > { %v2322_v27 = vadd.f32 %v2321_v18, %v2320_v10  ;;  %v2423_v26 = vrot.slane %v2422_v30, 1 }
 0x36d   : > { %2323 = vst.msk [vmem:[%s235_s30] sm:$0x1] %vm277_vm2, %v2322_v27  ;;  %v2424_v37 = vadd.f32 %v2423_v26, %v2422_v30 }
 0x36f   : > { %2425 = vst.msk [vmem:[%s235_s30 + $0x1] sm:$0x1] %vm277_vm2, %v2424_v37 }
 0x370 PF: > { %s16_s18 = sadd.s32 1, %s2749_s18  }
 0x371   : > { %p13_p4 = scmp.ge.s32.totalorder %s16_s18, 4  }
 0x373   :  { %15 = sbr.rel (!%p13_p4) target bundleno = 1 (0x1), region = 81 }

// kernel: basic_block_forward.4
= control target key start
LH: loop header
LB: loop body
LE: loop exit
PB: predicated region body
PF: predicated region fallthrough
CT: control target
= control target key end

     0   :  { %s2904_s18 = smov 0   ;;  %s4326_s0 = inlined_call_operand.vmem [shape: f32[2,16,16,8], index: 0, kind: input, shape index: {}]   ;;  %s4327_s1 = inlined_call_operand.vmem [shape: f32[1,1,8], index: 1, kind: input, shape index: {}]   ;;  %s4328_s2 = inlined_call_operand.vmem [shape: f32[1,1,8], index: 2, kind: input, shape index: {}]   ;;  %s4329_s3 = inlined_call_operand.vmem [shape: f32[72,8], index: 3, kind: input, shape index: {}]   ;;  %s4330_s4 = inlined_call_operand.vmem [shape: f32[2,16,16,8], index: 4, kind: output, shape index: {0}]   ;;  %s4331_s5 = inlined_call_operand.vmem [shape: f32[2,2,8], index: 5, kind: output, shape index: {1}]  }
   0x1 LB: > { %s2654_s19 = sadd.s32 4294967295, %s2863_s18   ;;  %p2658_p0 = scmp.ge.s32.totalorder %s2863_s18, 1  ;;  %s2863_s18 = sphi %s2904_s18, %s16_s18  }
   0x2   : > { %p190_p1 = scmp.lt.s32.totalorder %s2863_s18, 3 }
   0x4   : > { %p191_p2 = pnand %p2658_p0, %p190_p1 }
   0x6   : > { %194 = sbr.rel (%p191_p2) target bundleno = 880 (0x370), region = 36 }
   0xb   : > { %vm378_vm0 = vcmask 64512   ;;  %vm381_vm1 = vcmask 58368   ;;  %p2914_p3 = scmp.lt.s32.totalorder %s2654_s19, 1  ;;  %vm387_vm2 = vcmask 57344   ;;  %v2865_v0 = vmov 0.0   ;;  %s2866_s29 = smov 8  }
   0xc   : > { %379 = vst.msk [vmem:[#allocation2] sm:$0xff] %vm378_vm0, %v2865_v0  ;;  %380 = vst.msk [vmem:[#allocation2 + $0x8] sm:$0xff] %vm378_vm0, %v2865_v0  ;;  %v2968_v1 = vld [vmem:[%s4327_s1] ss:$0 sm:$0xff]  ;;  %s2867_s30 = smov 16   ;;  %s2868_s6 = smov 24  }
   0xd   : > { %384 = vst.msk [vmem:[#allocation2 + $0x198] sm:$0xff] %vm378_vm0, %v2865_v0  ;;  %385 = vst.msk [vmem:[#allocation2 + $0x1a0] sm:$0xff] %vm378_vm0, %v2865_v0  ;;  %s4457_s19 = smov (!%p2914_p3, %s2654_s19), 1  ;;  %v2980_v2 = vld [vmem:[%s4328_s2] ss:$0 sm:$0xff]  ;;  %s2869_s11 = smov 32  }
   0xe   : > { %382 = vst.msk [vmem:[#allocation2 + $0x10] sm:$0x3] %vm381_vm1, %v2865_v0  ;;  %386 = vst.msk [vmem:[#allocation2 + $0x1a8] sm:$0x3] %vm381_vm1, %v2865_v0  ;;  %s2700_s21 = sshll.u32 %s4457_s19, 8  ;;  %s2870_s16 = smov 40  }
   0xf   : > { %389 = vst.msk [vmem:[#allocation2 + $0x18] sm:$0x1] %vm387_vm2, %v2865_v0  ;;  %390 = vst.msk [vmem:[#allocation2 + $0x30] sm:$0x1] %vm387_vm2, %v2865_v0  ;;  %s2975_s26 = scalar_lea.vmem %s4326_s0, %s2700_s21  ;;  %s2871_s22 = smov 48   ;;  %vm1802_vm3 = vcmask 130048  }
  0x10   : > { %391 = vst.msk [vmem:[#allocation2 + $0x48] sm:$0x1] %vm387_vm2, %v2865_v0  ;;  %392 = vst.msk [vmem:[#allocation2 + $0x60] sm:$0x1] %vm387_vm2, %v2865_v0  ;;  %v238_v3 = vld [vmem:[%s2975_s26 + $0x10] sm:$0xff]  ;;  %v236_v4 = vld [vmem:[%s2975_s26] sm:$0xff] }
  0x11   : > { %393 = vst.msk [vmem:[#allocation2 + $0x78] sm:$0x1] %vm387_vm2, %v2865_v0  ;;  %394 = vst.msk [vmem:[#allocation2 + $0x90] sm:$0x1] %vm387_vm2, %v2865_v0  ;;  %v240_v5 = vld [vmem:[%s2975_s26 + $0x20] sm:$0xff]  ;;  %v277_v6 = vmul.f32 %v2968_v1, %v238_v3  ;;  %v275_v7 = vmul.f32 %v2968_v1, %v236_v4  ;;  %v237_v9 = vld [vmem:[%s2975_s26 + $0x8] sm:$0xff] }
  0x12   : > { %395 = vst.msk [vmem:[#allocation2 + $0xa8] sm:$0x1] %vm387_vm2, %v2865_v0  ;;  %396 = vst.msk [vmem:[#allocation2 + $0xc0] sm:$0x1] %vm387_vm2, %v2865_v0  ;;  %v279_v8 = vmul.f32 %v2968_v1, %v240_v5  ;;  %v242_v10 = vld [vmem:[%s2975_s26 + $0x30] sm:$0xff]  ;;  %v239_v11 = vld [vmem:[%s2975_s26 + $0x18] sm:$0xff]  ;;  %v276_v13 = vmul.f32 %v2968_v1, %v237_v9 }
  0x13   : > { %397 = vst.msk [vmem:[#allocation2 + $0xd8] sm:$0x1] %vm387_vm2, %v2865_v0  ;;  %398 = vst.msk [vmem:[#allocation2 + $0xf0] sm:$0x1] %vm387_vm2, %v2865_v0  ;;  %v489_v12 = vld [vmem:[#allocation2 + $0x1] sm:$0xff]  ;;  %v281_v14 = vmul.f32 %v2968_v1, %v242_v10  ;;  %v278_v15 = vmul.f32 %v2968_v1, %v239_v11  ;;  %v316_v18 = vadd.f32 %v2980_v2, %v277_v6  ;;  %v246_v27 = vld [vmem:[%s2975_s26 + $0x50] sm:$0xff] }
  0x14   : > { %399 = vst.msk [vmem:[#allocation2 + $0x108] sm:$0x1] %vm387_vm2, %v2865_v0  ;;  %400 = vst.msk [vmem:[#allocation2 + $0x120] sm:$0x1] %vm387_vm2, %v2865_v0  ;;  %v244_v16 = vld [vmem:[%s2975_s26 + $0x40] sm:$0xff]  ;;  %778 = vrot.lane.b32.xlu0 %v489_v12, %s2866_s29  ;;  %v314_v19 = vadd.f32 %v2980_v2, %v275_v7  ;;  %v318_v20 = vadd.f32 %v2980_v2, %v279_v8  ;;  %v241_v22 = vld [vmem:[%s2975_s26 + $0x28] sm:$0xff]  ;;  %v315_v23 = vadd.f32 %v2980_v2, %v276_v13 }
  0x15   : > { %401 = vst.msk [vmem:[#allocation2 + $0x138] sm:$0x1] %vm387_vm2, %v2865_v0  ;;  %402 = vst.msk [vmem:[#allocation2 + $0x150] sm:$0x1] %vm387_vm2, %v2865_v0  ;;  %v490_v17 = vld [vmem:[#allocation2 + $0x9] sm:$0xff]  ;;  %v283_v21 = vmul.f32 %v2968_v1, %v244_v16  ;;  %v320_v24 = vadd.f32 %v2980_v2, %v281_v14  ;;  %v317_v25 = vadd.f32 %v2980_v2, %v278_v15  ;;  %v243_v28 = vld [vmem:[%s2975_s26 + $0x38] sm:$0xff] }
  0x16   : > { %403 = vst.msk [vmem:[#allocation2 + $0x168] sm:$0x1] %vm387_vm2, %v2865_v0  ;;  %404 = vst.msk [vmem:[#allocation2 + $0x180] sm:$0x1] %vm387_vm2, %v2865_v0  ;;  %v280_v26 = vmul.f32 %v2968_v1, %v241_v22  ;;  %v248_v29 = vld [vmem:[%s2975_s26 + $0x60] sm:$0xff]  ;;  %v348_v30 = vmax.f32 %v316_v18, 0.0  ;;  %v285_v43 = vmul.f32 %v2968_v1, %v246_v27  ;;  %v282_v44 = vmul.f32 %v2968_v1, %v243_v28 }
  0x17   : > { %407 = vst.msk [vmem:[#allocation2 + $0x29] sm:$0x1] %vm387_vm2, %v2865_v0  ;;  %408 = vst.msk [vmem:[#allocation2 + $0x41] sm:$0x1] %vm387_vm2, %v2865_v0  ;;  %v346_v31 = vmax.f32 %v314_v19, 0.0  ;;  %v350_v32 = vmax.f32 %v318_v20, 0.0  ;;  %v322_v33 = vadd.f32 %v2980_v2, %v283_v21  ;;  %v287_v45 = vmul.f32 %v2968_v1, %v248_v29 }
  0x18   : > { %409 = vst.msk [vmem:[#allocation2 + $0x59] sm:$0x1] %vm387_vm2, %v2865_v0  ;;  %410 = vst.msk [vmem:[#allocation2 + $0x71] sm:$0x1] %vm387_vm2, %v2865_v0  ;;  %v245_v34 = vld [vmem:[%s2975_s26 + $0x48] sm:$0xff]  ;;  %v250_v35 = vld [vmem:[%s2975_s26 + $0x70] sm:$0xff]  ;;  %v319_v40 = vadd.f32 %v2980_v2, %v280_v26  ;;  %780 = vrot.lane.b32.xlu0 %v490_v17, %s2866_s29  ;;  %v324_v51 = vadd.f32 %v2980_v2, %v285_v43  ;;  %v321_v52 = vadd.f32 %v2980_v2, %v282_v44 }
  0x19   : > { %411 = vst.msk [vmem:[#allocation2 + $0x89] sm:$0x1] %vm387_vm2, %v2865_v0  ;;  %412 = vst.msk [vmem:[#allocation2 + $0xa1] sm:$0x1] %vm387_vm2, %v2865_v0  ;;  %v247_v36 = vld [vmem:[%s2975_s26 + $0x58] sm:$0xff]  ;;  %v347_v37 = vmax.f32 %v315_v23, 0.0  ;;  %v284_v48 = vmul.f32 %v2968_v1, %v245_v34  ;;  %v289_v49 = vmul.f32 %v2968_v1, %v250_v35  ;;  %v326_v53 = vadd.f32 %v2980_v2, %v287_v45 }
  0x1a   : > { %413 = vst.msk [vmem:[#allocation2 + $0xb9] sm:$0x1] %vm387_vm2, %v2865_v0  ;;  %414 = vst.msk [vmem:[#allocation2 + $0xd1] sm:$0x1] %vm387_vm2, %v2865_v0  ;;  %v352_v38 = vmax.f32 %v320_v24, 0.0  ;;  %v349_v39 = vmax.f32 %v317_v25, 0.0  ;;  %v286_v50 = vmul.f32 %v2968_v1, %v247_v36 }
  0x1b   : > { %415 = vst.msk [vmem:[#allocation2 + $0xe9] sm:$0x1] %vm387_vm2, %v2865_v0  ;;  %416 = vst.msk [vmem:[#allocation2 + $0x101] sm:$0x1] %vm387_vm2, %v2865_v0  ;;  %v252_v41 = vld [vmem:[%s2975_s26 + $0x80] sm:$0xff]  ;;  %v354_v42 = vmax.f32 %v322_v33, 0.0  ;;  %v323_v55 = vadd.f32 %v2980_v2, %v284_v48  ;;  %v328_v56 = vadd.f32 %v2980_v2, %v289_v49 }
  0x1c   : > { %417 = vst.msk [vmem:[#allocation2 + $0x119] sm:$0x1] %vm387_vm2, %v2865_v0  ;;  %418 = vst.msk [vmem:[#allocation2 + $0x131] sm:$0x1] %vm387_vm2, %v2865_v0  ;;  %v249_v46 = vld [vmem:[%s2975_s26 + $0x68] sm:$0xff]  ;;  %v351_v47 = vmax.f32 %v319_v40, 0.0  ;;  %v291_v54 = vmul.f32 %v2968_v1, %v252_v41  ;;  %v325_v57 = vadd.f32 %v2980_v2, %v286_v50 }
  0x1d   : > { %419 = vst.msk [vmem:[#allocation2 + $0x149] sm:$0x1] %vm387_vm2, %v2865_v0  ;;  %420 = vst.msk [vmem:[#allocation2 + $0x161] sm:$0x1] %vm387_vm2, %v2865_v0  ;;  %v288_v58 = vmul.f32 %v2968_v1, %v249_v46  ;;  %v254_v59 = vld [vmem:[%s2975_s26 + $0x90] sm:$0xff]  ;;  %v251_v60 = vld [vmem:[%s2975_s26 + $0x78] sm:$0xff] }
  0x1e   : > { %421 = vst.msk [vmem:[#allocation2 + $0x179] sm:$0x1] %vm387_vm2, %v2865_v0  ;;  %422 = vst.msk [vmem:[#allocation2 + $0x191] sm:$0x1] %vm387_vm2, %v2865_v0  ;;  %v256_v61 = vld [vmem:[%s2975_s26 + $0xa0] sm:$0xff]  ;;  %v356_v62 = vmax.f32 %v324_v51, 0.0  ;;  %v330_v3 = vadd.f32 %v2980_v2, %v291_v54  ;;  %v293_v12 = vmul.f32 %v2968_v1, %v254_v59  ;;  %v290_v13 = vmul.f32 %v2968_v1, %v251_v60 }
  0x1f   : > { %406 = vst.msk [vmem:[#allocation2 + $0x11] sm:$0x1] %vm387_vm2, %v2865_v0  ;;  %388 = vst.msk [vmem:[#allocation2] sm:$0x1] %vm387_vm2, %v2865_v0  ;;  %v353_v63 = vmax.f32 %v321_v52, 0.0  ;;  %v253_v4 = vld [vmem:[%s2975_s26 + $0x88] sm:$0xff]  ;;  %v327_v10 = vadd.f32 %v2980_v2, %v288_v58  ;;  %v295_v14 = vmul.f32 %v2968_v1, %v256_v61 }
  0x20   : > { %405 = vst.msk [vmem:[#allocation2 + $0x198] sm:$0x1] %vm387_vm2, %v2865_v0  ;;  %423 = vst.msk [vmem:[#allocation2 + $0x1a9] sm:$0x1] %vm387_vm2, %v2865_v0  ;;  %v358_v0 = vmax.f32 %v326_v53, 0.0  ;;  %v258_v5 = vld [vmem:[%s2975_s26 + $0xb0] sm:$0xff]  ;;  %v292_v19 = vmul.f32 %v2968_v1, %v253_v4  ;;  %v332_v23 = vadd.f32 %v2980_v2, %v293_v12  ;;  %v329_v24 = vadd.f32 %v2980_v2, %v290_v13 }
  0x21   : > { %427 = vst.msk [vmem:[#allocation2 + $0x31] sm:$0xff] %vm378_vm0, %v348_v30  ;;  %425 = vst.msk [vmem:[#allocation2 + $0x19] sm:$0xff] %vm378_vm0, %v346_v31  ;;  %v255_v6 = vld [vmem:[%s2975_s26 + $0x98] sm:$0xff]  ;;  %v355_v7 = vmax.f32 %v323_v55, 0.0  ;;  %v360_v8 = vmax.f32 %v328_v56, 0.0  ;;  %v357_v9 = vmax.f32 %v325_v57, 0.0  ;;  %v297_v20 = vmul.f32 %v2968_v1, %v258_v5 }
  0x22   : > { %429 = vst.msk [vmem:[#allocation2 + $0x49] sm:$0xff] %vm378_vm0, %v350_v32  ;;  %426 = vst.msk [vmem:[#allocation2 + $0x21] sm:$0xff] %vm378_vm0, %v347_v37  ;;  %v362_v11 = vmax.f32 %v330_v3, 0.0  ;;  %v260_v15 = vld [vmem:[%s2975_s26 + $0xc0] sm:$0xff]  ;;  %v359_v18 = vmax.f32 %v327_v10, 0.0  ;;  %v294_v21 = vmul.f32 %v2968_v1, %v255_v6  ;;  %v257_v22 = vld [vmem:[%s2975_s26 + $0xa8] sm:$0xff]  ;;  %v334_v25 = vadd.f32 %v2980_v2, %v295_v14 }
  0x23   : > { %431 = vst.msk [vmem:[#allocation2 + $0x61] sm:$0xff] %vm378_vm0, %v352_v38  ;;  %428 = vst.msk [vmem:[#allocation2 + $0x39] sm:$0xff] %vm378_vm0, %v349_v39  ;;  %v262_v26 = vld [vmem:[%s2975_s26 + $0xd0] sm:$0xff]  ;;  %v331_v29 = vadd.f32 %v2980_v2, %v292_v19  ;;  %v336_v30 = vadd.f32 %v2980_v2, %v297_v20  ;;  %v299_v32 = vmul.f32 %v2968_v1, %v260_v15  ;;  %v259_v33 = vld [vmem:[%s2975_s26 + $0xb8] sm:$0xff]  ;;  %v364_v34 = vmax.f32 %v332_v23, 0.0  ;;  %s2873_s7 = smov 56  }
  0x24   : > { %433 = vst.msk [vmem:[#allocation2 + $0x79] sm:$0xff] %vm378_vm0, %v354_v42  ;;  %430 = vst.msk [vmem:[#allocation2 + $0x51] sm:$0xff] %vm378_vm0, %v351_v47  ;;  %v333_v31 = vadd.f32 %v2980_v2, %v294_v21  ;;  %v361_v35 = vmax.f32 %v329_v24, 0.0  ;;  %v366_v36 = vmax.f32 %v334_v25, 0.0  ;;  %v296_v37 = vmul.f32 %v2968_v1, %v257_v22  ;;  %v264_v38 = vld [vmem:[%s2975_s26 + $0xe0] sm:$0xff]  ;;  %v261_v39 = vld [vmem:[%s2975_s26 + $0xc8] sm:$0xff] }
  0x25   : > { %435 = vst.msk [vmem:[#allocation2 + $0x91] sm:$0xff] %vm378_vm0, %v356_v62  ;;  %432 = vst.msk [vmem:[#allocation2 + $0x69] sm:$0xff] %vm378_vm0, %v353_v63  ;;  %v263_v40 = vld [vmem:[%s2975_s26 + $0xd8] sm:$0xff]  ;;  %v363_v41 = vmax.f32 %v331_v29, 0.0  ;;  %v368_v42 = vmax.f32 %v336_v30, 0.0  ;;  %v338_v44 = vadd.f32 %v2980_v2, %v299_v32  ;;  %v265_v45 = vld [vmem:[%s2975_s26 + $0xe8] sm:$0xff]  ;;  %v301_v47 = vmul.f32 %v2968_v1, %v262_v26 }
  0x26   : > { %437 = vst.msk [vmem:[#allocation2 + $0xa9] sm:$0xff] %vm378_vm0, %v358_v0  ;;  %434 = vst.msk [vmem:[#allocation2 + $0x81] sm:$0xff] %vm378_vm0, %v355_v7  ;;  %v365_v43 = vmax.f32 %v333_v31, 0.0  ;;  %v335_v46 = vadd.f32 %v2980_v2, %v296_v37  ;;  %v298_v48 = vmul.f32 %v2968_v1, %v259_v33  ;;  %v303_v52 = vmul.f32 %v2968_v1, %v264_v38  ;;  %v521_v31 = vld [vmem:[#allocation2 + $0x2] sm:$0xff] }
  0x27   : > { %439 = vst.msk [vmem:[#allocation2 + $0xc1] sm:$0xff] %vm378_vm0, %v360_v8  ;;  %436 = vst.msk [vmem:[#allocation2 + $0x99] sm:$0xff] %vm378_vm0, %v357_v9  ;;  %v370_v51 = vmax.f32 %v338_v44, 0.0  ;;  %v300_v53 = vmul.f32 %v2968_v1, %v261_v39  ;;  %v302_v54 = vmul.f32 %v2968_v1, %v263_v40  ;;  %v340_v56 = vadd.f32 %v2980_v2, %v301_v47 }
  0x28   : > { %v3053_v16 = vld [vmem:[#allocation2 + $0x31] sm:$0xff]  ;;  %v3055_v17 = vld [vmem:[#allocation2 + $0x19] sm:$0xff]  ;;  %441 = vst.msk [vmem:[#allocation2 + $0xd9] sm:$0xff] %vm378_vm0, %v362_v11  ;;  %438 = vst.msk [vmem:[#allocation2 + $0xb1] sm:$0xff] %vm378_vm0, %v359_v18  ;;  %v367_v55 = vmax.f32 %v335_v46, 0.0  ;;  %v337_v57 = vadd.f32 %v2980_v2, %v298_v48  ;;  %v304_v58 = vmul.f32 %v2968_v1, %v265_v45  ;;  %v342_v59 = vadd.f32 %v2980_v2, %v303_v52 }
  0x29   : > { %786 = vrot.lane.b32.xlu0 %v3053_v16, %s2866_s29  ;;  %782 = vrot.lane.b32.xlu1 %v3055_v17, %s2866_s29  ;;  %v3073_v27 = vld [vmem:[#allocation2 + $0x49] sm:$0xff]  ;;  %v3075_v28 = vld [vmem:[#allocation2 + $0x21] sm:$0xff]  ;;  %443 = vst.msk [vmem:[#allocation2 + $0xf1] sm:$0xff] %vm378_vm0, %v364_v34  ;;  %440 = vst.msk [vmem:[#allocation2 + $0xc9] sm:$0xff] %vm378_vm0, %v361_v35  ;;  %v339_v60 = vadd.f32 %v2980_v2, %v300_v53  ;;  %v341_v61 = vadd.f32 %v2980_v2, %v302_v54  ;;  %v372_v62 = vmax.f32 %v340_v56, 0.0  ;;  %vm1835_vm4 = vcmask 195584  }
  0x2a   : > { %445 = vst.msk [vmem:[#allocation2 + $0x109] sm:$0xff] %vm378_vm0, %v366_v36  ;;  %v497_v49 = vld [vmem:[#allocation2 + $0x61] sm:$0xff]  ;;  %v3099_v50 = vld [vmem:[#allocation2 + $0x39] sm:$0xff]  ;;  %442 = vst.msk [vmem:[#allocation2 + $0xe1] sm:$0xff] %vm378_vm0, %v363_v41  ;;  %v369_v63 = vmax.f32 %v337_v57, 0.0  ;;  %v343_v0 = vadd.f32 %v2980_v2, %v304_v58  ;;  %v374_v4 = vmax.f32 %v342_v59, 0.0 }
  0x2b   : > { %447 = vst.msk [vmem:[#allocation2 + $0x121] sm:$0xff] %vm378_vm0, %v368_v42  ;;  %444 = vst.msk [vmem:[#allocation2 + $0xf9] sm:$0xff] %vm378_vm0, %v365_v43  ;;  %v499_v1 = vld [vmem:[#allocation2 + $0x79] sm:$0xff]  ;;  %v3119_v3 = vld [vmem:[#allocation2 + $0x51] sm:$0xff]  ;;  %v371_v5 = vmax.f32 %v339_v60, 0.0  ;;  %v373_v6 = vmax.f32 %v341_v61, 0.0 }
  0x2c   : > { %449 = vst.msk [vmem:[#allocation2 + $0x139] sm:$0xff] %vm378_vm0, %v370_v51  ;;  %446 = vst.msk [vmem:[#allocation2 + $0x111] sm:$0xff] %vm378_vm0, %v367_v55  ;;  %v375_v7 = vmax.f32 %v343_v0, 0.0  ;;  %v501_v2 = vld [vmem:[#allocation2 + $0x91] sm:$0xff]  ;;  %v3130_v8 = vld [vmem:[#allocation2 + $0x69] sm:$0xff]  ;;  %vm1868_vm5 = vcmask 261120  }
  0x2d   : > { %790 = vrot.lane.b32.xlu0 %v3073_v27, %s2866_s29  ;;  %784 = vrot.lane.b32.xlu1 %v3075_v28, %s2866_s29  ;;  %451 = vst.msk [vmem:[#allocation2 + $0x151] sm:$0xff] %vm378_vm0, %v372_v62  ;;  %448 = vst.msk [vmem:[#allocation2 + $0x129] sm:$0xff] %vm378_vm0, %v369_v63  ;;  %v503_v9 = vld [vmem:[#allocation2 + $0xa9] sm:$0xff]  ;;  %v500_v10 = vld [vmem:[#allocation2 + $0x81] sm:$0xff]  ;;  %vm1901_vm6 = vcmask 326656   ;;  %vm1967_vm7 = vcmask 457728  }
  0x2e   : > { %453 = vst.msk [vmem:[#allocation2 + $0x169] sm:$0xff] %vm378_vm0, %v374_v4  ;;  %450 = vst.msk [vmem:[#allocation2 + $0x141] sm:$0xff] %vm378_vm0, %v371_v5  ;;  %v505_v11 = vld [vmem:[#allocation2 + $0xc1] sm:$0xff]  ;;  %v502_v12 = vld [vmem:[#allocation2 + $0x99] sm:$0xff]  ;;  %vm1934_vm8 = vcmask 392192   ;;  %vm2000_vm9 = vcmask 523264  }
  0x2f   : > { %452 = vst.msk [vmem:[#allocation2 + $0x159] sm:$0xff] %vm378_vm0, %v373_v6  ;;  %454 = vst.msk [vmem:[#allocation2 + $0x171] sm:$0xff] %vm378_vm0, %v375_v7  ;;  %v507_v13 = vld [vmem:[#allocation2 + $0xd9] sm:$0xff]  ;;  %v504_v14 = vld [vmem:[#allocation2 + $0xb1] sm:$0xff]  ;;  %vm2042_vm10 = vcmask 588800  }
  0x30   : > { %v509_v15 = vld [vmem:[#allocation2 + $0xf1] sm:$0xff]  ;;  %v506_v18 = vld [vmem:[#allocation2 + $0xc9] sm:$0xff]  ;;  %v3155_v33 = vld [vmem:[#allocation2 + $0x1a] sm:$0xff] }
  0x31   : > { %794 = vrot.lane.b32.xlu0 %v497_v49, %s2866_s29  ;;  %788 = vrot.lane.b32.xlu1 %v3099_v50, %s2866_s29  ;;  %v511_v19 = vld [vmem:[#allocation2 + $0x109] sm:$0xff]  ;;  %v508_v20 = vld [vmem:[#allocation2 + $0xe1] sm:$0xff]  ;;  %v3160_v35 = vld [vmem:[#allocation2 + $0x32] sm:$0xff] }
  0x32   : > { %v513_v21 = vld [vmem:[#allocation2 + $0x121] sm:$0xff]  ;;  %v510_v22 = vld [vmem:[#allocation2 + $0xf9] sm:$0xff]  ;;  %v522_v36 = vld [vmem:[#allocation2 + $0xa] sm:$0xff] }
  0x33   : > { %v515_v23 = vld [vmem:[#allocation2 + $0x139] sm:$0xff]  ;;  %v512_v24 = vld [vmem:[#allocation2 + $0x111] sm:$0xff]  ;;  %v3167_v38 = vld [vmem:[#allocation2 + $0x22] sm:$0xff] }
  0x34   : > { %v517_v25 = vld [vmem:[#allocation2 + $0x151] sm:$0xff]  ;;  %v514_v26 = vld [vmem:[#allocation2 + $0x129] sm:$0xff]  ;;  %v3175_v40 = vld [vmem:[#allocation2 + $0x3a] sm:$0xff] }
  0x35   : > { %798 = vrot.lane.b32.xlu0 %v499_v1, %s2866_s29  ;;  %792 = vrot.lane.b32.xlu1 %v3119_v3, %s2866_s29  ;;  %v519_v29 = vld [vmem:[#allocation2 + $0x169] sm:$0xff]  ;;  %v516_v30 = vld [vmem:[#allocation2 + $0x141] sm:$0xff]  ;;  %v3183_v42 = vld [vmem:[#allocation2 + $0x52] sm:$0xff] }
  0x36   : > { %v518_v32 = vld [vmem:[#allocation2 + $0x159] sm:$0xff]  ;;  %v520_v34 = vld [vmem:[#allocation2 + $0x171] sm:$0xff]  ;;  %v3173_v39 = vld [vmem:[#allocation2 + $0x62] sm:$0xff] }
  0x37   : > { %v3165_v37 = vld [vmem:[#allocation2 + $0x4a] sm:$0xff]  ;;  %v3181_v41 = vld [vmem:[#allocation2 + $0x7a] sm:$0xff]  ;;  %v3189_v43 = vld [vmem:[#allocation2 + $0x92] sm:$0xff] }
  0x38   : > { %v3191_v44 = vld [vmem:[#allocation2 + $0x6a] sm:$0xff]  ;;  %v3199_v46 = vld [vmem:[#allocation2 + $0x82] sm:$0xff]  ;;  %v3207_v48 = vld [vmem:[#allocation2 + $0x9a] sm:$0xff] }
  0x39   : > { %802 = vrot.lane.b32.xlu0 %v501_v2, %s2866_s29  ;;  %796 = vrot.lane.b32.xlu1 %v3130_v8, %s2866_s29  ;;  %v3197_v45 = vld [vmem:[#allocation2 + $0xaa] sm:$0xff]  ;;  %v3205_v47 = vld [vmem:[#allocation2 + $0xc2] sm:$0xff]  ;;  %v539_v49 = vld [vmem:[#allocation2 + $0xda] sm:$0xff] }
  0x3a   : > { %v3213_v51 = vld [vmem:[#allocation2 + $0xb2] sm:$0xff]  ;;  %v3218_v53 = vld [vmem:[#allocation2 + $0xca] sm:$0xff]  ;;  %v540_v55 = vld [vmem:[#allocation2 + $0xe2] sm:$0xff] }
  0x3b   : > { %v541_v52 = vld [vmem:[#allocation2 + $0xf2] sm:$0xff]  ;;  %v543_v54 = vld [vmem:[#allocation2 + $0x10a] sm:$0xff]  ;;  %v545_v56 = vld [vmem:[#allocation2 + $0x122] sm:$0xff] }
  0x3c   : > { %v542_v57 = vld [vmem:[#allocation2 + $0xfa] sm:$0xff]  ;;  %v544_v60 = vld [vmem:[#allocation2 + $0x112] sm:$0xff]  ;;  %v546_v63 = vld [vmem:[#allocation2 + $0x12a] sm:$0xff] }
  0x3d   : > { %806 = vrot.lane.b32.xlu0 %v503_v9, %s2866_s29  ;;  %800 = vrot.lane.b32.xlu1 %v500_v10, %s2866_s29  ;;  %v547_v59 = vld [vmem:[#allocation2 + $0x13a] sm:$0xff]  ;;  %v549_v62 = vld [vmem:[#allocation2 + $0x152] sm:$0xff]  ;;  %v551_v0 = vld [vmem:[#allocation2 + $0x16a] sm:$0xff] }
  0x3e   : > { %v548_v1 = vld [vmem:[#allocation2 + $0x142] sm:$0xff]  ;;  %v550_v6 = vld [vmem:[#allocation2 + $0x15a] sm:$0xff]  ;;  %v552_v10 = vld [vmem:[#allocation2 + $0x172] sm:$0xff] }
  0x3f   : > { %v3245_v9 = vld [vmem:[#allocation2 + $0x18] sm:$0xff] }
  0x41   : > { %810 = vrot.lane.b32.xlu0 %v505_v11, %s2866_s29  ;;  %804 = vrot.lane.b32.xlu1 %v502_v12, %s2866_s29 }
  0x45   : > { %814 = vrot.lane.b32.xlu0 %v507_v13, %s2866_s29  ;;  %808 = vrot.lane.b32.xlu1 %v504_v14, %s2866_s29  ;;  %v3254_v13 = vld [vmem:[#allocation2 + $0x30] sm:$0xff] }
  0x49   : > { %818 = vrot.lane.b32.xlu0 %v509_v15, %s2866_s29  ;;  %812 = vrot.lane.b32.xlu1 %v506_v18, %s2866_s29  ;;  %v3263_v18 = vld [vmem:[#allocation2 + $0x48] sm:$0xff] }
  0x4d   : > { %822 = vrot.lane.b32.xlu0 %v511_v19, %s2866_s29  ;;  %816 = vrot.lane.b32.xlu1 %v508_v20, %s2866_s29  ;;  %v3265_v19 = vld [vmem:[#allocation2 + $0x20] sm:$0xff] }
  0x51   : > { %826 = vrot.lane.b32.xlu0 %v513_v21, %s2866_s29  ;;  %820 = vrot.lane.b32.xlu1 %v510_v22, %s2866_s29  ;;  %v3275_v22 = vld [vmem:[#allocation2 + $0x60] sm:$0xff] }
  0x55   : > { %830 = vrot.lane.b32.xlu0 %v515_v23, %s2866_s29  ;;  %824 = vrot.lane.b32.xlu1 %v512_v24, %s2866_s29  ;;  %v3277_v23 = vld [vmem:[#allocation2 + $0x38] sm:$0xff] }
  0x59   : > { %834 = vrot.lane.b32.xlu0 %v517_v25, %s2866_s29  ;;  %828 = vrot.lane.b32.xlu1 %v514_v26, %s2866_s29  ;;  %v3287_v26 = vld [vmem:[#allocation2 + $0x78] sm:$0xff] }
  0x5d   : > { %838 = vrot.lane.b32.xlu0 %v519_v29, %s2866_s29  ;;  %832 = vrot.lane.b32.xlu1 %v516_v30, %s2866_s29  ;;  %v3289_v29 = vld [vmem:[#allocation2 + $0x50] sm:$0xff] }
  0x61   : > { %906 = vrot.lane.b32.xlu0 %v521_v31, %s2867_s30  ;;  %836 = vrot.lane.b32.xlu1 %v518_v32, %s2866_s29  ;;  %v3299_v32 = vld [vmem:[#allocation2 + $0x90] sm:$0xff] }
  0x62   : > { %4342 = vst [vmem:[#allocation9_spill] sm:$0xff] %v3299_v32 }
  0x65   : > { %910 = vrot.lane.b32.xlu0 %v3155_v33, %s2867_s30  ;;  %840 = vrot.lane.b32.xlu1 %v520_v34, %s2866_s29  ;;  %v3301_v34 = vld [vmem:[#allocation2 + $0x68] sm:$0xff] }
  0x69   : > { %914 = vrot.lane.b32.xlu0 %v3160_v35, %s2867_s30  ;;  %908 = vrot.lane.b32.xlu1 %v522_v36, %s2867_s30 }
  0x6d   : > { %918 = vrot.lane.b32.xlu0 %v3165_v37, %s2867_s30  ;;  %912 = vrot.lane.b32.xlu1 %v3167_v38, %s2867_s30 }
  0x71   : > { %922 = vrot.lane.b32.xlu0 %v3173_v39, %s2867_s30  ;;  %916 = vrot.lane.b32.xlu1 %v3175_v40, %s2867_s30 }
  0x75   : > { %926 = vrot.lane.b32.xlu0 %v3181_v41, %s2867_s30  ;;  %920 = vrot.lane.b32.xlu1 %v3183_v42, %s2867_s30 }
  0x79   : > { %930 = vrot.lane.b32.xlu0 %v3189_v43, %s2867_s30  ;;  %924 = vrot.lane.b32.xlu1 %v3191_v44, %s2867_s30 }
  0x7d   : > { %934 = vrot.lane.b32.xlu0 %v3197_v45, %s2867_s30  ;;  %928 = vrot.lane.b32.xlu1 %v3199_v46, %s2867_s30 }
  0x81   : > { %938 = vrot.lane.b32.xlu0 %v3205_v47, %s2867_s30  ;;  %932 = vrot.lane.b32.xlu1 %v3207_v48, %s2867_s30 }
  0x85   : > { %942 = vrot.lane.b32.xlu0 %v539_v49, %s2867_s30  ;;  %936 = vrot.lane.b32.xlu1 %v3213_v51, %s2867_s30 }
  0x86   : > { %v3225_v58 = vpop.permute.xlu0 %778 }
  0x89   : > { %946 = vrot.lane.b32.xlu0 %v541_v52, %s2867_s30  ;;  %940 = vrot.lane.b32.xlu1 %v3218_v53, %s2867_s30  ;;  %v3311_v52 = vld [vmem:[#allocation2 + $0xa8] sm:$0xff] }
  0x8a   : > { %v3231_v61 = vpop.permute.xlu0 %780 }
  0x8d   : > { %950 = vrot.lane.b32.xlu0 %v543_v54, %s2867_s30  ;;  %944 = vrot.lane.b32.xlu1 %v540_v55, %s2867_s30  ;;  %v3313_v54 = vld [vmem:[#allocation2 + $0x80] sm:$0xff] }
  0x8e   : > { %4345 = vst [vmem:[#allocation12_spill] sm:$0xff] %v3313_v54 }
  0x91   : > { %954 = vrot.lane.b32.xlu0 %v545_v56, %s2867_s30  ;;  %948 = vrot.lane.b32.xlu1 %v542_v57, %s2867_s30  ;;  %v3323_v57 = vld [vmem:[#allocation2 + $0xc0] sm:$0xff] }
  0x95   : > { %958 = vrot.lane.b32.xlu0 %v547_v59, %s2867_s30  ;;  %952 = vrot.lane.b32.xlu1 %v544_v60, %s2867_s30  ;;  %v3325_v59 = vld [vmem:[#allocation2 + $0x98] sm:$0xff] }
  0x96   : > { %4348 = vst [vmem:[#allocation15_spill] sm:$0xff] %v3325_v59 }
  0x99   : > { %962 = vrot.lane.b32.xlu0 %v549_v62, %s2867_s30  ;;  %956 = vrot.lane.b32.xlu1 %v546_v63, %s2867_s30  ;;  %v3335_v63 = vld [vmem:[#allocation2 + $0xd8] sm:$0xff] }
  0x9b   : > { %v3235_v4 = vpop.permute.xlu0 %786  ;;  %v3237_v5 = vpop.permute.xlu1 %782 }
  0x9d   : > { %966 = vrot.lane.b32.xlu0 %v551_v0, %s2867_s30  ;;  %960 = vrot.lane.b32.xlu1 %v548_v1, %s2867_s30  ;;  %v3337_v0 = vld [vmem:[#allocation2 + $0xb0] sm:$0xff] }
  0x9f   : > { %v3241_v7 = vpop.permute.xlu0 %790  ;;  %v3243_v2 = vpop.permute.xlu1 %784 }
  0xa1   : > { %1034 = vrot.lane.b32.xlu0 %v3245_v9, %s2868_s6  ;;  %964 = vrot.lane.b32.xlu1 %v550_v6, %s2867_s30 }
  0xa3   : > { %v3250_v11 = vpop.permute.xlu0 %794  ;;  %v3252_v12 = vpop.permute.xlu1 %788 }
  0xa5   : > { %1038 = vrot.lane.b32.xlu0 %v3254_v13, %s2868_s6  ;;  %968 = vrot.lane.b32.xlu1 %v552_v10, %s2867_s30  ;;  %v3347_v10 = vld [vmem:[#allocation2 + $0xf0] sm:$0xff]  ;;  %s2872_s30 = smov 64  }
  0xa7   : > { %v3259_v14 = vpop.permute.xlu0 %798  ;;  %v3261_v15 = vpop.permute.xlu1 %792 }
  0xa8   : > { %4336 = vst [vmem:[#allocation3_spill] sm:$0xff] %v3259_v14 }
  0xa9   : > { %1042 = vrot.lane.b32.xlu0 %v3263_v18, %s2868_s6  ;;  %1036 = vrot.lane.b32.xlu1 %v3265_v19, %s2868_s6 }
  0xab   : > { %v3271_v20 = vpop.permute.xlu0 %802  ;;  %v3273_v21 = vpop.permute.xlu1 %796 }
  0xac   : > { %4337 = vst [vmem:[#allocation4_spill] sm:$0xff] %v3271_v20 }
  0xad   : > { %1046 = vrot.lane.b32.xlu0 %v3275_v22, %s2868_s6  ;;  %1040 = vrot.lane.b32.xlu1 %v3277_v23, %s2868_s6 }
  0xaf   : > { %v3283_v24 = vpop.permute.xlu0 %806  ;;  %v3285_v25 = vpop.permute.xlu1 %800 }
  0xb0   : > { %4338 = vst [vmem:[#allocation5_spill] sm:$0xff] %v3283_v24  ;;  %4339 = vst [vmem:[#allocation6_spill] sm:$0xff] %v3285_v25  ;;  %v2040_v24 = vld [vmem:[%s4329_s3 + $0x38] sm:$0xff] }
  0xb1   : > { %1050 = vrot.lane.b32.xlu0 %v3287_v26, %s2868_s6  ;;  %1044 = vrot.lane.b32.xlu1 %v3289_v29, %s2868_s6 }
  0xb3   : > { %v3295_v30 = vpop.permute.xlu0 %810  ;;  %v3297_v31 = vpop.permute.xlu1 %804 }
  0xb4   : > { %4340 = vst [vmem:[#allocation7_spill] sm:$0xff] %v3295_v30  ;;  %4341 = vst [vmem:[#allocation8_spill] sm:$0xff] %v3297_v31  ;;  %v3371_v30 = vld [vmem:[#allocation2 + $0x120] sm:$0xff] }
  0xb5   : > { %1054 = vrot.lane.b32.xlu0 %v3299_v32, %s2868_s6  ;;  %1048 = vrot.lane.b32.xlu1 %v3301_v34, %s2868_s6 }
  0xb7   : > { %v3307_v36 = vpop.permute.xlu0 %814  ;;  %v3309_v49 = vpop.permute.xlu1 %808 }
  0xb8   : > { %4343 = vst [vmem:[#allocation10_spill] sm:$0xff] %v3307_v36  ;;  %4344 = vst [vmem:[#allocation11_spill] sm:$0xff] %v3309_v49  ;;  %v3359_v36 = vld [vmem:[#allocation2 + $0x108] sm:$0xff]  ;;  %v3373_v49 = vld [vmem:[#allocation2 + $0xf8] sm:$0xff] }
  0xb9   : > { %1058 = vrot.lane.b32.xlu0 %v3311_v52, %s2868_s6  ;;  %1052 = vrot.lane.b32.xlu1 %v3313_v54, %s2868_s6 }
  0xbb   : > { %v3319_v55 = vpop.permute.xlu0 %818  ;;  %v3321_v56 = vpop.permute.xlu1 %812 }
  0xbc   : > { %4346 = vst [vmem:[#allocation13_spill] sm:$0xff] %v3319_v55  ;;  %4347 = vst [vmem:[#allocation14_spill] sm:$0xff] %v3321_v56  ;;  %v3349_v55 = vld [vmem:[#allocation2 + $0xc8] sm:$0xff]  ;;  %v3361_v56 = vld [vmem:[#allocation2 + $0xe0] sm:$0xff] }
  0xbd   : > { %1062 = vrot.lane.b32.xlu0 %v3323_v57, %s2868_s6  ;;  %1056 = vrot.lane.b32.xlu1 %v3325_v59, %s2868_s6 }
  0xbf   : > { %v3331_v60 = vpop.permute.xlu0 %822  ;;  %v3333_v62 = vpop.permute.xlu1 %816 }
  0xc0   : > { %4349 = vst [vmem:[#allocation16_spill] sm:$0xff] %v3331_v60  ;;  %4350 = vst [vmem:[#allocation17_spill] sm:$0xff] %v3333_v62 }
  0xc1   : > { %1066 = vrot.lane.b32.xlu0 %v3335_v63, %s2868_s6  ;;  %1060 = vrot.lane.b32.xlu1 %v3337_v0, %s2868_s6 }
  0xc3   : > { %v3343_v1 = vpop.permute.xlu0 %826  ;;  %v3345_v6 = vpop.permute.xlu1 %820 }
  0xc4   : > { %4351 = vst [vmem:[#allocation18_spill] sm:$0xff] %v3343_v1  ;;  %4352 = vst [vmem:[#allocation19_spill] sm:$0xff] %v3345_v6 }
  0xc5   : > { %1070 = vrot.lane.b32.xlu0 %v3347_v10, %s2868_s6  ;;  %1064 = vrot.lane.b32.xlu1 %v3349_v55, %s2868_s6 }
  0xc7   : > { %v3355_v60 = vpop.permute.xlu0 %830  ;;  %v3357_v62 = vpop.permute.xlu1 %824 }
  0xc8   : > { %4353 = vst [vmem:[#allocation20_spill] sm:$0xff] %v3355_v60  ;;  %4354 = vst [vmem:[#allocation21_spill] sm:$0xff] %v3357_v62  ;;  %v2041_v60 = vld [vmem:[%s4329_s3 + $0x40] sm:$0xff] }
  0xc9   : > { %1074 = vrot.lane.b32.xlu0 %v3359_v36, %s2868_s6  ;;  %1068 = vrot.lane.b32.xlu1 %v3361_v56, %s2868_s6 }
  0xca   : > { %2743 = vmatprep.subr.mxu0 %v2041_v60  ;;  %2809 = vmatprep.subr.mxu1 %v2041_v60 }
  0xcb   : > { %v3367_v1 = vpop.permute.xlu0 %834  ;;  %v3369_v6 = vpop.permute.xlu1 %828  ;;  %2744 = vmatpush3.msra.mxu0 %v2041_v60  ;;  %2818 = vmatpush3.msra.mxu1 %v2041_v60 }
  0xcc   : > { %4355 = vst [vmem:[#allocation22_spill] sm:$0xff] %v3367_v1  ;;  %4356 = vst [vmem:[#allocation23_spill] sm:$0xff] %v3369_v6  ;;  %v3386_v6 = vld [vmem:[#allocation2 + $0x110] sm:$0xff]  ;;  %2745 = vmatprep.subr.mxu0 %v2040_v24  ;;  %2810 = vmatprep.subr.mxu1 %v2040_v24 }
  0xcd   : > { %1078 = vrot.lane.b32.xlu0 %v3371_v30, %s2868_s6  ;;  %1072 = vrot.lane.b32.xlu1 %v3373_v49, %s2868_s6 }
  0xce   : > { %2746 = vmatpush3.msra.mxu0 %v2040_v24  ;;  %2819 = vmatpush3.msra.mxu1 %v2040_v24  ;;  %v2037_v24 = vld [vmem:[%s4329_s3 + $0x20] sm:$0xff] }
  0xcf   : > { %v3382_v62 = vpop.permute.xlu0 %838  ;;  %v3384_v1 = vpop.permute.xlu1 %832 }
  0xd0   : > { %4357 = vst [vmem:[#allocation24_spill] sm:$0xff] %v3382_v62  ;;  %4358 = vst [vmem:[#allocation25_spill] sm:$0xff] %v3384_v1  ;;  %v2039_v62 = vld [vmem:[%s4329_s3 + $0x30] sm:$0xff] }
  0xd1   : > { %1164 = vrot.lane.b32.xlu0 %v3075_v28, %s2869_s11  ;;  %1076 = vrot.lane.b32.xlu1 %v3386_v6, %s2868_s6  ;;  %v2038_v28 = vld [vmem:[%s4329_s3 + $0x28] sm:$0xff] }
  0xd2   : > { %2747 = vmatprep.subr.mxu0 %v2039_v62  ;;  %2811 = vmatprep.subr.mxu1 %v2039_v62 }
  0xd3   : > { %v3398_v60 = vpop.permute.xlu0 %906  ;;  %v3400_v1 = vpop.permute.xlu1 %836  ;;  %2748 = vmatpush3.msra.mxu0 %v2039_v62  ;;  %2820 = vmatpush3.msra.mxu1 %v2039_v62 }
  0xd4   : > { %4359 = vst [vmem:[#allocation26_spill] sm:$0xff] %v3400_v1  ;;  %2749 = vmatprep.subr.mxu0 %v2038_v28  ;;  %2812 = vmatprep.subr.mxu1 %v2038_v28 }
  0xd5   : > { %1292 = vrot.lane.b32.xlu0 %v3167_v38, %s2870_s16  ;;  %1162 = vrot.lane.b32.xlu1 %v3055_v17, %s2869_s11  ;;  %v2036_v17 = vld [vmem:[%s4329_s3 + $0x18] sm:$0xff] }
  0xd6   : > { %2750 = vmatpush3.msra.mxu0 %v2038_v28  ;;  %2821 = vmatpush3.msra.mxu1 %v2038_v28  ;;  %v2035_v28 = vld [vmem:[%s4329_s3 + $0x10] sm:$0xff] }
  0xd7   : > { %v3409_v31 = vpop.permute.xlu0 %910  ;;  %v3411_v1 = vpop.permute.xlu1 %840  ;;  %2751 = vmatprep.subr.mxu0 %v2037_v24  ;;  %2813 = vmatprep.subr.mxu1 %v2037_v24 }
  0xd8   : > { %4360 = vst [vmem:[#allocation27_spill] sm:$0xff] %v3411_v1  ;;  %2752 = vmatpush3.msra.mxu0 %v2037_v24  ;;  %2822 = vmatpush3.msra.mxu1 %v2037_v24  ;;  %v2034_v24 = vld [vmem:[%s4329_s3 + $0x8] sm:$0xff] }
  0xd9   : > { %1420 = vrot.lane.b32.xlu0 %v3277_v23, %s2871_s22  ;;  %1290 = vrot.lane.b32.xlu1 %v3155_v33, %s2870_s16 }
  0xda   : > { %2753 = vmatprep.subr.mxu0 %v2036_v17  ;;  %2814 = vmatprep.subr.mxu1 %v2036_v17 }
  0xdb   : > { %v3423_v38 = vpop.permute.xlu0 %914  ;;  %v3425_v62 = vpop.permute.xlu1 %908  ;;  %2754 = vmatpush3.msra.mxu0 %v2036_v17  ;;  %2823 = vmatpush3.msra.mxu1 %v2036_v17  ;;  %v2033_v17 = vld [vmem:[%s4329_s3] sm:$0xff] }
  0xdc   : > { %2755 = vmatprep.subr.mxu0 %v2035_v28  ;;  %2815 = vmatprep.subr.mxu1 %v2035_v28 }
  0xdd   : > { %1166 = vrot.lane.b32.xlu0 %v3053_v16, %s2869_s11  ;;  %1418 = vrot.lane.b32.xlu1 %v3254_v13, %s2871_s22 }
  0xde   : > { %2756 = vmatpush3.msra.mxu0 %v2035_v28  ;;  %2824 = vmatpush3.msra.mxu1 %v2035_v28 }
  0xdf   : > { %v3434_v33 = vpop.permute.xlu0 %918  ;;  %v3436_v1 = vpop.permute.xlu1 %912  ;;  %2757 = vmatprep.subr.mxu0 %v2034_v24  ;;  %2816 = vmatprep.subr.mxu1 %v2034_v24 }
  0xe0   : > { %2758 = vmatpush3.msra.mxu0 %v2034_v24  ;;  %2825 = vmatpush3.msra.mxu1 %v2034_v24 }
  0xe1   : > { %1674 = vrot.lane.b32.xlu0 %v3160_v35, %s2872_s30  ;;  %1546 = vrot.lane.b32.xlu1 %v3053_v16, %s2873_s7 }
  0xe2   : > { %2759 = vmatprep.subr.mxu0 %v2033_v17  ;;  %2817 = vmatprep.subr.mxu1 %v2033_v17 }
  0xe3   : > { %v3448_v20 = vpop.permute.xlu0 %922  ;;  %v3450_v25 = vpop.permute.xlu1 %916  ;;  %2760 = vmatpush3.msra.mxu0 %v2033_v17  ;;  %2826 = vmatpush3.msra.mxu1 %v2033_v17 }
  0xe5   : > { %1294 = vrot.lane.b32.xlu0 %v3160_v35, %s2870_s16  ;;  %1548 = vrot.lane.b32.xlu1 %v3099_v50, %s2873_s7 }
  0xe7   : > { %v3456_v16 = vpop.permute.xlu0 %926  ;;  %v3458_v28 = vpop.permute.xlu1 %920 }
  0xe8   : > { %4361 = vst [vmem:[#allocation28_spill] sm:$0xff] %v3456_v16 }
  0xe9   : > { %1296 = vrot.lane.b32.xlu0 %v3175_v40, %s2870_s16  ;;  %1168 = vrot.lane.b32.xlu1 %v3099_v50, %s2869_s11 }
  0xeb   : > { %v3464_v24 = vpop.permute.xlu0 %930  ;;  %v3466_v14 = vpop.permute.xlu1 %924 }
  0xec   : > { %4362 = vst [vmem:[#allocation29_spill] sm:$0xff] %v3464_v24 }
  0xed   : > { %1424 = vrot.lane.b32.xlu0 %v3289_v29, %s2871_s22  ;;  %1676 = vrot.lane.b32.xlu1 %v3175_v40, %s2872_s30 }
  0xef   : > { %v3472_v35 = vpop.permute.xlu0 %934  ;;  %v3474_v17 = vpop.permute.xlu1 %928 }
  0xf0   : > { %4363 = vst [vmem:[#allocation30_spill] sm:$0xff] %v3472_v35  ;;  %4364 = vst [vmem:[#allocation31_spill] sm:$0xff] %v3474_v17 }
  0xf1   : > { %1170 = vrot.lane.b32.xlu0 %v3073_v27, %s2869_s11  ;;  %1422 = vrot.lane.b32.xlu1 %v3263_v18, %s2871_s22 }
  0xf3   : > { %v3480_v50 = vpop.permute.xlu0 %938  ;;  %v3482_v24 = vpop.permute.xlu1 %932 }
  0xf4   : > { %4365 = vst [vmem:[#allocation32_spill] sm:$0xff] %v3480_v50  ;;  %4366 = vst [vmem:[#allocation33_spill] sm:$0xff] %v3482_v24 }
  0xf5   : > { %1678 = vrot.lane.b32.xlu0 %v3165_v37, %s2872_s30  ;;  %1550 = vrot.lane.b32.xlu1 %v3073_v27, %s2873_s7 }
  0xf7   : > { %v3488_v40 = vpop.permute.xlu0 %942  ;;  %v3490_v35 = vpop.permute.xlu1 %936 }
  0xf8   : > { %4367 = vst [vmem:[#allocation34_spill] sm:$0xff] %v3488_v40  ;;  %4368 = vst [vmem:[#allocation35_spill] sm:$0xff] %v3490_v35 }
  0xf9   : > { %1298 = vrot.lane.b32.xlu0 %v3165_v37, %s2870_s16  ;;  %1552 = vrot.lane.b32.xlu1 %v3119_v3, %s2873_s7  ;;  %v591_v37 = vld [vmem:[#allocation2 + $0x61] sm:$0xff] }
  0xfb   : > { %v3496_v17 = vpop.permute.xlu0 %946  ;;  %v3498_v50 = vpop.permute.xlu1 %940 }
  0xfc   : > { %4369 = vst [vmem:[#allocation36_spill] sm:$0xff] %v3496_v17  ;;  %4370 = vst [vmem:[#allocation37_spill] sm:$0xff] %v3498_v50 }
  0xfd   : > { %1300 = vrot.lane.b32.xlu0 %v3183_v42, %s2870_s16  ;;  %1172 = vrot.lane.b32.xlu1 %v3119_v3, %s2869_s11 }
  0xff   : > { %v3504_v27 = vpop.permute.xlu0 %950  ;;  %v3506_v40 = vpop.permute.xlu1 %944 }
 0x100   : > { %4371 = vst [vmem:[#allocation38_spill] sm:$0xff] %v3504_v27  ;;  %4372 = vst [vmem:[#allocation39_spill] sm:$0xff] %v3506_v40 }
 0x101   : > { %1428 = vrot.lane.b32.xlu0 %v3301_v34, %s2871_s22  ;;  %1680 = vrot.lane.b32.xlu1 %v3183_v42, %s2872_s30 }
 0x103   : > { %v3512_v17 = vpop.permute.xlu0 %954  ;;  %v3514_v50 = vpop.permute.xlu1 %948 }
 0x104   : > { %4373 = vst [vmem:[#allocation40_spill] sm:$0xff] %v3512_v17  ;;  %4374 = vst [vmem:[#allocation41_spill] sm:$0xff] %v3514_v50  ;;  %v592_v17 = vld [vmem:[#allocation2 + $0x69] sm:$0xff] }
 0x105   : > { %1174 = vrot.lane.b32.xlu0 %v591_v37, %s2869_s11  ;;  %1426 = vrot.lane.b32.xlu1 %v3275_v22, %s2871_s22 }
 0x107   : > { %v3519_v3 = vpop.permute.xlu0 %958  ;;  %v3521_v27 = vpop.permute.xlu1 %952 }
 0x108   : > { %4375 = vst [vmem:[#allocation42_spill] sm:$0xff] %v3519_v3  ;;  %4376 = vst [vmem:[#allocation43_spill] sm:$0xff] %v3521_v27 }
 0x109   : > { %1682 = vrot.lane.b32.xlu0 %v3173_v39, %s2872_s30  ;;  %1554 = vrot.lane.b32.xlu1 %v591_v37, %s2873_s7 }
 0x10b   : > { %v3526_v42 = vpop.permute.xlu0 %962  ;;  %v3528_v40 = vpop.permute.xlu1 %956 }
 0x10c   : > { %4377 = vst [vmem:[#allocation44_spill] sm:$0xff] %v3526_v42  ;;  %4378 = vst [vmem:[#allocation45_spill] sm:$0xff] %v3528_v40 }
 0x10d   : > { %1302 = vrot.lane.b32.xlu0 %v3173_v39, %s2870_s16  ;;  %1556 = vrot.lane.b32.xlu1 %v3130_v8, %s2873_s7  ;;  %v593_v8 = vld [vmem:[#allocation2 + $0x79] sm:$0xff] }
 0x10f   : > { %v3534_v50 = vpop.permute.xlu0 %966  ;;  %v3536_v3 = vpop.permute.xlu1 %960 }
 0x110   : > { %4379 = vst [vmem:[#allocation46_spill] sm:$0xff] %v3534_v50  ;;  %4380 = vst [vmem:[#allocation47_spill] sm:$0xff] %v3536_v3 }
 0x111   : > { %1304 = vrot.lane.b32.xlu0 %v3191_v44, %s2870_s16  ;;  %1176 = vrot.lane.b32.xlu1 %v592_v17, %s2869_s11 }
 0x113   : > { %v3541_v37 = vpop.permute.xlu0 %1034  ;;  %v3543_v42 = vpop.permute.xlu1 %964 }
 0x114   : > { %4381 = vst [vmem:[#allocation48_spill] sm:$0xff] %v3543_v42 }
 0x115   : > { %1432 = vrot.lane.b32.xlu0 %v3313_v54, %s2871_s22  ;;  %1684 = vrot.lane.b32.xlu1 %v3191_v44, %s2872_s30  ;;  %v689_v44 = vld [vmem:[#allocation2 + $0x81] sm:$0xff] }
 0x117   : > { %v3549_v39 = vpop.permute.xlu0 %1038  ;;  %v3551_v50 = vpop.permute.xlu1 %968 }
 0x118   : > { %4382 = vst [vmem:[#allocation49_spill] sm:$0xff] %v3551_v50 }
 0x119   : > { %1178 = vrot.lane.b32.xlu0 %v593_v8, %s2869_s11  ;;  %1430 = vrot.lane.b32.xlu1 %v3287_v26, %s2871_s22 }
 0x11b   : > { %v3556_v17 = vpop.permute.xlu0 %1042  ;;  %v3558_v3 = vpop.permute.xlu1 %1036 }
 0x11d   : > { %1686 = vrot.lane.b32.xlu0 %v3181_v41, %s2872_s30  ;;  %1558 = vrot.lane.b32.xlu1 %v593_v8, %s2873_s7 }
 0x11f   : > { %v3563_v42 = vpop.permute.xlu0 %1046  ;;  %v3565_v40 = vpop.permute.xlu1 %1040 }
 0x121   : > { %1306 = vrot.lane.b32.xlu0 %v3181_v41, %s2870_s16  ;;  %1560 = vrot.lane.b32.xlu1 %v689_v44, %s2873_s7  ;;  %v595_v41 = vld [vmem:[#allocation2 + $0x91] sm:$0xff] }
 0x123   : > { %v3570_v50 = vpop.permute.xlu0 %1050  ;;  %v3572_v27 = vpop.permute.xlu1 %1044 }
 0x125   : > { %1308 = vrot.lane.b32.xlu0 %v3199_v46, %s2870_s16  ;;  %1180 = vrot.lane.b32.xlu1 %v689_v44, %s2869_s11 }
 0x127   : > { %v3577_v8 = vpop.permute.xlu0 %1054  ;;  %v3579_v35 = vpop.permute.xlu1 %1048 }
 0x128   : > { %4383 = vst [vmem:[#allocation50_spill] sm:$0xff] %v3577_v8 }
 0x129   : > { %1436 = vrot.lane.b32.xlu0 %v3325_v59, %s2871_s22  ;;  %1688 = vrot.lane.b32.xlu1 %v3199_v46, %s2872_s30  ;;  %v691_v46 = vld [vmem:[#allocation2 + $0x99] sm:$0xff] }
 0x12b   : > { %v3585_v24 = vpop.permute.xlu0 %1058  ;;  %v3587_v54 = vpop.permute.xlu1 %1052 }
 0x12c   : > { %4384 = vst [vmem:[#allocation51_spill] sm:$0xff] %v3585_v24 }
 0x12d   : > { %1182 = vrot.lane.b32.xlu0 %v595_v41, %s2869_s11  ;;  %1434 = vrot.lane.b32.xlu1 %v3299_v32, %s2871_s22 }
 0x12f   : > { %v3592_v44 = vpop.permute.xlu0 %1062  ;;  %v3594_v8 = vpop.permute.xlu1 %1056 }
 0x130   : > { %4385 = vst [vmem:[#allocation52_spill] sm:$0xff] %v3592_v44  ;;  %4386 = vst [vmem:[#allocation53_spill] sm:$0xff] %v3594_v8 }
 0x131   : > { %1690 = vrot.lane.b32.xlu0 %v3189_v43, %s2872_s30  ;;  %1562 = vrot.lane.b32.xlu1 %v595_v41, %s2873_s7 }
 0x133   : > { %v3599_v59 = vpop.permute.xlu0 %1066  ;;  %v3601_v24 = vpop.permute.xlu1 %1060 }
 0x134   : > { %4387 = vst [vmem:[#allocation54_spill] sm:$0xff] %v3599_v59  ;;  %4388 = vst [vmem:[#allocation55_spill] sm:$0xff] %v3601_v24 }
 0x135   : > { %1310 = vrot.lane.b32.xlu0 %v3189_v43, %s2870_s16  ;;  %1564 = vrot.lane.b32.xlu1 %v691_v46, %s2873_s7  ;;  %v597_v43 = vld [vmem:[#allocation2 + $0xa9] sm:$0xff] }
 0x137   : > { %v3606_v32 = vpop.permute.xlu0 %1070  ;;  %v3608_v44 = vpop.permute.xlu1 %1064 }
 0x138   : > { %4389 = vst [vmem:[#allocation56_spill] sm:$0xff] %v3606_v32  ;;  %4390 = vst [vmem:[#allocation57_spill] sm:$0xff] %v3608_v44 }
 0x139   : > { %1312 = vrot.lane.b32.xlu0 %v3207_v48, %s2870_s16  ;;  %1184 = vrot.lane.b32.xlu1 %v691_v46, %s2869_s11 }
 0x13b   : > { %v3613_v41 = vpop.permute.xlu0 %1074  ;;  %v3615_v8 = vpop.permute.xlu1 %1068 }
 0x13c   : > { %4391 = vst [vmem:[#allocation58_spill] sm:$0xff] %v3613_v41  ;;  %4392 = vst [vmem:[#allocation59_spill] sm:$0xff] %v3615_v8 }
 0x13d   : > { %1440 = vrot.lane.b32.xlu0 %v3337_v0, %s2871_s22  ;;  %1692 = vrot.lane.b32.xlu1 %v3207_v48, %s2872_s30  ;;  %v693_v0 = vld [vmem:[#allocation2 + $0xb1] sm:$0xff] }
 0x13f   : > { %v3621_v59 = vpop.permute.xlu0 %1078  ;;  %v3623_v32 = vpop.permute.xlu1 %1072 }
 0x140   : > { %4393 = vst [vmem:[#allocation60_spill] sm:$0xff] %v3621_v59  ;;  %4394 = vst [vmem:[#allocation61_spill] sm:$0xff] %v3623_v32  ;;  %v457_v59 = vld [vmem:[#allocation2] sm:$0xff] }
 0x141   : > { %1186 = vrot.lane.b32.xlu0 %v597_v43, %s2869_s11  ;;  %1438 = vrot.lane.b32.xlu1 %v3311_v52, %s2871_s22  ;;  %v1770_v52 = vsel %vm378_vm0, %v457_v59, %v3225_v58  ;;  %v599_v59 = vld [vmem:[#allocation2 + $0xc1] sm:$0xff] }
 0x143   : > { %v1165_v46 = vpop.permute.xlu0 %1164  ;;  %v3628_v41 = vpop.permute.xlu1 %1076 }
 0x144   : > { %4395 = vst [vmem:[#allocation62_spill] sm:$0xff] %v3628_v41 }
 0x145   : > { %1694 = vrot.lane.b32.xlu0 %v3197_v45, %s2872_s30  ;;  %1566 = vrot.lane.b32.xlu1 %v597_v43, %s2873_s7  ;;  %v1803_v43 = vsel %vm1802_vm3, %v1770_v52, %v3398_v60 }
 0x146   : > { %v1836_v24 = vsel %vm1835_vm4, %v1803_v43, %v3541_v37  ;;  %v695_v43 = vld [vmem:[#allocation2 + $0xc9] sm:$0xff] }
 0x147   : > { %v1293_v48 = vpop.permute.xlu0 %1292  ;;  %v1163_v8 = vpop.permute.xlu1 %1162 }
 0x148   : > { %v1869_v16 = vsel %vm1868_vm5, %v1836_v24, %v1163_v8 }
 0x149   : > { %1314 = vrot.lane.b32.xlu0 %v3197_v45, %s2870_s16  ;;  %1568 = vrot.lane.b32.xlu1 %v693_v0, %s2873_s7 }
 0x14b   : > { %v1421_v32 = vpop.permute.xlu0 %1420  ;;  %v1291_v44 = vpop.permute.xlu1 %1290 }
 0x14c   : > { %v1902_v58 = vsel %vm1901_vm6, %v1869_v16, %v1291_v44 }
 0x14d   : > { %1316 = vrot.lane.b32.xlu0 %v3213_v51, %s2870_s16  ;;  %1188 = vrot.lane.b32.xlu1 %v693_v0, %s2869_s11 }
 0x14f   : > { %v1167_v41 = vpop.permute.xlu0 %1166  ;;  %v1419_v45 = vpop.permute.xlu1 %1418 }
 0x150   : > { %v1935_v60 = vsel %vm1934_vm8, %v1902_v58, %v1419_v45 }
 0x151   : > { %1444 = vrot.lane.b32.xlu0 %v3349_v55, %s2871_s22  ;;  %1696 = vrot.lane.b32.xlu1 %v3213_v51, %s2872_s30  ;;  %v458_v55 = vld [vmem:[#allocation2 + $0x8] sm:$0xff] }
 0x152   : > { %v1771_v8 = vsel %vm378_vm0, %v458_v55, %v3231_v61 }
 0x153   : > { %v1675_v0 = vpop.permute.xlu0 %1674  ;;  %v1547_v37 = vpop.permute.xlu1 %1546  ;;  %v1804_v44 = vsel %vm1802_vm3, %v1771_v8, %v3425_v62 }
 0x154   : > { %v1968_v52 = vsel %vm1967_vm7, %v1935_v60, %v1547_v37 }
 0x155   : > { %1190 = vrot.lane.b32.xlu0 %v599_v59, %s2869_s11  ;;  %1442 = vrot.lane.b32.xlu1 %v3323_v57, %s2871_s22  ;;  %v2001_v51 = vsel %vm2000_vm9, %v1968_v52, %v1675_v0  ;;  %v1837_v57 = vsel %vm1835_vm4, %v1804_v44, %v3558_v3  ;;  %v1772_v3 = vsel %vm378_vm0, %v3245_v9, %v3237_v5  ;;  %v601_v9 = vld [vmem:[#allocation2 + $0xd9] sm:$0xff] }
 0x156   : > { %2761 = vmatprep.mubr.msk.f32.mxu0 %vm2042_vm10, %v2001_v51  ;;  %v1870_v60 = vsel %vm1868_vm5, %v1837_v57, %v1165_v46  ;;  %v697_v57 = vld [vmem:[#allocation2 + $0xe1] sm:$0xff] }
 0x157   : > { %v1295_v16 = vpop.permute.xlu0 %1294  ;;  %v1549_v24 = vpop.permute.xlu1 %1548  ;;  %v1903_v0 = vsel %vm1901_vm6, %v1870_v60, %v1293_v48 }
 0x158   : > { %v1936_v61 = vsel %vm1934_vm8, %v1903_v0, %v1421_v32 }
 0x159   : > { %1698 = vrot.lane.b32.xlu0 %v3205_v47, %s2872_s30  ;;  %1570 = vrot.lane.b32.xlu1 %v599_v59, %s2873_s7  ;;  %v1969_v59 = vsel %vm1967_vm7, %v1936_v61, %v1549_v24  ;;  %v266_v61 = vld [vmem:[%s2975_s26 + $0xf0] sm:$0xff] }
 0x15b   : > { %v1297_v45 = vpop.permute.xlu0 %1296  ;;  %v1169_v58 = vpop.permute.xlu1 %1168 }
 0x15d   : > { %1318 = vrot.lane.b32.xlu0 %v3205_v47, %s2870_s16  ;;  %1572 = vrot.lane.b32.xlu1 %v695_v43, %s2873_s7  ;;  %v1805_v47 = vsel %vm1802_vm3, %v1772_v3, %v3409_v31 }
 0x15e   : > { %v1838_v48 = vsel %vm1835_vm4, %v1805_v47, %v3549_v39  ;;  %v1773_v39 = vsel %vm378_vm0, %v3265_v19, %v3243_v2  ;;  %v2844_v2 = vld [vmem:[%s4327_s1] ss:$0 sm:$0xff] }
 0x15f   : > { %v1425_v62 = vpop.permute.xlu0 %1424  ;;  %v1677_v37 = vpop.permute.xlu1 %1676  ;;  %v1871_v51 = vsel %vm1868_vm5, %v1838_v48, %v1167_v41  ;;  %v1806_v44 = vsel %vm1802_vm3, %v1773_v39, %v3436_v1  ;;  %v305_v19 = vmul.f32 %v2844_v2, %v266_v61 }
 0x160   : > { %v2002_v52 = vsel %vm2000_vm9, %v1969_v59, %v1677_v37  ;;  %v1904_v5 = vsel %vm1901_vm6, %v1871_v51, %v1295_v16  ;;  %v634_v59 = vld [vmem:[#allocation2 + $0xe2] sm:$0xff] }
 0x161   : > { %1320 = vrot.lane.b32.xlu0 %v3218_v53, %s2870_s16  ;;  %1192 = vrot.lane.b32.xlu1 %v695_v43, %s2869_s11  ;;  %v1839_v43 = vsel %vm1835_vm4, %v1806_v44, %v3565_v40 }
 0x162   : > { %2762 = vmatmul.mubr.msk.f32.vlgmr.msra.gmra.mxu0 %vm2042_vm10, %v2002_v52 }
 0x163   : > { %v1171_v32 = vpop.permute.xlu0 %1170  ;;  %v1423_v46 = vpop.permute.xlu1 %1422 }
 0x164   : > { %v1937_v55 = vsel %vm1934_vm8, %v1904_v5, %v1423_v46  ;;  %v267_v46 = vld [vmem:[%s2975_s26 + $0xf8] sm:$0xff] }
 0x165   : > { %1448 = vrot.lane.b32.xlu0 %v3361_v56, %s2871_s22  ;;  %1700 = vrot.lane.b32.xlu1 %v3218_v53, %s2872_s30  ;;  %v728_v53 = vld [vmem:[#allocation2 + $0xda] sm:$0xff]  ;;  %v306_v51 = vmul.f32 %v2844_v2, %v267_v46 }
 0x167   : > { %v1679_v24 = vpop.permute.xlu0 %1678  ;;  %v1551_v31 = vpop.permute.xlu1 %1550 }
 0x168   : > { %v1970_v8 = vsel %vm1967_vm7, %v1937_v55, %v1551_v31 }
 0x169   : > { %1194 = vrot.lane.b32.xlu0 %v601_v9, %s2869_s11  ;;  %1446 = vrot.lane.b32.xlu1 %v3335_v63, %s2871_s22  ;;  %v2003_v56 = vsel %vm2000_vm9, %v1970_v8, %v1679_v24  ;;  %v1872_v63 = vsel %vm1868_vm5, %v1839_v43, %v1169_v58  ;;  %v2845_v58 = vld [vmem:[%s4328_s2] ss:$0 sm:$0xff] }
 0x16a   : > { %2764 = vmatprep.mubr.msk.f32.mxu0 %vm2042_vm10, %v2003_v56  ;;  %v1905_v1 = vsel %vm1901_vm6, %v1872_v63, %v1297_v45  ;;  %v344_v37 = vadd.f32 %v2845_v58, %v305_v19  ;;  %v345_v5 = vadd.f32 %v2845_v58, %v306_v51 }
 0x16b   : > { %v1299_v41 = vpop.permute.xlu0 %1298  ;;  %v1553_v16 = vpop.permute.xlu1 %1552  ;;  %v1938_v40 = vsel %vm1934_vm8, %v1905_v1, %v1425_v62  ;;  %v1774_v62 = vsel %vm378_vm0, %v3254_v13, %v3235_v4  ;;  %v603_v13 = vld [vmem:[#allocation2 + $0xf1] sm:$0xff] }
 0x16c   : > { %v1971_v52 = vsel %vm1967_vm7, %v1938_v40, %v1553_v16  ;;  %v376_v45 = vmax.f32 %v344_v37, 0.0  ;;  %v377_v8 = vmax.f32 %v345_v5, 0.0 }
 0x16d   : > { %1702 = vrot.lane.b32.xlu0 %v728_v53, %s2872_s30  ;;  %1574 = vrot.lane.b32.xlu1 %v601_v9, %s2873_s7  ;;  %v1807_v9 = vsel %vm1802_vm3, %v1774_v62, %v3423_v38 }
 0x16e   : > { %455 = vst.msk [vmem:[#allocation2 + $0x181] sm:$0xff] %vm378_vm0, %v376_v45  ;;  %v1840_v31 = vsel %vm1835_vm4, %v1807_v9, %v3556_v17  ;;  %456 = vst.msk [vmem:[#allocation2 + $0x189] sm:$0xff] %vm378_vm0, %v377_v8  ;;  %v730_v17 = vld [vmem:[#allocation2 + $0xf2] sm:$0xff] }
 0x16f   : > { %v1301_v60 = vpop.permute.xlu0 %1300  ;;  %v1173_v0 = vpop.permute.xlu1 %1172  ;;  %v1873_v56 = vsel %vm1868_vm5, %v1840_v31, %v1171_v32  ;;  %v1775_v32 = vsel %vm378_vm0, %v3277_v23, %v3252_v12  ;;  %v636_v23 = vld [vmem:[#allocation2 + $0xfa] sm:$0xff]  ;;  %v701_v9 = vld [vmem:[#allocation2 + $0x111] sm:$0xff] }
 0x170   : > { %v1906_v4 = vsel %vm1901_vm6, %v1873_v56, %v1299_v41  ;;  %v1808_v43 = vsel %vm1802_vm3, %v1775_v32, %v3450_v25 }
 0x171   : > { %1322 = vrot.lane.b32.xlu0 %v728_v53, %s2870_s16  ;;  %1576 = vrot.lane.b32.xlu1 %v697_v57, %s2873_s7  ;;  %v1841_v63 = vsel %vm1835_vm4, %v1808_v43, %v3572_v27  ;;  %v1779_v43 = vsel %vm378_vm0, %v3301_v34, %v3273_v21  ;;  %v734_v34 = vld [vmem:[#allocation2 + $0x122] sm:$0xff] }
 0x173   : > { %v1429_v3 = vpop.permute.xlu0 %1428  ;;  %v1681_v47 = vpop.permute.xlu1 %1680 }
 0x174   : > { %v2004_v48 = vsel %vm2000_vm9, %v1971_v52, %v1681_v47 }
 0x175   : > { %1324 = vrot.lane.b32.xlu0 %v634_v59, %s2870_s16  ;;  %1196 = vrot.lane.b32.xlu1 %v697_v57, %s2869_s11  ;;  %v699_v57 = vld [vmem:[#allocation2 + $0xf9] sm:$0xff] }
 0x176   : > { %2765 = vmatmul.mubr.msk.f32.gmra.mxu0 %vm2042_vm10, %v2004_v48  ;;  %v1777_v48 = vsel %vm378_vm0, %v3289_v29, %v3261_v15  ;;  %v638_v29 = vld [vmem:[#allocation2 + $0x112] sm:$0xff] }
 0x177   : > { %v1175_v55 = vpop.permute.xlu0 %1174  ;;  %v1427_v24 = vpop.permute.xlu1 %1426  ;;  %v1810_v62 = vsel %vm1802_vm3, %v1777_v48, %v3458_v28  ;;  %v4399_v48 = vld [vmem:[#allocation6_spill] sm:$0xff] }
 0x178   : > { %v1939_v38 = vsel %vm1934_vm8, %v1906_v4, %v1427_v24  ;;  %v1843_v5 = vsel %vm1835_vm4, %v1810_v62, %v3579_v35  ;;  %v1778_v4 = vsel %vm378_vm0, %v3275_v22, %v3250_v11 }
 0x179   : > { %1452 = vrot.lane.b32.xlu0 %v3373_v49, %s2871_s22  ;;  %1704 = vrot.lane.b32.xlu1 %v634_v59, %s2872_s30 }
 0x17b   : > { %v1683_v53 = vpop.permute.xlu0 %1682  ;;  %v1555_v39 = vpop.permute.xlu1 %1554 }
 0x17c   : > { %v1972_v16 = vsel %vm1967_vm7, %v1939_v38, %v1555_v39  ;;  %v3809_v39 = vld [vmem:[#allocation2 + $0x128] sm:$0xff] }
 0x17d   : > { %1198 = vrot.lane.b32.xlu0 %v603_v13, %s2869_s11  ;;  %1450 = vrot.lane.b32.xlu1 %v3347_v10, %s2871_s22  ;;  %v2005_v49 = vsel %vm2000_vm9, %v1972_v16, %v1683_v53  ;;  %v1874_v10 = vsel %vm1868_vm5, %v1841_v63, %v1173_v0 }
 0x17e   : > { %2767 = vmatprep.mubr.msk.f32.mxu0 %vm2042_vm10, %v2005_v49  ;;  %v1907_v19 = vsel %vm1901_vm6, %v1874_v10, %v1301_v60  ;;  %v1776_v60 = vsel %vm378_vm0, %v3263_v18, %v3241_v7  ;;  %v605_v7 = vld [vmem:[#allocation2 + $0x109] sm:$0xff] }
 0x17f   : > { %v1303_v41 = vpop.permute.xlu0 %1302  ;;  %v1557_v44 = vpop.permute.xlu1 %1556  ;;  %v1940_v12 = vsel %vm1934_vm8, %v1907_v19, %v1429_v3  ;;  %v1809_v0 = vsel %vm1802_vm3, %v1776_v60, %v3434_v33  ;;  %v672_v60 = vld [vmem:[#allocation2 + $0x138] sm:$0xff] }
 0x180   : > { %v1973_v25 = vsel %vm1967_vm7, %v1940_v12, %v1557_v44  ;;  %v1842_v37 = vsel %vm1835_vm4, %v1809_v0, %v3563_v42  ;;  %v702_v44 = vld [vmem:[#allocation2 + $0x121] sm:$0xff]  ;;  %v4397_v0 = vld [vmem:[#allocation28_spill] sm:$0xff] }
 0x181   : > { %1706 = vrot.lane.b32.xlu0 %v730_v17, %s2872_s30  ;;  %1578 = vrot.lane.b32.xlu1 %v603_v13, %s2873_s7  ;;  %v1875_v52 = vsel %vm1868_vm5, %v1842_v37, %v1175_v55  ;;  %v1811_v13 = vsel %vm1802_vm3, %v1778_v4, %v3448_v20 }
 0x182   : > { %v1908_v3 = vsel %vm1901_vm6, %v1875_v52, %v1303_v41  ;;  %v1844_v16 = vsel %vm1835_vm4, %v1811_v13, %v3570_v50  ;;  %v703_v41 = vld [vmem:[#allocation2 + $0x129] sm:$0xff] }
 0x183   : > { %v1305_v61 = vpop.permute.xlu0 %1304  ;;  %v1177_v2 = vpop.permute.xlu1 %1176  ;;  %v4398_v52 = vld [vmem:[#allocation50_spill] sm:$0xff] }
 0x185   : > { %1326 = vrot.lane.b32.xlu0 %v730_v17, %s2870_s16  ;;  %1580 = vrot.lane.b32.xlu1 %v699_v57, %s2873_s7 }
 0x187   : > { %v1433_v27 = vpop.permute.xlu0 %1432  ;;  %v1685_v1 = vpop.permute.xlu1 %1684 }
 0x188   : > { %v2006_v40 = vsel %vm2000_vm9, %v1973_v25, %v1685_v1  ;;  %v4396_v1 = vld [vmem:[#allocation3_spill] sm:$0xff] }
 0x189   : > { %1328 = vrot.lane.b32.xlu0 %v636_v23, %s2870_s16  ;;  %1200 = vrot.lane.b32.xlu1 %v699_v57, %s2869_s11  ;;  %v1812_v57 = vsel %vm1802_vm3, %v1779_v43, %v3466_v14  ;;  %v735_v14 = vld [vmem:[#allocation2 + $0x12a] sm:$0xff] }
 0x18a   : > { %2768 = vmatmul.mubr.msk.f32.gmra.mxu0 %vm2042_vm10, %v2006_v40  ;;  %v1780_v40 = vsel %vm378_vm0, %v3287_v26, %v4396_v1  ;;  %v673_v26 = vld [vmem:[#allocation2 + $0x140] sm:$0xff] }
 0x18b   : > { %v1179_v59 = vpop.permute.xlu0 %1178  ;;  %v1431_v58 = vpop.permute.xlu1 %1430 }
 0x18c   : > { %v1941_v18 = vsel %vm1934_vm8, %v1908_v3, %v1431_v58  ;;  %v1877_v49 = vsel %vm1868_vm5, %v1844_v16, %v1179_v59  ;;  %v1813_v59 = vsel %vm1802_vm3, %v1780_v40, %v4397_v0  ;;  %v4403_v16 = vld [vmem:[#allocation4_spill] sm:$0xff]  ;;  %v4410_v40 = vld [vmem:[#allocation55_spill] sm:$0xff] }
 0x18d   : > { %1456 = vrot.lane.b32.xlu0 %v3386_v6, %s2871_s22  ;;  %1708 = vrot.lane.b32.xlu1 %v636_v23, %s2872_s30  ;;  %v732_v6 = vld [vmem:[#allocation2 + $0x10a] sm:$0xff]  ;;  %v1846_v3 = vsel %vm1835_vm4, %v1813_v59, %v4398_v52 }
 0x18f   : > { %v1687_v47 = vpop.permute.xlu0 %1686  ;;  %v1559_v46 = vpop.permute.xlu1 %1558 }
 0x190   : > { %v1974_v33 = vsel %vm1967_vm7, %v1941_v18, %v1559_v46 }
 0x191   : > { %1202 = vrot.lane.b32.xlu0 %v605_v7, %s2869_s11  ;;  %1454 = vrot.lane.b32.xlu1 %v3359_v36, %s2871_s22  ;;  %v2007_v42 = vsel %vm2000_vm9, %v1974_v33, %v1687_v47  ;;  %v1876_v36 = vsel %vm1868_vm5, %v1843_v5, %v1177_v2 }
 0x192   : > { %2770 = vmatprep.mubr.msk.f32.mxu0 %vm2042_vm10, %v2007_v42  ;;  %v1909_v31 = vsel %vm1901_vm6, %v1876_v36, %v1305_v61  ;;  %v1845_v61 = vsel %vm1835_vm4, %v1812_v57, %v3587_v54  ;;  %v4401_v36 = vld [vmem:[#allocation31_spill] sm:$0xff] }
 0x193   : > { %v1307_v45 = vpop.permute.xlu0 %1306  ;;  %v1561_v51 = vpop.permute.xlu1 %1560  ;;  %v1942_v15 = vsel %vm1934_vm8, %v1909_v31, %v1433_v27  ;;  %v674_v57 = vld [vmem:[#allocation2 + $0x150] sm:$0xff] }
 0x194   : > { %v1975_v28 = vsel %vm1967_vm7, %v1942_v15, %v1561_v51  ;;  %v1910_v11 = vsel %vm1901_vm6, %v1877_v49, %v1307_v45  ;;  %v4400_v45 = vld [vmem:[#allocation12_spill] sm:$0xff]  ;;  %v705_v15 = vld [vmem:[#allocation2 + $0x141] sm:$0xff] }
 0x195   : > { %1710 = vrot.lane.b32.xlu0 %v732_v6, %s2872_s30  ;;  %1582 = vrot.lane.b32.xlu1 %v605_v7, %s2873_s7  ;;  %v1781_v51 = vsel %vm378_vm0, %v4400_v45, %v4399_v48  ;;  %v4404_v49 = vld [vmem:[#allocation9_spill] sm:$0xff]  ;;  %v4412_v48 = vld [vmem:[#allocation30_spill] sm:$0xff] }
 0x197   : > { %v1309_v55 = vpop.permute.xlu0 %1308  ;;  %v1181_v24 = vpop.permute.xlu1 %1180 }
 0x199   : > { %1330 = vrot.lane.b32.xlu0 %v732_v6, %s2870_s16  ;;  %1584 = vrot.lane.b32.xlu1 %v701_v9, %s2873_s7 }
 0x19b   : > { %v1437_v35 = vpop.permute.xlu0 %1436  ;;  %v1689_v8 = vpop.permute.xlu1 %1688 }
 0x19c   : > { %v2008_v56 = vsel %vm2000_vm9, %v1975_v28, %v1689_v8 }
 0x19d   : > { %1332 = vrot.lane.b32.xlu0 %v638_v29, %s2870_s16  ;;  %1204 = vrot.lane.b32.xlu1 %v701_v9, %s2869_s11  ;;  %v1814_v9 = vsel %vm1802_vm3, %v1781_v51, %v4401_v36 }
 0x19e   : > { %2771 = vmatmul.mubr.msk.f32.gmra.mxu0 %vm2042_vm10, %v2008_v56 }
 0x19f   : > { %v1183_v38 = vpop.permute.xlu0 %1182  ;;  %v1435_v53 = vpop.permute.xlu1 %1434 }
 0x1a0   : > { %v1943_v22 = vsel %vm1934_vm8, %v1910_v11, %v1435_v53  ;;  %v1879_v7 = vsel %vm1868_vm5, %v1846_v3, %v1183_v38  ;;  %v1782_v11 = vsel %vm378_vm0, %v4404_v49, %v4403_v16  ;;  %v707_v3 = vld [vmem:[#allocation2 + $0x159] sm:$0xff]  ;;  %v4415_v49 = vld [vmem:[#allocation35_spill] sm:$0xff] }
 0x1a1   : > { %1460 = vrot.lane.b32.xlu0 %v3809_v39, %s2871_s22  ;;  %1712 = vrot.lane.b32.xlu1 %v638_v29, %s2872_s30  ;;  %v704_v29 = vld [vmem:[#allocation2 + $0x139] sm:$0xff] }
 0x1a3   : > { %v1691_v17 = vpop.permute.xlu0 %1690  ;;  %v1563_v20 = vpop.permute.xlu1 %1562 }
 0x1a4   : > { %v1976_v32 = vsel %vm1967_vm7, %v1943_v22, %v1563_v20  ;;  %v737_v22 = vld [vmem:[#allocation2 + $0x142] sm:$0xff] }
 0x1a5   : > { %1080 = vrot.lane.b32.xlu0 %v3809_v39, %s2868_s6  ;;  %1458 = vrot.lane.b32.xlu1 %v3371_v30, %s2871_s22  ;;  %v2009_v50 = vsel %vm2000_vm9, %v1976_v32, %v1691_v17  ;;  %v1878_v30 = vsel %vm1868_vm5, %v1845_v61, %v1181_v24  ;;  %v736_v17 = vld [vmem:[#allocation2 + $0x13a] sm:$0xff] }
 0x1a6   : > { %2773 = vmatprep.mubr.msk.f32.mxu0 %vm2042_vm10, %v2009_v50  ;;  %v1911_v12 = vsel %vm1901_vm6, %v1878_v30, %v1309_v55  ;;  %v4402_v55 = vld [vmem:[#allocation53_spill] sm:$0xff] }
 0x1a7   : > { %v1311_v63 = vpop.permute.xlu0 %1310  ;;  %v1565_v10 = vpop.permute.xlu1 %1564  ;;  %v1944_v21 = vsel %vm1934_vm8, %v1911_v12, %v1437_v35  ;;  %v1847_v24 = vsel %vm1835_vm4, %v1814_v9, %v4402_v55  ;;  %v4405_v20 = vld [vmem:[#allocation29_spill] sm:$0xff] }
 0x1a8   : > { %v1977_v54 = vsel %vm1967_vm7, %v1944_v21, %v1565_v10  ;;  %v1912_v18 = vsel %vm1901_vm6, %v1879_v7, %v1311_v63  ;;  %v1815_v32 = vsel %vm1802_vm3, %v1782_v11, %v4405_v20  ;;  %v675_v21 = vld [vmem:[#allocation2 + $0x158] sm:$0xff] }
 0x1a9   : > { %1588 = vrot.lane.b32.xlu0 %v703_v41, %s2873_s7  ;;  %1586 = vrot.lane.b32.xlu1 %v702_v44, %s2873_s7  ;;  %v706_v7 = vld [vmem:[#allocation2 + $0x151] sm:$0xff] }
 0x1ab   : > { %v1313_v2 = vpop.permute.xlu0 %1312  ;;  %v1185_v19 = vpop.permute.xlu1 %1184 }
 0x1ac   : > { %v1880_v31 = vsel %vm1868_vm5, %v1847_v24, %v1185_v19  ;;  %v739_v24 = vld [vmem:[#allocation2 + $0x15a] sm:$0xff] }
 0x1ad   : > { %1208 = vrot.lane.b32.xlu0 %v703_v41, %s2869_s11  ;;  %1206 = vrot.lane.b32.xlu1 %v702_v44, %s2869_s11  ;;  %v1913_v8 = vsel %vm1901_vm6, %v1880_v31, %v1313_v2  ;;  %v4406_v44 = vld [vmem:[#allocation51_spill] sm:$0xff] }
 0x1ae   : > { %v1848_v43 = vsel %vm1835_vm4, %v1815_v32, %v4406_v44  ;;  %v738_v31 = vld [vmem:[#allocation2 + $0x152] sm:$0xff] }
 0x1af   : > { %v1441_v23 = vpop.permute.xlu0 %1440  ;;  %v1693_v25 = vpop.permute.xlu1 %1692  ;;  %v677_v32 = vld [vmem:[#allocation2 + $0x170] sm:$0xff] }
 0x1b0   : > { %v2010_v27 = vsel %vm2000_vm9, %v1977_v54, %v1693_v25  ;;  %v1946_v56 = vsel %vm1934_vm8, %v1913_v8, %v1441_v23 }
 0x1b1   : > { %1716 = vrot.lane.b32.xlu0 %v735_v14, %s2872_s30  ;;  %1714 = vrot.lane.b32.xlu1 %v734_v34, %s2872_s30 }
 0x1b2   : > { %2774 = vmatmul.mubr.msk.f32.gmra.mxu0 %vm2042_vm10, %v2010_v27  ;;  %v4409_v27 = vld [vmem:[#allocation33_spill] sm:$0xff] }
 0x1b3   : > { %v1187_v58 = vpop.permute.xlu0 %1186  ;;  %v1439_v37 = vpop.permute.xlu1 %1438 }
 0x1b4   : > { %v1945_v47 = vsel %vm1934_vm8, %v1912_v18, %v1439_v37  ;;  %v1881_v63 = vsel %vm1868_vm5, %v1848_v43, %v1187_v58 }
 0x1b5   : > { %1462 = vrot.lane.b32.xlu0 %v672_v60, %s2871_s22  ;;  %1334 = vrot.lane.b32.xlu1 %v734_v34, %s2870_s16  ;;  %v4408_v34 = vld [vmem:[#allocation15_spill] sm:$0xff] }
 0x1b7   : > { %v1695_v46 = vpop.permute.xlu0 %1694  ;;  %v1567_v33 = vpop.permute.xlu1 %1566 }
 0x1b8   : > { %v1978_v42 = vsel %vm1967_vm7, %v1945_v47, %v1567_v33  ;;  %v2846_v33 = vld [vmem:[#allocation2 + $0xa8] sm:$0xff] }
 0x1b9   : > { %1464 = vrot.lane.b32.xlu0 %v673_v26, %s2871_s22  ;;  %1336 = vrot.lane.b32.xlu1 %v735_v14, %s2870_s16  ;;  %v2011_v6 = vsel %vm2000_vm9, %v1978_v42, %v1695_v46  ;;  %v4407_v14 = vld [vmem:[#allocation8_spill] sm:$0xff]  ;;  %v4411_v42 = vld [vmem:[#allocation5_spill] sm:$0xff] }
 0x1ba   : > { %2776 = vmatprep.mubr.msk.f32.mxu0 %vm2042_vm10, %v2011_v6  ;;  %v1783_v54 = vsel %vm378_vm0, %v4408_v34, %v4407_v14  ;;  %v1784_v6 = vsel %vm378_vm0, %v2846_v33, %v4411_v42  ;;  %v4418_v14 = vld [vmem:[#allocation32_spill] sm:$0xff]  ;;  %v4421_v33 = vld [vmem:[#allocation37_spill] sm:$0xff] }
 0x1bb   : > { %v1315_v62 = vpop.permute.xlu0 %1314  ;;  %v1569_v5 = vpop.permute.xlu1 %1568  ;;  %v1816_v1 = vsel %vm1802_vm3, %v1783_v54, %v4409_v27  ;;  %v1817_v45 = vsel %vm1802_vm3, %v1784_v6, %v4412_v48  ;;  %v4422_v6 = vld [vmem:[#allocation59_spill] sm:$0xff] }
 0x1bc   : > { %v1979_v4 = vsel %vm1967_vm7, %v1946_v56, %v1569_v5  ;;  %v1914_v10 = vsel %vm1901_vm6, %v1881_v63, %v1315_v62  ;;  %v4413_v5 = vld [vmem:[#allocation52_spill] sm:$0xff]  ;;  %v676_v56 = vld [vmem:[#allocation2 + $0x168] sm:$0xff] }
 0x1bd   : > { %1084 = vrot.lane.b32.xlu0 %v673_v26, %s2868_s6  ;;  %1082 = vrot.lane.b32.xlu1 %v672_v60, %s2868_s6  ;;  %v1849_v60 = vsel %vm1835_vm4, %v1816_v1, %v4410_v40  ;;  %v1850_v36 = vsel %vm1835_vm4, %v1817_v45, %v4413_v5 }
 0x1bf   : > { %v1317_v28 = vpop.permute.xlu0 %1316  ;;  %v1189_v35 = vpop.permute.xlu1 %1188 }
 0x1c0   : > { %v1882_v0 = vsel %vm1868_vm5, %v1849_v60, %v1189_v35 }
 0x1c1   : > { %1592 = vrot.lane.b32.xlu0 %v705_v15, %s2873_s7  ;;  %1590 = vrot.lane.b32.xlu1 %v704_v29, %s2873_s7  ;;  %v1915_v37 = vsel %vm1901_vm6, %v1882_v0, %v1317_v28 }
 0x1c3   : > { %v1445_v13 = vpop.permute.xlu0 %1444  ;;  %v1697_v38 = vpop.permute.xlu1 %1696 }
 0x1c4   : > { %v2012_v53 = vsel %vm2000_vm9, %v1979_v4, %v1697_v38  ;;  %v1948_v52 = vsel %vm1934_vm8, %v1915_v37, %v1445_v13  ;;  %v2847_v4 = vld [vmem:[#allocation2 + $0xb0] sm:$0xff] }
 0x1c5   : > { %1212 = vrot.lane.b32.xlu0 %v705_v15, %s2869_s11  ;;  %1210 = vrot.lane.b32.xlu1 %v704_v29, %s2869_s11  ;;  %v4414_v13 = vld [vmem:[#allocation11_spill] sm:$0xff] }
 0x1c6   : > { %2777 = vmatmul.mubr.msk.f32.gmra.mxu0 %vm2042_vm10, %v2012_v53  ;;  %v1785_v38 = vsel %vm378_vm0, %v2847_v4, %v4414_v13 }
 0x1c7   : > { %v1191_v50 = vpop.permute.xlu0 %1190  ;;  %v1443_v41 = vpop.permute.xlu1 %1442  ;;  %v1818_v11 = vsel %vm1802_vm3, %v1785_v38, %v4415_v49 }
 0x1c8   : > { %v1947_v61 = vsel %vm1934_vm8, %v1914_v10, %v1443_v41  ;;  %v1883_v9 = vsel %vm1868_vm5, %v1850_v36, %v1191_v50 }
 0x1c9   : > { %1720 = vrot.lane.b32.xlu0 %v737_v22, %s2872_s30  ;;  %1718 = vrot.lane.b32.xlu1 %v736_v17, %s2872_s30 }
 0x1cb   : > { %v1699_v30 = vpop.permute.xlu0 %1698  ;;  %v1571_v2 = vpop.permute.xlu1 %1570 }
 0x1cc   : > { %v1980_v19 = vsel %vm1967_vm7, %v1947_v61, %v1571_v2  ;;  %v4417_v2 = vld [vmem:[#allocation7_spill] sm:$0xff] }
 0x1cd   : > { %1466 = vrot.lane.b32.xlu0 %v674_v57, %s2871_s22  ;;  %1338 = vrot.lane.b32.xlu1 %v736_v17, %s2870_s16  ;;  %v2013_v12 = vsel %vm2000_vm9, %v1980_v19, %v1699_v30  ;;  %v2848_v30 = vld [vmem:[#allocation2 + $0xc0] sm:$0xff] }
 0x1ce   : > { %2779 = vmatprep.mubr.msk.f32.mxu0 %vm2042_vm10, %v2013_v12  ;;  %v1786_v19 = vsel %vm378_vm0, %v2848_v30, %v4417_v2  ;;  %v709_v12 = vld [vmem:[#allocation2 + $0x171] sm:$0xff] }
 0x1cf   : > { %v1319_v23 = vpop.permute.xlu0 %1318  ;;  %v1573_v25 = vpop.permute.xlu1 %1572  ;;  %v1819_v34 = vsel %vm1802_vm3, %v1786_v19, %v4418_v14  ;;  %v4427_v30 = vld [vmem:[#allocation39_spill] sm:$0xff]  ;;  %v4428_v19 = vld [vmem:[#allocation61_spill] sm:$0xff] }
 0x1d0   : > { %v1981_v18 = vsel %vm1967_vm7, %v1948_v52, %v1573_v25  ;;  %v1916_v55 = vsel %vm1901_vm6, %v1883_v9, %v1319_v23  ;;  %v4419_v25 = vld [vmem:[#allocation54_spill] sm:$0xff]  ;;  %v741_v52 = vld [vmem:[#allocation2 + $0x172] sm:$0xff] }
 0x1d1   : > { %1468 = vrot.lane.b32.xlu0 %v675_v21, %s2871_s22  ;;  %1340 = vrot.lane.b32.xlu1 %v737_v22, %s2870_s16  ;;  %v4416_v22 = vld [vmem:[#allocation57_spill] sm:$0xff]  ;;  %v1852_v27 = vsel %vm1835_vm4, %v1819_v34, %v4419_v25  ;;  %v743_v14 = vld [vmem:[#allocation2 + $0x18a] sm:$0xff] }
 0x1d2   : > { %v1851_v17 = vsel %vm1835_vm4, %v1818_v11, %v4416_v22  ;;  %v711_v22 = vld [vmem:[#allocation2 + $0x189] sm:$0xff] }
 0x1d3   : > { %v1321_v59 = vpop.permute.xlu0 %1320  ;;  %v1193_v58 = vpop.permute.xlu1 %1192  ;;  %v742_v34 = vld [vmem:[#allocation2 + $0x182] sm:$0xff] }
 0x1d4   : > { %v1884_v20 = vsel %vm1868_vm5, %v1851_v17, %v1193_v58  ;;  %v710_v17 = vld [vmem:[#allocation2 + $0x181] sm:$0xff] }
 0x1d5   : > { %1088 = vrot.lane.b32.xlu0 %v675_v21, %s2868_s6  ;;  %1086 = vrot.lane.b32.xlu1 %v674_v57, %s2868_s6  ;;  %v1917_v44 = vsel %vm1901_vm6, %v1884_v20, %v1321_v59  ;;  %v708_v21 = vld [vmem:[#allocation2 + $0x169] sm:$0xff] }
 0x1d7   : > { %v1449_v26 = vpop.permute.xlu0 %1448  ;;  %v1701_v47 = vpop.permute.xlu1 %1700 }
 0x1d8   : > { %v2014_v46 = vsel %vm2000_vm9, %v1981_v18, %v1701_v47  ;;  %v1950_v43 = vsel %vm1934_vm8, %v1917_v44, %v1449_v26  ;;  %v4420_v18 = vld [vmem:[#allocation14_spill] sm:$0xff] }
 0x1d9   : > { %1596 = vrot.lane.b32.xlu0 %v707_v3, %s2873_s7  ;;  %1594 = vrot.lane.b32.xlu1 %v706_v7, %s2873_s7 }
 0x1da   : > { %2780 = vmatmul.mubr.msk.f32.gmra.mxu0 %vm2042_vm10, %v2014_v46 }
 0x1db   : > { %v1195_v51 = vpop.permute.xlu0 %1194  ;;  %v1447_v62 = vpop.permute.xlu1 %1446 }
 0x1dc   : > { %v1949_v15 = vsel %vm1934_vm8, %v1916_v55, %v1447_v62  ;;  %v1885_v1 = vsel %vm1868_vm5, %v1852_v27, %v1195_v51  ;;  %v678_v51 = vld [vmem:[#allocation2 + $0x180] sm:$0xff]  ;;  %v679_v55 = vld [vmem:[#allocation2 + $0x188] sm:$0xff] }
 0x1dd   : > { %1216 = vrot.lane.b32.xlu0 %v707_v3, %s2869_s11  ;;  %1214 = vrot.lane.b32.xlu1 %v706_v7, %s2869_s11  ;;  %v740_v3 = vld [vmem:[#allocation2 + $0x16a] sm:$0xff] }
 0x1de   : > { %v2849_v7 = vld [vmem:[#allocation2 + $0xc8] sm:$0xff] }
 0x1df   : > { %v1703_v29 = vpop.permute.xlu0 %1702  ;;  %v1575_v28 = vpop.permute.xlu1 %1574  ;;  %v1787_v26 = vsel %vm378_vm0, %v2849_v7, %v4420_v18  ;;  %v681_v7 = vld [vmem:[#allocation2 + $0x1a0] sm:$0xff]  ;;  %v2852_v18 = vld [vmem:[#allocation2 + $0xf8] sm:$0xff] }
 0x1e0   : > { %v1982_v35 = vsel %vm1967_vm7, %v1949_v15, %v1575_v28  ;;  %v1820_v42 = vsel %vm1802_vm3, %v1787_v26, %v4421_v33  ;;  %v2850_v28 = vld [vmem:[#allocation2 + $0xd8] sm:$0xff]  ;;  %v4429_v26 = vld [vmem:[#allocation19_spill] sm:$0xff] }
 0x1e1   : > { %1724 = vrot.lane.b32.xlu0 %v739_v24, %s2872_s30  ;;  %1722 = vrot.lane.b32.xlu1 %v738_v31, %s2872_s30  ;;  %v2015_v8 = vsel %vm2000_vm9, %v1982_v35, %v1703_v29  ;;  %v1853_v48 = vsel %vm1835_vm4, %v1820_v42, %v4422_v6  ;;  %v4423_v35 = vld [vmem:[#allocation10_spill] sm:$0xff]  ;;  %v4430_v42 = vld [vmem:[#allocation41_spill] sm:$0xff] }
 0x1e2   : > { %2782 = vmatprep.mubr.msk.f32.mxu0 %vm2042_vm10, %v2015_v8  ;;  %v1788_v8 = vsel %vm378_vm0, %v2850_v28, %v4423_v35 }
 0x1e3   : > { %v1323_v53 = vpop.permute.xlu0 %1322  ;;  %v1577_v16 = vpop.permute.xlu1 %1576 }
 0x1e4   : > { %v1983_v63 = vsel %vm1967_vm7, %v1950_v43, %v1577_v16  ;;  %v1918_v40 = vsel %vm1901_vm6, %v1885_v1, %v1323_v53  ;;  %v4425_v53 = vld [vmem:[#allocation56_spill] sm:$0xff]  ;;  %v2851_v43 = vld [vmem:[#allocation2 + $0xe0] sm:$0xff] }
 0x1e5   : > { %1470 = vrot.lane.b32.xlu0 %v676_v56, %s2871_s22  ;;  %1342 = vrot.lane.b32.xlu1 %v738_v31, %s2870_s16  ;;  %v680_v1 = vld [vmem:[#allocation2 + $0x198] sm:$0xff] }
 0x1e7   : > { %v1325_v50 = vpop.permute.xlu0 %1324  ;;  %v1197_v41 = vpop.permute.xlu1 %1196 }
 0x1e8   : > { %v1886_v45 = vsel %vm1868_vm5, %v1853_v48, %v1197_v41  ;;  %v2853_v48 = vld [vmem:[#allocation2 + $0xf0] sm:$0xff] }
 0x1e9   : > { %1472 = vrot.lane.b32.xlu0 %v677_v32, %s2871_s22  ;;  %1344 = vrot.lane.b32.xlu1 %v739_v24, %s2870_s16  ;;  %v1919_v36 = vsel %vm1901_vm6, %v1886_v45, %v1325_v50  ;;  %v4431_v45 = vld [vmem:[#allocation13_spill] sm:$0xff] }
 0x1eb   : > { %v1453_v10 = vpop.permute.xlu0 %1452  ;;  %v1705_v57 = vpop.permute.xlu1 %1704 }
 0x1ec   : > { %v2016_v61 = vsel %vm2000_vm9, %v1983_v63, %v1705_v57  ;;  %v1952_v9 = vsel %vm1934_vm8, %v1919_v36, %v1453_v10  ;;  %v4426_v63 = vld [vmem:[#allocation17_spill] sm:$0xff]  ;;  %v4433_v36 = vld [vmem:[#allocation36_spill] sm:$0xff] }
 0x1ed   : > { %1092 = vrot.lane.b32.xlu0 %v677_v32, %s2868_s6  ;;  %1090 = vrot.lane.b32.xlu1 %v676_v56, %s2868_s6  ;;  %v4424_v56 = vld [vmem:[#allocation34_spill] sm:$0xff]  ;;  %v1789_v10 = vsel %vm378_vm0, %v2851_v43, %v4426_v63 }
 0x1ee   : > { %2783 = vmatmul.mubr.msk.f32.gmra.mxu0 %vm2042_vm10, %v2016_v61  ;;  %v1821_v4 = vsel %vm1802_vm3, %v1788_v8, %v4424_v56  ;;  %v1822_v2 = vsel %vm1802_vm3, %v1789_v10, %v4427_v30 }
 0x1ef   : > { %v1199_v54 = vpop.permute.xlu0 %1198  ;;  %v1451_v23 = vpop.permute.xlu1 %1450  ;;  %v1854_v16 = vsel %vm1835_vm4, %v1821_v4, %v4425_v53 }
 0x1f0   : > { %v1951_v60 = vsel %vm1934_vm8, %v1918_v40, %v1451_v23  ;;  %v1887_v49 = vsel %vm1868_vm5, %v1854_v16, %v1199_v54 }
 0x1f1   : > { %1600 = vrot.lane.b32.xlu0 %v709_v12, %s2873_s7  ;;  %1598 = vrot.lane.b32.xlu1 %v708_v21, %s2873_s7 }
 0x1f3   : > { %v1707_v0 = vpop.permute.xlu0 %1706  ;;  %v1579_v59 = vpop.permute.xlu1 %1578 }
 0x1f4   : > { %v1984_v58 = vsel %vm1967_vm7, %v1951_v60, %v1579_v59 }
 0x1f5   : > { %1220 = vrot.lane.b32.xlu0 %v709_v12, %s2869_s11  ;;  %1218 = vrot.lane.b32.xlu1 %v708_v21, %s2869_s11  ;;  %v2017_v37 = vsel %vm2000_vm9, %v1984_v58, %v1707_v0  ;;  %v1855_v12 = vsel %vm1835_vm4, %v1822_v2, %v4428_v19  ;;  %v712_v58 = vld [vmem:[#allocation2 + $0x199] sm:$0xff] }
 0x1f6   : > { %2785 = vmatprep.mubr.msk.f32.mxu1 %vm2042_vm10, %v2017_v37 }
 0x1f7   : > { %v1327_v47 = vpop.permute.xlu0 %1326  ;;  %v1581_v46 = vpop.permute.xlu1 %1580 }
 0x1f8   : > { %v1985_v24 = vsel %vm1967_vm7, %v1952_v9, %v1581_v46  ;;  %v1920_v11 = vsel %vm1901_vm6, %v1887_v49, %v1327_v47  ;;  %v1791_v47 = vsel %vm378_vm0, %v2852_v18, %v4429_v26 }
 0x1f9   : > { %1728 = vrot.lane.b32.xlu0 %v741_v52, %s2872_s30  ;;  %1726 = vrot.lane.b32.xlu1 %v740_v3, %s2872_s30  ;;  %v1824_v6 = vsel %vm1802_vm3, %v1791_v47, %v4430_v42 }
 0x1fb   : > { %v1329_v62 = vpop.permute.xlu0 %1328  ;;  %v1201_v5 = vpop.permute.xlu1 %1200 }
 0x1fc   : > { %v1888_v21 = vsel %vm1868_vm5, %v1855_v12, %v1201_v5 }
 0x1fd   : > { %1474 = vrot.lane.b32.xlu0 %v678_v51, %s2871_s22  ;;  %1346 = vrot.lane.b32.xlu1 %v740_v3, %s2870_s16  ;;  %v1921_v25 = vsel %vm1901_vm6, %v1888_v21, %v1329_v62  ;;  %v744_v3 = vld [vmem:[#allocation2 + $0x19a] sm:$0xff]  ;;  %v4432_v62 = vld [vmem:[#allocation62_spill] sm:$0xff] }
 0x1fe   : > { %v1857_v5 = vsel %vm1835_vm4, %v1824_v6, %v4432_v62 }
 0x1ff   : > { %v1457_v31 = vpop.permute.xlu0 %1456  ;;  %v1709_v15 = vpop.permute.xlu1 %1708 }
 0x200   : > { %v2018_v29 = vsel %vm2000_vm9, %v1985_v24, %v1709_v15  ;;  %v1954_v27 = vsel %vm1934_vm8, %v1921_v25, %v1457_v31  ;;  %v713_v24 = vld [vmem:[#allocation2 + $0x1a1] sm:$0xff]  ;;  %v2855_v25 = vld [vmem:[#allocation2 + $0x110] sm:$0xff] }
 0x201   : > { %1476 = vrot.lane.b32.xlu0 %v679_v55, %s2871_s22  ;;  %1348 = vrot.lane.b32.xlu1 %v741_v52, %s2870_s16  ;;  %v4434_v31 = vld [vmem:[#allocation58_spill] sm:$0xff] }
 0x202   : > { %2786 = vmatmul.mubr.msk.f32.vlgmr.msra.gmra.mxu1 %vm2042_vm10, %v2018_v29 }
 0x203   : > { %v3989_v13 = vpop.permute.xlu0 %1202  ;;  %v1455_v38 = vpop.permute.xlu1 %1454 }
 0x204   : > { %v1953_v20 = vsel %vm1934_vm8, %v1920_v11, %v1455_v38 }
 0x205   : > { %1096 = vrot.lane.b32.xlu0 %v679_v55, %s2868_s6  ;;  %1094 = vrot.lane.b32.xlu1 %v678_v51, %s2868_s6  ;;  %v1790_v51 = vsel %vm378_vm0, %v2853_v48, %v4431_v45 }
 0x206   : > { %v1823_v9 = vsel %vm1802_vm3, %v1790_v51, %v4433_v36 }
 0x207   : > { %v1711_v32 = vpop.permute.xlu0 %1710  ;;  %v1583_v50 = vpop.permute.xlu1 %1582  ;;  %v1856_v15 = vsel %vm1835_vm4, %v1823_v9, %v4434_v31 }
 0x208   : > { %v1986_v41 = vsel %vm1967_vm7, %v1953_v20, %v1583_v50  ;;  %v1889_v35 = vsel %vm1868_vm5, %v1856_v15, %v3989_v13  ;;  %v745_v13 = vld [vmem:[#allocation2 + $0x1a2] sm:$0xff] }
 0x209   : > { %1604 = vrot.lane.b32.xlu0 %v711_v22, %s2873_s7  ;;  %1602 = vrot.lane.b32.xlu1 %v710_v17, %s2873_s7  ;;  %v2019_v44 = vsel %vm2000_vm9, %v1986_v41, %v1711_v32 }
 0x20a   : > { %2788 = vmatprep.mubr.msk.f32.mxu1 %vm2042_vm10, %v2019_v44 }
 0x20b   : > { %v1331_v57 = vpop.permute.xlu0 %1330  ;;  %v1585_v61 = vpop.permute.xlu1 %1584 }
 0x20c   : > { %v1987_v40 = vsel %vm1967_vm7, %v1954_v27, %v1585_v61  ;;  %v1922_v8 = vsel %vm1901_vm6, %v1889_v35, %v1331_v57  ;;  %v4436_v27 = vld [vmem:[#allocation21_spill] sm:$0xff] }
 0x20d   : > { %1224 = vrot.lane.b32.xlu0 %v711_v22, %s2869_s11  ;;  %1222 = vrot.lane.b32.xlu1 %v710_v17, %s2869_s11  ;;  %s4047_s11 = scalar_lea.vmem %s4330_s4, %s2700_s21  ;;  %s2663_s21 = sshll.u32 %s4457_s19, 1 }
 0x20e   : > { %s235_s17 = scalar_lea.vmem %s4331_s5, %s2663_s21 }
 0x20f   : > { %v1333_v54 = vpop.permute.xlu0 %1332  ;;  %v1205_v23 = vpop.permute.xlu1 %1204 }
 0x210   : > { %v1890_v55 = vsel %vm1868_vm5, %v1857_v5, %v1205_v23 }
 0x211   : > { %1732 = vrot.lane.b32.xlu0 %v743_v14, %s2872_s30  ;;  %1730 = vrot.lane.b32.xlu1 %v742_v34, %s2872_s30  ;;  %v1923_v56 = vsel %vm1901_vm6, %v1890_v55, %v1333_v54  ;;  %v4435_v54 = vld [vmem:[#allocation16_spill] sm:$0xff] }
 0x213   : > { %v1461_v60 = vpop.permute.xlu0 %1460  ;;  %v1713_v0 = vpop.permute.xlu1 %1712 }
 0x214   : > { %v2020_v59 = vsel %vm2000_vm9, %v1987_v40, %v1713_v0  ;;  %v1956_v4 = vsel %vm1934_vm8, %v1923_v56, %v1461_v60  ;;  %v4437_v0 = vld [vmem:[#allocation38_spill] sm:$0xff] }
 0x215   : > { %1478 = vrot.lane.b32.xlu0 %v680_v1, %s2871_s22  ;;  %1350 = vrot.lane.b32.xlu1 %v742_v34, %s2870_s16  ;;  %v2854_v34 = vld [vmem:[#allocation2 + $0x108] sm:$0xff]  ;;  %v1793_v1 = vsel %vm378_vm0, %v2855_v25, %v4436_v27 }
 0x216   : > { %2789 = vmatmul.mubr.msk.f32.gmra.mxu1 %vm2042_vm10, %v2020_v59  ;;  %v1792_v23 = vsel %vm378_vm0, %v2854_v34, %v4435_v54 }
 0x217   : > { %v4021_v37 = vpop.permute.xlu0 %1080  ;;  %v1459_v52 = vpop.permute.xlu1 %1458  ;;  %v1825_v59 = vsel %vm1802_vm3, %v1792_v23, %v4437_v0 }
 0x218   : > { %v1955_v38 = vsel %vm1934_vm8, %v1922_v8, %v1459_v52 }
 0x219   : > { %1606 = vrot.lane.b32.xlu0 %v712_v58, %s2873_s7  ;;  %1352 = vrot.lane.b32.xlu1 %v743_v14, %s2870_s16  ;;  %v4438_v58 = vld [vmem:[#allocation43_spill] sm:$0xff] }
 0x21a   : > { %v1826_v52 = vsel %vm1802_vm3, %v1793_v1, %v4438_v58 }
 0x21b   : > { %v1589_v46 = vpop.permute.xlu0 %1588  ;;  %v1587_v33 = vpop.permute.xlu1 %1586  ;;  %v1859_v18 = vsel %vm1835_vm4, %v1826_v52, %v4021_v37 }
 0x21c   : > { %v1989_v16 = vsel %vm1967_vm7, %v1956_v4, %v1589_v46  ;;  %v1988_v49 = vsel %vm1967_vm7, %v1955_v38, %v1587_v33 }
 0x21d   : > { %1734 = vrot.lane.b32.xlu0 %v744_v3, %s2872_s30  ;;  %1480 = vrot.lane.b32.xlu1 %v681_v7, %s2871_s22  ;;  %v4439_v3 = vld [vmem:[#allocation60_spill] sm:$0xff] }
 0x21e   : > { %v1858_v7 = vsel %vm1835_vm4, %v1825_v59, %v4439_v3 }
 0x21f   : > { %v1209_v29 = vpop.permute.xlu0 %1208  ;;  %v1207_v28 = vpop.permute.xlu1 %1206 }
 0x220   : > { %v1892_v26 = vsel %vm1868_vm5, %v1859_v18, %v1209_v29  ;;  %v1891_v47 = vsel %vm1868_vm5, %v1858_v7, %v1207_v28 }
 0x221   : > { %1608 = vrot.lane.b32.xlu1 %v713_v24, %s2873_s7 }
 0x222   : > { %v2763_v53 = vpop.f32.mrf.mxu0 }
 0x223   : > { %v2435_v11 = vmul.f32 %v2763_v53, %v2763_v53  ;;  %2537 = vst.msk [vmem:[%s4047_s11 + $0x8] sm:$0xff] %vm378_vm0, %v2763_v53  ;;  %v1717_v22 = vpop.permute.xlu0 %1716  ;;  %v1715_v17 = vpop.permute.xlu1 %1714  ;;  %v2365_v41 = vsel %vm378_vm0, %v2763_v53, 0.0 }
 0x224   : > { %v2022_v20 = vsel %vm2000_vm9, %v1989_v16, %v1717_v22  ;;  %v2205_v32 = vpop.f32.mrf.mxu0  ;;  %v2021_v50 = vsel %vm2000_vm9, %v1988_v49, %v1715_v17 }
 0x225   : > { %v2364_v44 = vsel %vm378_vm0, %v2205_v32, 0.0  ;;  %v2434_v43 = vmul.f32 %v2205_v32, %v2205_v32  ;;  %2536 = vst.msk [vmem:[%s4047_s11] sm:$0xff] %vm378_vm0, %v2205_v32  ;;  %1736 = vrot.lane.b32.xlu1 %v745_v13, %s2872_s30  ;;  %2791 = vmatprep.mubr.msk.f32.mxu1 %vm2042_vm10, %v2021_v50  ;;  %v2467_v10 = vsel %vm378_vm0, %v2435_v11, 0.0 }
 0x226   : > { %v2366_v63 = vadd.f32 %v2365_v41, %v2364_v44  ;;  %2792 = vmatmul.mubr.msk.f32.gmra.mxu1 %vm2042_vm10, %v2022_v20  ;;  %v4440_v20 = vld [vmem:[#allocation23_spill] sm:$0xff]  ;;  %v2856_v41 = vld [vmem:[#allocation2 + $0x120] sm:$0xff]  ;;  %v4441_v44 = vld [vmem:[#allocation18_spill] sm:$0xff] }
 0x227   : > { %v2466_v57 = vsel %vm378_vm0, %v2434_v43, 0.0  ;;  %v1463_v61 = vpop.permute.xlu0 %1462  ;;  %v1335_v30 = vpop.permute.xlu1 %1334  ;;  %v1795_v32 = vsel %vm378_vm0, %v3809_v39, %v4440_v20  ;;  %v1794_v43 = vsel %vm378_vm0, %v2856_v41, %v4441_v44 }
 0x228   : > { %v2468_v2 = vadd.f32 %v2467_v10, %v2466_v57  ;;  %v1924_v33 = vsel %vm1901_vm6, %v1891_v47, %v1335_v30  ;;  %v4443_v30 = vld [vmem:[#allocation40_spill] sm:$0xff] }
 0x229   : > { %v1957_v36 = vsel %vm1934_vm8, %v1924_v33, %v1463_v61 }
 0x22b   : > { %v1465_v19 = vpop.permute.xlu0 %1464  ;;  %v1337_v12 = vpop.permute.xlu1 %1336 }
 0x22c   : > { %v1925_v42 = vsel %vm1901_vm6, %v1892_v26, %v1337_v12 }
 0x22d   : > { %v1958_v37 = vsel %vm1934_vm8, %v1925_v42, %v1465_v19 }
 0x22f   : > { %v1085_v21 = vpop.permute.xlu0 %1084  ;;  %v1083_v14 = vpop.permute.xlu1 %1082 }
 0x233   : > { %v1593_v40 = vpop.permute.xlu0 %1592  ;;  %v1591_v60 = vpop.permute.xlu1 %1590 }
 0x234   : > { %v1991_v55 = vsel %vm1967_vm7, %v1958_v37, %v1593_v40  ;;  %v1990_v24 = vsel %vm1967_vm7, %v1957_v36, %v1591_v60 }
 0x236   : > { %v2766_v46 = vpop.f32.mrf.mxu0 }
 0x237   : > { %2539 = vst.msk [vmem:[%s4047_s11 + $0x18] sm:$0xff] %vm378_vm0, %v2766_v46  ;;  %v1213_v6 = vpop.permute.xlu0 %1212  ;;  %v1211_v48 = vpop.permute.xlu1 %1210  ;;  %v2437_v51 = vmul.f32 %v2766_v46, %v2766_v46  ;;  %v2369_v31 = vsel %vm378_vm0, %v2766_v46, 0.0 }
 0x238   : > { %v2215_v45 = vpop.f32.mrf.mxu0 }
 0x239   : > { %v2367_v62 = vsel %vm378_vm0, %v2215_v45, 0.0  ;;  %v2436_v5 = vmul.f32 %v2215_v45, %v2215_v45  ;;  %2538 = vst.msk [vmem:[%s4047_s11 + $0x10] sm:$0xff] %vm378_vm0, %v2215_v45  ;;  %v2471_v38 = vsel %vm378_vm0, %v2437_v51, 0.0 }
 0x23a   : > { %v2368_v9 = vadd.f32 %v2367_v62, %v2366_v63  ;;  %v4442_v63 = vld [vmem:[#allocation45_spill] sm:$0xff] }
 0x23b   : > { %v2469_v15 = vsel %vm378_vm0, %v2436_v5, 0.0  ;;  %v1721_v29 = vpop.permute.xlu0 %1720  ;;  %v1719_v28 = vpop.permute.xlu1 %1718  ;;  %v1828_v10 = vsel %vm1802_vm3, %v1795_v32, %v4442_v63  ;;  %v4447_v32 = vld [vmem:[#allocation47_spill] sm:$0xff] }
 0x23c   : > { %v2470_v35 = vadd.f32 %v2469_v15, %v2468_v2  ;;  %v2024_v8 = vsel %vm2000_vm9, %v1991_v55, %v1721_v29  ;;  %v2023_v56 = vsel %vm2000_vm9, %v1990_v24, %v1719_v28  ;;  %v2370_v4 = vadd.f32 %v2369_v31, %v2368_v9  ;;  %v483_v55 = vld [vmem:[#allocation2 + $0x138] sm:$0xff]  ;;  %v484_v24 = vld [vmem:[#allocation2 + $0x140] sm:$0xff] }
 0x23d   : > { %2794 = vmatprep.mubr.msk.f32.mxu1 %vm2042_vm10, %v2023_v56  ;;  %v1827_v2 = vsel %vm1802_vm3, %v1794_v43, %v4443_v30  ;;  %v1861_v19 = vsel %vm1835_vm4, %v1828_v10, %v1085_v21 }
 0x23e   : > { %2795 = vmatmul.mubr.msk.f32.gmra.mxu1 %vm2042_vm10, %v2024_v8  ;;  %v2472_v53 = vadd.f32 %v2471_v38, %v2470_v35  ;;  %v1860_v39 = vsel %vm1835_vm4, %v1827_v2, %v1083_v14  ;;  %v1894_v25 = vsel %vm1868_vm5, %v1861_v19, %v1213_v6  ;;  %v4444_v8 = vld [vmem:[#allocation20_spill] sm:$0xff] }
 0x23f   : > { %v1467_v13 = vpop.permute.xlu0 %1466  ;;  %v1339_v16 = vpop.permute.xlu1 %1338  ;;  %v1893_v27 = vsel %vm1868_vm5, %v1860_v39, %v1211_v48  ;;  %v1796_v56 = vsel %vm378_vm0, %v483_v55, %v4444_v8 }
 0x240   : > { %v1926_v40 = vsel %vm1901_vm6, %v1893_v27, %v1339_v16 }
 0x241   : > { %v1959_v18 = vsel %vm1934_vm8, %v1926_v40, %v1467_v13 }
 0x243   : > { %v1469_v49 = vpop.permute.xlu0 %1468  ;;  %v1341_v11 = vpop.permute.xlu1 %1340 }
 0x244   : > { %v1927_v60 = vsel %vm1901_vm6, %v1894_v25, %v1341_v11  ;;  %v4446_v11 = vld [vmem:[#allocation42_spill] sm:$0xff] }
 0x245   : > { %v1960_v7 = vsel %vm1934_vm8, %v1927_v60, %v1469_v49  ;;  %v1829_v20 = vsel %vm1802_vm3, %v1796_v56, %v4446_v11 }
 0x247   : > { %v4101_v22 = vpop.permute.xlu0 %1088  ;;  %v4103_v17 = vpop.permute.xlu1 %1086 }
 0x248   : > { %v1862_v63 = vsel %vm1835_vm4, %v1829_v20, %v4103_v17 }
 0x24a   : > { %v2769_v50 = vpop.f32.mrf.mxu0 }
 0x24b   : > { %2541 = vst.msk [vmem:[%s4047_s11 + $0x28] sm:$0xff] %vm378_vm0, %v2769_v50  ;;  %v1597_v57 = vpop.permute.xlu0 %1596  ;;  %v1595_v61 = vpop.permute.xlu1 %1594  ;;  %v2439_v34 = vmul.f32 %v2769_v50, %v2769_v50  ;;  %v2373_v21 = vsel %vm378_vm0, %v2769_v50, 0.0 }
 0x24c   : > { %v2225_v12 = vpop.f32.mrf.mxu0  ;;  %v1993_v47 = vsel %vm1967_vm7, %v1960_v7, %v1597_v57  ;;  %v1992_v46 = vsel %vm1967_vm7, %v1959_v18, %v1595_v61 }
 0x24d   : > { %v2371_v54 = vsel %vm378_vm0, %v2225_v12, 0.0  ;;  %v2438_v23 = vmul.f32 %v2225_v12, %v2225_v12  ;;  %2540 = vst.msk [vmem:[%s4047_s11 + $0x20] sm:$0xff] %vm378_vm0, %v2225_v12  ;;  %v2475_v3 = vsel %vm378_vm0, %v2439_v34, 0.0 }
 0x24e   : > { %v2372_v1 = vadd.f32 %v2371_v54, %v2370_v4  ;;  %v4445_v4 = vld [vmem:[#allocation25_spill] sm:$0xff] }
 0x24f   : > { %v2473_v0 = vsel %vm378_vm0, %v2438_v23, 0.0  ;;  %v1217_v14 = vpop.permute.xlu0 %1216  ;;  %v1215_v59 = vpop.permute.xlu1 %1214  ;;  %v1797_v38 = vsel %vm378_vm0, %v484_v24, %v4445_v4 }
 0x250   : > { %v2474_v58 = vadd.f32 %v2473_v0, %v2472_v53  ;;  %v2374_v52 = vadd.f32 %v2373_v21, %v2372_v1  ;;  %v1830_v50 = vsel %vm1802_vm3, %v1797_v38, %v4447_v32  ;;  %v1895_v61 = vsel %vm1868_vm5, %v1862_v63, %v1215_v59 }
 0x251   : > { %v1863_v43 = vsel %vm1835_vm4, %v1830_v50, %v4101_v22 }
 0x252   : > { %v2476_v26 = vadd.f32 %v2475_v3, %v2474_v58  ;;  %v1896_v57 = vsel %vm1868_vm5, %v1863_v43, %v1217_v14 }
 0x253   : > { %v1725_v33 = vpop.permute.xlu0 %1724  ;;  %v1723_v42 = vpop.permute.xlu1 %1722 }
 0x254   : > { %v2026_v6 = vsel %vm2000_vm9, %v1993_v47, %v1725_v33  ;;  %v2025_v48 = vsel %vm2000_vm9, %v1992_v46, %v1723_v42  ;;  %v485_v33 = vld [vmem:[#allocation2 + $0x150] sm:$0xff]  ;;  %v486_v42 = vld [vmem:[#allocation2 + $0x158] sm:$0xff] }
 0x255   : > { %2797 = vmatprep.mubr.msk.f32.mxu1 %vm2042_vm10, %v2025_v48 }
 0x256   : > { %2798 = vmatmul.mubr.msk.f32.gmra.mxu1 %vm2042_vm10, %v2026_v6 }
 0x257   : > { %v1471_v45 = vpop.permute.xlu0 %1470  ;;  %v1343_v51 = vpop.permute.xlu1 %1342 }
 0x258   : > { %v1928_v2 = vsel %vm1901_vm6, %v1895_v61, %v1343_v51 }
 0x259   : > { %v1961_v22 = vsel %vm1934_vm8, %v1928_v2, %v1471_v45  ;;  %v4453_v2 = vld [vmem:[#allocation46_spill] sm:$0xff] }
 0x25b   : > { %v1473_v62 = vpop.permute.xlu0 %1472  ;;  %v1345_v5 = vpop.permute.xlu1 %1344 }
 0x25c   : > { %v1929_v19 = vsel %vm1901_vm6, %v1896_v57, %v1345_v5 }
 0x25d   : > { %v1962_v34 = vsel %vm1934_vm8, %v1929_v19, %v1473_v62  ;;  %v4448_v62 = vld [vmem:[#allocation22_spill] sm:$0xff] }
 0x25e   : > { %v2772_v37 = vpop.f32.mrf.mxu0  ;;  %v1798_v5 = vsel %vm378_vm0, %v485_v33, %v4448_v62 }
 0x25f   : > { %2543 = vst.msk [vmem:[%s4047_s11 + $0x38] sm:$0xff] %vm378_vm0, %v2772_v37  ;;  %v4138_v36 = vpop.permute.xlu0 %1092  ;;  %v4140_v9 = vpop.permute.xlu1 %1090  ;;  %v2441_v15 = vmul.f32 %v2772_v37, %v2772_v37  ;;  %v2377_v53 = vsel %vm378_vm0, %v2772_v37, 0.0  ;;  %v4449_v37 = vld [vmem:[#allocation26_spill] sm:$0xff] }
 0x260   : > { %v2235_v31 = vpop.f32.mrf.mxu0  ;;  %v1799_v55 = vsel %vm378_vm0, %v486_v42, %v4449_v37  ;;  %v4455_v42 = vld [vmem:[#allocation49_spill] sm:$0xff] }
 0x261   : > { %v2375_v29 = vsel %vm378_vm0, %v2235_v31, 0.0  ;;  %v2440_v28 = vmul.f32 %v2235_v31, %v2235_v31  ;;  %2542 = vst.msk [vmem:[%s4047_s11 + $0x30] sm:$0xff] %vm378_vm0, %v2235_v31  ;;  %v2479_v10 = vsel %vm378_vm0, %v2441_v15, 0.0  ;;  %v4450_v15 = vld [vmem:[#allocation44_spill] sm:$0xff] }
 0x262   : > { %v2376_v35 = vadd.f32 %v2375_v29, %v2374_v52  ;;  %v1831_v29 = vsel %vm1802_vm3, %v1798_v5, %v4450_v15 }
 0x263   : > { %v2477_v13 = vsel %vm378_vm0, %v2440_v28, 0.0  ;;  %v1601_v16 = vpop.permute.xlu0 %1600  ;;  %v1599_v49 = vpop.permute.xlu1 %1598  ;;  %v4451_v28 = vld [vmem:[#allocation48_spill] sm:$0xff]  ;;  %v1864_v56 = vsel %vm1835_vm4, %v1831_v29, %v4140_v9 }
 0x264   : > { %v2478_v41 = vadd.f32 %v2477_v13, %v2476_v26  ;;  %v2378_v44 = vadd.f32 %v2377_v53, %v2376_v35  ;;  %v1995_v17 = vsel %vm1967_vm7, %v1962_v34, %v1601_v16  ;;  %v1994_v54 = vsel %vm1967_vm7, %v1961_v22, %v1599_v49 }
 0x265   : > { %v1832_v35 = vsel %vm1802_vm3, %v1799_v55, %v4451_v28 }
 0x266   : > { %v2480_v30 = vadd.f32 %v2479_v10, %v2478_v41  ;;  %v1865_v8 = vsel %vm1835_vm4, %v1832_v35, %v4138_v36  ;;  %v487_v41 = vld [vmem:[#allocation2 + $0x168] sm:$0xff]  ;;  %v4452_v10 = vld [vmem:[#allocation24_spill] sm:$0xff] }
 0x267   : > { %v1221_v12 = vpop.permute.xlu0 %1220  ;;  %v1219_v39 = vpop.permute.xlu1 %1218  ;;  %v1800_v57 = vsel %vm378_vm0, %v487_v41, %v4452_v10 }
 0x268   : > { %v1898_v4 = vsel %vm1868_vm5, %v1865_v8, %v1221_v12  ;;  %v1897_v38 = vsel %vm1868_vm5, %v1864_v56, %v1219_v39  ;;  %v1833_v19 = vsel %vm1802_vm3, %v1800_v57, %v4453_v2 }
 0x26b   : > { %v1729_v23 = vpop.permute.xlu0 %1728  ;;  %v1727_v25 = vpop.permute.xlu1 %1726 }
 0x26c   : > { %v2028_v27 = vsel %vm2000_vm9, %v1995_v17, %v1729_v23  ;;  %v2027_v1 = vsel %vm2000_vm9, %v1994_v54, %v1727_v25 }
 0x26d   : > { %2800 = vmatprep.mubr.msk.f32.mxu1 %vm2042_vm10, %v2027_v1 }
 0x26e   : > { %2801 = vmatmul.mubr.msk.f32.gmra.mxu1 %vm2042_vm10, %v2028_v27 }
 0x26f   : > { %v1475_v40 = vpop.permute.xlu0 %1474  ;;  %v1347_v60 = vpop.permute.xlu1 %1346 }
 0x270   : > { %v1930_v53 = vsel %vm1901_vm6, %v1897_v38, %v1347_v60 }
 0x271   : > { %v1963_v20 = vsel %vm1934_vm8, %v1930_v53, %v1475_v40 }
 0x272   : > { %v2775_v21 = vpop.f32.mrf.mxu0 }
 0x273   : > { %2545 = vst.msk [vmem:[%s4047_s11 + $0x48] sm:$0xff] %vm378_vm0, %v2775_v21  ;;  %v1477_v0 = vpop.permute.xlu0 %1476  ;;  %v1349_v14 = vpop.permute.xlu1 %1348  ;;  %v2443_v58 = vmul.f32 %v2775_v21, %v2775_v21  ;;  %v2381_v18 = vsel %vm378_vm0, %v2775_v21, 0.0 }
 0x274   : > { %v2245_v59 = vpop.f32.mrf.mxu0  ;;  %v1931_v13 = vsel %vm1901_vm6, %v1898_v4, %v1349_v14 }
 0x275   : > { %v2379_v52 = vsel %vm378_vm0, %v2245_v59, 0.0  ;;  %v2442_v3 = vmul.f32 %v2245_v59, %v2245_v59  ;;  %2544 = vst.msk [vmem:[%s4047_s11 + $0x40] sm:$0xff] %vm378_vm0, %v2245_v59  ;;  %v2483_v45 = vsel %vm378_vm0, %v2443_v58, 0.0  ;;  %v1964_v11 = vsel %vm1934_vm8, %v1931_v13, %v1477_v0  ;;  %v488_v59 = vld [vmem:[#allocation2 + $0x170] sm:$0xff] }
 0x276   : > { %v2380_v7 = vadd.f32 %v2379_v52, %v2378_v44 }
 0x277   : > { %v2481_v26 = vsel %vm378_vm0, %v2442_v3, 0.0  ;;  %v4179_v47 = vpop.permute.xlu0 %1096  ;;  %v1095_v46 = vpop.permute.xlu1 %1094 }
 0x278   : > { %v2482_v6 = vadd.f32 %v2481_v26, %v2480_v30  ;;  %v2382_v48 = vadd.f32 %v2381_v18, %v2380_v7  ;;  %v1866_v39 = vsel %vm1835_vm4, %v1833_v19, %v1095_v46  ;;  %v4454_v46 = vld [vmem:[#allocation27_spill] sm:$0xff] }
 0x279   : > { %v1801_v33 = vsel %vm378_vm0, %v488_v59, %v4454_v46 }
 0x27a   : > { %v2484_v51 = vadd.f32 %v2483_v45, %v2482_v6  ;;  %v1834_v6 = vsel %vm1802_vm3, %v1801_v33, %v4455_v42 }
 0x27b   : > { %v1605_v24 = vpop.permute.xlu0 %1604  ;;  %v1603_v31 = vpop.permute.xlu1 %1602 }
 0x27c   : > { %v1997_v36 = vsel %vm1967_vm7, %v1964_v11, %v1605_v24  ;;  %v1996_v32 = vsel %vm1967_vm7, %v1963_v20, %v1603_v31 }
 0x27f   : > { %v1225_v16 = vpop.permute.xlu0 %1224  ;;  %v1223_v49 = vpop.permute.xlu1 %1222 }
 0x280   : > { %v1899_v54 = vsel %vm1868_vm5, %v1866_v39, %v1223_v49 }
 0x283   : > { %v1733_v9 = vpop.permute.xlu0 %1732  ;;  %v1731_v50 = vpop.permute.xlu1 %1730 }
 0x284   : > { %v2030_v44 = vsel %vm2000_vm9, %v1997_v36, %v1733_v9  ;;  %v2029_v43 = vsel %vm2000_vm9, %v1996_v32, %v1731_v50 }
 0x285   : > { %2803 = vmatprep.mubr.msk.f32.mxu1 %vm2042_vm10, %v2029_v43 }
 0x286   : > { %v2778_v63 = vpop.f32.mrf.mxu0  ;;  %2804 = vmatmul.mubr.msk.f32.gmra.mxu1 %vm2042_vm10, %v2030_v44 }
 0x287   : > { %2547 = vst.msk [vmem:[%s4047_s11 + $0x58] sm:$0xff] %vm378_vm0, %v2778_v63  ;;  %v1479_v61 = vpop.permute.xlu0 %1478  ;;  %v1351_v30 = vpop.permute.xlu1 %1350  ;;  %v2445_v34 = vmul.f32 %v2778_v63, %v2778_v63  ;;  %v2385_v25 = vsel %vm378_vm0, %v2778_v63, 0.0 }
 0x288   : > { %v2255_v12 = vpop.f32.mrf.mxu0  ;;  %v1932_v27 = vsel %vm1901_vm6, %v1899_v54, %v1351_v30 }
 0x289   : > { %v2383_v22 = vsel %vm378_vm0, %v2255_v12, 0.0  ;;  %v2444_v17 = vmul.f32 %v2255_v12, %v2255_v12  ;;  %2546 = vst.msk [vmem:[%s4047_s11 + $0x50] sm:$0xff] %vm378_vm0, %v2255_v12  ;;  %v2487_v14 = vsel %vm378_vm0, %v2445_v34, 0.0  ;;  %v1965_v58 = vsel %vm1934_vm8, %v1932_v27, %v1479_v61 }
 0x28a   : > { %v2384_v23 = vadd.f32 %v2383_v22, %v2382_v48  ;;  %v1867_v48 = vsel %vm1835_vm4, %v1834_v6, %v4179_v47 }
 0x28b   : > { %v2485_v1 = vsel %vm378_vm0, %v2444_v17, 0.0  ;;  %v1607_v40 = vpop.permute.xlu0 %1606  ;;  %v1353_v60 = vpop.permute.xlu1 %1352 }
 0x28c   : > { %v2486_v21 = vadd.f32 %v2485_v1, %v2484_v51  ;;  %v2386_v0 = vadd.f32 %v2385_v25, %v2384_v23  ;;  %v1998_v3 = vsel %vm1967_vm7, %v1965_v58, %v1607_v40  ;;  %v1900_v51 = vsel %vm1868_vm5, %v1867_v48, %v1225_v16 }
 0x28d   : > { %v1933_v62 = vsel %vm1901_vm6, %v1900_v51, %v1353_v60 }
 0x28e   : > { %v2488_v52 = vadd.f32 %v2487_v14, %v2486_v21 }
 0x28f   : > { %v1735_v7 = vpop.permute.xlu0 %1734  ;;  %v1481_v18 = vpop.permute.xlu1 %1480 }
 0x290   : > { %v2031_v26 = vsel %vm2000_vm9, %v1998_v3, %v1735_v7  ;;  %v1966_v5 = vsel %vm1934_vm8, %v1933_v62, %v1481_v18 }
 0x291   : > { %2806 = vmatprep.mubr.msk.f32.mxu1 %vm2042_vm10, %v2031_v26 }
 0x293   : > { %v1609_v45 = vpop.permute.xlu1 %1608 }
 0x294   : > { %v1999_v37 = vsel %vm1967_vm7, %v1966_v5, %v1609_v45 }
 0x297   : > { %v1737_v55 = vpop.permute.xlu1 %1736 }
 0x298   : > { %v2032_v24 = vsel %vm2000_vm9, %v1999_v37, %v1737_v55 }
 0x299   : > { %2807 = vmatmul.mubr.msk.f32.gmra.mxu1 %vm2042_vm10, %v2032_v24 }
 0x29a   : > { %v2781_v31 = vpop.f32.mrf.mxu0 }
 0x29b   : > { %2549 = vst.msk [vmem:[%s4047_s11 + $0x68] sm:$0xff] %vm378_vm0, %v2781_v31  ;;  %v2447_v47 = vmul.f32 %v2781_v31, %v2781_v31  ;;  %v2389_v8 = vsel %vm378_vm0, %v2781_v31, 0.0 }
 0x29c   : > { %v2265_v15 = vpop.f32.mrf.mxu0 }
 0x29d   : > { %v2387_v29 = vsel %vm378_vm0, %v2265_v15, 0.0  ;;  %v2446_v28 = vmul.f32 %v2265_v15, %v2265_v15  ;;  %2548 = vst.msk [vmem:[%s4047_s11 + $0x60] sm:$0xff] %vm378_vm0, %v2265_v15  ;;  %v2491_v53 = vsel %vm378_vm0, %v2447_v47, 0.0 }
 0x29e   : > { %v2388_v35 = vadd.f32 %v2387_v29, %v2386_v0 }
 0x29f   : > { %v2489_v56 = vsel %vm378_vm0, %v2446_v28, 0.0 }
 0x2a0   : > { %v2490_v4 = vadd.f32 %v2489_v56, %v2488_v52  ;;  %v2390_v38 = vadd.f32 %v2389_v8, %v2388_v35 }
 0x2a2   : > { %v2492_v13 = vadd.f32 %v2491_v53, %v2490_v4 }
 0x2ae   : > { %v2784_v16 = vpop.f32.mrf.mxu0 }
 0x2af   : > { %2551 = vst.msk [vmem:[%s4047_s11 + $0x78] sm:$0xff] %vm378_vm0, %v2784_v16  ;;  %v2449_v11 = vmul.f32 %v2784_v16, %v2784_v16  ;;  %v2393_v9 = vsel %vm378_vm0, %v2784_v16, 0.0 }
 0x2b0   : > { %v2275_v49 = vpop.f32.mrf.mxu0 }
 0x2b1   : > { %v2391_v20 = vsel %vm378_vm0, %v2275_v49, 0.0  ;;  %v2448_v36 = vmul.f32 %v2275_v49, %v2275_v49  ;;  %2550 = vst.msk [vmem:[%s4047_s11 + $0x70] sm:$0xff] %vm378_vm0, %v2275_v49  ;;  %v2495_v43 = vsel %vm378_vm0, %v2449_v11, 0.0 }
 0x2b2   : > { %v2392_v32 = vadd.f32 %v2391_v20, %v2390_v38 }
 0x2b3   : > { %v2493_v50 = vsel %vm378_vm0, %v2448_v36, 0.0 }
 0x2b4   : > { %v2394_v41 = vadd.f32 %v2393_v9, %v2392_v32  ;;  %v2494_v44 = vadd.f32 %v2493_v50, %v2492_v13 }
 0x2b6   : > { %v2496_v63 = vadd.f32 %v2495_v43, %v2494_v44 }
 0x2c2   : > { %v2787_v10 = vpop.f32.mrf.mxu1 }
 0x2c3   : > { %2553 = vst.msk [vmem:[%s4047_s11 + $0x88] sm:$0xff] %vm378_vm0, %v2787_v10  ;;  %v2451_v61 = vmul.f32 %v2787_v10, %v2787_v10  ;;  %v2397_v12 = vsel %vm378_vm0, %v2787_v10, 0.0 }
 0x2c4   : > { %v2285_v57 = vpop.f32.mrf.mxu1 }
 0x2c5   : > { %v2395_v30 = vsel %vm378_vm0, %v2285_v57, 0.0  ;;  %v2450_v2 = vmul.f32 %v2285_v57, %v2285_v57  ;;  %2552 = vst.msk [vmem:[%s4047_s11 + $0x80] sm:$0xff] %vm378_vm0, %v2285_v57  ;;  %v2499_v17 = vsel %vm378_vm0, %v2451_v61, 0.0 }
 0x2c6   : > { %v2396_v19 = vadd.f32 %v2395_v30, %v2394_v41 }
 0x2c7   : > { %v2497_v39 = vsel %vm378_vm0, %v2450_v2, 0.0 }
 0x2c8   : > { %v2498_v34 = vadd.f32 %v2497_v39, %v2496_v63  ;;  %v2398_v22 = vadd.f32 %v2397_v12, %v2396_v19 }
 0x2ca   : > { %v2500_v54 = vadd.f32 %v2499_v17, %v2498_v34 }
 0x2d6   : > { %v2790_v23 = vpop.f32.mrf.mxu1 }
 0x2d7   : > { %2555 = vst.msk [vmem:[%s4047_s11 + $0x98] sm:$0xff] %vm378_vm0, %v2790_v23  ;;  %v2453_v27 = vmul.f32 %v2790_v23, %v2790_v23  ;;  %v2401_v21 = vsel %vm378_vm0, %v2790_v23, 0.0 }
 0x2d8   : > { %v2295_v25 = vpop.f32.mrf.mxu1 }
 0x2d9   : > { %v2399_v1 = vsel %vm378_vm0, %v2295_v25, 0.0  ;;  %v2452_v40 = vmul.f32 %v2295_v25, %v2295_v25  ;;  %2554 = vst.msk [vmem:[%s4047_s11 + $0x90] sm:$0xff] %vm378_vm0, %v2295_v25  ;;  %v2503_v58 = vsel %vm378_vm0, %v2453_v27, 0.0 }
 0x2da   : > { %v2400_v60 = vadd.f32 %v2399_v1, %v2398_v22 }
 0x2db   : > { %v2501_v0 = vsel %vm378_vm0, %v2452_v40, 0.0 }
 0x2dc   : > { %v2502_v14 = vadd.f32 %v2501_v0, %v2500_v54  ;;  %v2402_v59 = vadd.f32 %v2401_v21, %v2400_v60 }
 0x2de   : > { %v2504_v52 = vadd.f32 %v2503_v58, %v2502_v14 }
 0x2e6   : > { %v2793_v3 = vpop.f32.mrf.mxu1 }
 0x2e7   : > { %2557 = vst.msk [vmem:[%s4047_s11 + $0xa8] sm:$0xff] %vm378_vm0, %v2793_v3  ;;  %v2455_v18 = vmul.f32 %v2793_v3, %v2793_v3  ;;  %v2405_v42 = vsel %vm378_vm0, %v2793_v3, 0.0 }
 0x2e8   : > { %v2305_v7 = vpop.f32.mrf.mxu1 }
 0x2e9   : > { %v2403_v26 = vsel %vm378_vm0, %v2305_v7, 0.0  ;;  %v2454_v46 = vmul.f32 %v2305_v7, %v2305_v7  ;;  %2556 = vst.msk [vmem:[%s4047_s11 + $0xa0] sm:$0xff] %vm378_vm0, %v2305_v7  ;;  %v2507_v51 = vsel %vm378_vm0, %v2455_v18, 0.0 }
 0x2ea   : > { %v2404_v33 = vadd.f32 %v2403_v26, %v2402_v59 }
 0x2eb   : > { %v2505_v6 = vsel %vm378_vm0, %v2454_v46, 0.0 }
 0x2ec   : > { %v2506_v48 = vadd.f32 %v2505_v6, %v2504_v52  ;;  %v2406_v45 = vadd.f32 %v2405_v42, %v2404_v33 }
 0x2ee   : > { %v2508_v62 = vadd.f32 %v2507_v51, %v2506_v48 }
 0x2fe   : > { %v2796_v5 = vpop.f32.mrf.mxu1 }
 0x2ff   : > { %2559 = vst.msk [vmem:[%s4047_s11 + $0xb8] sm:$0xff] %vm378_vm0, %v2796_v5  ;;  %v2457_v55 = vmul.f32 %v2796_v5, %v2796_v5  ;;  %v2409_v47 = vsel %vm378_vm0, %v2796_v5, 0.0 }
 0x300   : > { %v2315_v37 = vpop.f32.mrf.mxu1 }
 0x301   : > { %v2407_v24 = vsel %vm378_vm0, %v2315_v37, 0.0  ;;  %v2456_v31 = vmul.f32 %v2315_v37, %v2315_v37  ;;  %2558 = vst.msk [vmem:[%s4047_s11 + $0xb0] sm:$0xff] %vm378_vm0, %v2315_v37  ;;  %v2511_v8 = vsel %vm378_vm0, %v2457_v55, 0.0 }
 0x302   : > { %v2408_v15 = vadd.f32 %v2407_v24, %v2406_v45 }
 0x303   : > { %v2509_v29 = vsel %vm378_vm0, %v2456_v31, 0.0 }
 0x304   : > { %v2510_v28 = vadd.f32 %v2509_v29, %v2508_v62  ;;  %v2410_v35 = vadd.f32 %v2409_v47, %v2408_v15 }
 0x306   : > { %v2512_v56 = vadd.f32 %v2511_v8, %v2510_v28 }
 0x316   : > { %v2799_v4 = vpop.f32.mrf.mxu1 }
 0x317   : > { %2561 = vst.msk [vmem:[%s4047_s11 + $0xc8] sm:$0xff] %vm378_vm0, %v2799_v4  ;;  %v2459_v9 = vmul.f32 %v2799_v4, %v2799_v4  ;;  %v2413_v44 = vsel %vm378_vm0, %v2799_v4, 0.0 }
 0x318   : > { %v2325_v38 = vpop.f32.mrf.mxu1 }
 0x319   : > { %2560 = vst.msk [vmem:[%s4047_s11 + $0xc0] sm:$0xff] %vm378_vm0, %v2325_v38  ;;  %v2458_v16 = vmul.f32 %v2325_v38, %v2325_v38  ;;  %v2411_v11 = vsel %vm378_vm0, %v2325_v38, 0.0  ;;  %v2515_v10 = vsel %vm378_vm0, %v2459_v9, 0.0 }
 0x31a   : > { %v2412_v32 = vadd.f32 %v2411_v11, %v2410_v35 }
 0x31b   : > { %v2513_v36 = vsel %vm378_vm0, %v2458_v16, 0.0 }
 0x31c   : > { %v2514_v41 = vadd.f32 %v2513_v36, %v2512_v56  ;;  %v2414_v63 = vadd.f32 %v2413_v44, %v2412_v32 }
 0x31e   : > { %v2516_v30 = vadd.f32 %v2515_v10, %v2514_v41 }
 0x32e   : > { %v2802_v53 = vpop.f32.mrf.mxu1 }
 0x32f   : > { %2563 = vst.msk [vmem:[%s4047_s11 + $0xd8] sm:$0xff] %vm378_vm0, %v2802_v53  ;;  %v2461_v2 = vmul.f32 %v2802_v53, %v2802_v53  ;;  %v2417_v39 = vsel %vm378_vm0, %v2802_v53, 0.0 }
 0x330   : > { %v2335_v13 = vpop.f32.mrf.mxu1 }
 0x331   : > { %2562 = vst.msk [vmem:[%s4047_s11 + $0xd0] sm:$0xff] %vm378_vm0, %v2335_v13  ;;  %v2460_v50 = vmul.f32 %v2335_v13, %v2335_v13  ;;  %v2415_v43 = vsel %vm378_vm0, %v2335_v13, 0.0  ;;  %v2519_v17 = vsel %vm378_vm0, %v2461_v2, 0.0 }
 0x332   : > { %v2416_v61 = vadd.f32 %v2415_v43, %v2414_v63 }
 0x333   : > { %v2517_v57 = vsel %vm378_vm0, %v2460_v50, 0.0 }
 0x334   : > { %v2518_v12 = vadd.f32 %v2517_v57, %v2516_v30  ;;  %v2418_v22 = vadd.f32 %v2417_v39, %v2416_v61 }
 0x336   : > { %v2520_v25 = vadd.f32 %v2519_v17, %v2518_v12 }
 0x346   : > { %v2805_v49 = vpop.f32.mrf.mxu1 }
 0x347   : > { %2565 = vst.msk [vmem:[%s4047_s11 + $0xe8] sm:$0xff] %vm378_vm0, %v2805_v49  ;;  %v2463_v27 = vmul.f32 %v2805_v49, %v2805_v49  ;;  %v2421_v60 = vsel %vm378_vm0, %v2805_v49, 0.0 }
 0x348   : > { %v2345_v20 = vpop.f32.mrf.mxu1 }
 0x349   : > { %2564 = vst.msk [vmem:[%s4047_s11 + $0xe0] sm:$0xff] %vm378_vm0, %v2345_v20  ;;  %v2462_v19 = vmul.f32 %v2345_v20, %v2345_v20  ;;  %v2419_v34 = vsel %vm378_vm0, %v2345_v20, 0.0  ;;  %v2523_v14 = vsel %vm378_vm0, %v2463_v27, 0.0 }
 0x34a   : > { %v2420_v23 = vadd.f32 %v2419_v34, %v2418_v22 }
 0x34b   : > { %v2521_v54 = vsel %vm378_vm0, %v2462_v19, 0.0 }
 0x34c   : > { %v2522_v1 = vadd.f32 %v2521_v54, %v2520_v25  ;;  %v2422_v0 = vadd.f32 %v2421_v60, %v2420_v23 }
 0x34e   : > { %v2524_v7 = vadd.f32 %v2523_v14, %v2522_v1 }
 0x359   : > { %v2808_v40 = vpop.f32.mrf.mxu1 }
 0x35a   : > { %2567 = vst.msk [vmem:[%s4047_s11 + $0xf8] sm:$0xff] %vm378_vm0, %v2808_v40  ;;  %v2465_v59 = vmul.f32 %v2808_v40, %v2808_v40  ;;  %v2425_v18 = vsel %vm378_vm0, %v2808_v40, 0.0 }
 0x35b   : > { %v2355_v21 = vpop.f32.mrf.mxu1 }
 0x35c   : > { %v2423_v58 = vsel %vm378_vm0, %v2355_v21, 0.0  ;;  %v2464_v52 = vmul.f32 %v2355_v21, %v2355_v21  ;;  %2566 = vst.msk [vmem:[%s4047_s11 + $0xf0] sm:$0xff] %vm378_vm0, %v2355_v21  ;;  %v2527_v42 = vsel %vm378_vm0, %v2465_v59, 0.0 }
 0x35d   : > { %v2424_v3 = vadd.f32 %v2423_v58, %v2422_v0 }
 0x35e   : > { %v2525_v26 = vsel %vm378_vm0, %v2464_v52, 0.0 }
 0x35f   : > { %v2426_v46 = vadd.f32 %v2425_v18, %v2424_v3  ;;  %v2526_v33 = vadd.f32 %v2525_v26, %v2524_v7 }
 0x361   : > { %v2427_v6 = vrot.slane %v2426_v46, 4  ;;  %v2528_v48 = vadd.f32 %v2527_v42, %v2526_v33 }
 0x363   : > { %v2428_v45 = vadd.f32 %v2427_v6, %v2426_v46  ;;  %v2529_v51 = vrot.slane %v2528_v48, 4 }
 0x365   : > { %v2429_v62 = vrot.slane %v2428_v45, 2  ;;  %v2530_v5 = vadd.f32 %v2529_v51, %v2528_v48 }
 0x367   : > { %v2430_v37 = vadd.f32 %v2429_v62, %v2428_v45  ;;  %v2531_v55 = vrot.slane %v2530_v5, 2 }
 0x369   : > { %v2431_v24 = vrot.slane %v2430_v37, 1  ;;  %v2532_v31 = vadd.f32 %v2531_v55, %v2530_v5 }
 0x36b   : > { %v2432_v15 = vadd.f32 %v2431_v24, %v2430_v37  ;;  %v2533_v47 = vrot.slane %v2532_v31, 1 }
 0x36d   : > { %2433 = vst.msk [vmem:[%s235_s17] sm:$0x1] %vm387_vm2, %v2432_v15  ;;  %v2534_v29 = vadd.f32 %v2533_v47, %v2532_v31 }
 0x36f   : > { %2535 = vst.msk [vmem:[%s235_s17 + $0x1] sm:$0x1] %vm387_vm2, %v2534_v29 }
 0x370 PF: > { %s16_s18 = sadd.s32 1, %s2863_s18  }
 0x371   : > { %p13_p4 = scmp.ge.s32.totalorder %s16_s18, 4  }
 0x373   :  { %15 = sbr.rel (!%p13_p4) target bundleno = 1 (0x1), region = 81 }

</bundles_post_ra>
